<compile_context>
chip_gen: v7x
topology: tpu7x:2x2x1
jax: 0.10.0
libtpu: 0.0.40
codegen_flags: <defaults>
</compile_context>

<pallas_src>
import math

import jax
import jax.numpy as jnp
from jax.experimental import pallas as pl
from jax.experimental.pallas import tpu as pltpu


def _mse_clamp_kernel(pred_ref, true_ref, w_ref, out_ref):
    diff = pred_ref[...] - true_ref[...]
    w_clamped = jnp.clip(w_ref[...], 0.0, 1.0)
    out_ref[...] = (diff * diff) * w_clamped


_LANE = 128
# Below this per-input size the pallas_call launch dominates; XLA's fused
# elementwise is already at HBM roofline for this op.
_MIN_PALLAS_BYTES = 1 << 20


def _reference(y_pred, y_true, y_weights):
    return (y_pred - y_true) ** 2 * jnp.clip(y_weights, 0.0, 1.0)


def mse_clamp_loss(y_pred, y_true, y_weights):
    assert y_pred.shape == y_true.shape == y_weights.shape, (
        "all inputs must share the same shape (broadcasting not supported)"
    )
    orig_shape = y_pred.shape
    dtype = jnp.result_type(y_pred.dtype, y_true.dtype, y_weights.dtype)
    itemsize = jnp.dtype(dtype).itemsize
    total = math.prod(orig_shape) if orig_shape else 1

    # Fallbacks: tiny inputs, or an element count not a multiple of 128.
    # We never pad: padding 3 inputs + slicing the output would ~3x HBM traffic.
    if total * itemsize < _MIN_PALLAS_BYTES or total % _LANE != 0:
        return _reference(y_pred, y_true, y_weights)

    # dtype-aware sublane packing.
    sublane = {4: 8, 2: 16, 1: 32}.get(itemsize, 8)

    # Lane-dense width: largest multiple-of-128 divisor of `total` from the
    # candidate set, so the flat reshape is exact (zero copies).
    cols = _LANE
    for c in (2048, 1024, 512, 256):
        if total % c == 0:
            cols = c
            break
    rows = total // cols

    # ---- tile sizing: ~4 MiB per array per tile ---------------------------
    target_tile_bytes = 4 << 20
    block_rows = max(
        sublane, (target_tile_bytes // (cols * itemsize)) // sublane * sublane
    )
    # Guarantee >= 2 grid steps (v7x has 2 TCs) whenever there is enough data.
    if rows >= 2 * sublane:
        half = (rows // 2) // sublane * sublane
        block_rows = min(block_rows, half)
    if block_rows >= rows:
        block_rows = rows  # single full-extent block (legal per BlockSpec rules)

    # Last row-block may be ragged; Pallas masks OOB reads/writes.
    grid_rows = pl.cdiv(rows, block_rows)

    # ---- VMEM budget: 4 streams x 2 buffers x tile, +30% headroom ---------
    tile_bytes = block_rows * cols * itemsize
    vmem_limit = int(tile_bytes * 4 * 2 * 1.3) + (1 << 20)
    vmem_limit = min(max(vmem_limit, 16 << 20), 48 << 20)  # < v7x 64 MiB per TC

    spec = pl.BlockSpec((block_rows, cols), lambda i: (i, 0))

    cost = pl.CostEstimate(
        flops=5 * total,                       # sub, square, weight-mul, min+max
        transcendentals=0,
        bytes_accessed=4 * total * itemsize,   # 3 reads + 1 write, no padding
    )

    p2 = y_pred.astype(dtype).reshape(rows, cols)
    t2 = y_true.astype(dtype).reshape(rows, cols)
    w2 = y_weights.astype(dtype).reshape(rows, cols)

    out2 = pl.pallas_call(
        _mse_clamp_kernel,
        out_shape=jax.ShapeDtypeStruct((rows, cols), dtype),
        grid_spec=pltpu.PrefetchScalarGridSpec(
            num_scalar_prefetch=0,
            grid=(grid_rows,),
            in_specs=[spec, spec, spec],
            out_specs=spec,
        ),
        compiler_params=pltpu.CompilerParams(
            dimension_semantics=("parallel",),
            vmem_limit_bytes=vmem_limit,
        ),
        cost_estimate=cost,
    )(p2, t2, w2)

    return out2.reshape(orig_shape)


if __name__ == "__main__":
    key = jax.random.PRNGKey(0)
    k1, k2, k3 = jax.random.split(key, 3)

    # 1) Small, module-consistent NCHW shape (exercises the tiny-input fast path).
    shape_small = (2, 4, 16, 16)
    yp_s = jax.random.normal(k1, shape_small, dtype=jnp.float32)
    yt_s = jax.random.normal(k2, shape_small, dtype=jnp.float32)
    yw_s = jax.random.uniform(
        k3, shape_small, dtype=jnp.float32, minval=-0.5, maxval=1.5
    )
    out_s = jax.block_until_ready(mse_clamp_loss(yp_s, yt_s, yw_s))
    ref_s = _reference(yp_s, yt_s, yw_s)
    assert out_s.shape == shape_small and out_s.dtype == jnp.float32
    assert jnp.allclose(out_s, ref_s, atol=1e-6, rtol=1e-6)

    # 2) Larger shape that actually runs the Pallas kernel (2 MiB/input,
    #    cols=2048, grid of 2 parallel row-blocks).
    shape_big = (4, 8, 128, 128)
    yp_b = jax.random.normal(k1, shape_big, dtype=jnp.float32)
    yt_b = jax.random.normal(k2, shape_big, dtype=jnp.float32)
    yw_b = jax.random.uniform(
        k3, shape_big, dtype=jnp.float32, minval=-0.5, maxval=1.5
    )
    out_b = jax.block_until_ready(mse_clamp_loss(yp_b, yt_b, yw_b))
    ref_b = _reference(yp_b, yt_b, yw_b)
    assert out_b.shape == shape_big and out_b.dtype == jnp.float32
    assert jnp.allclose(out_b, ref_b, atol=1e-6, rtol=1e-6)

    print("KERNEL_OK")
</pallas_src>

<mosaic_0001>
module attributes {stable_mosaic.version = 11 : i64} {
  func.func @_mse_clamp_kernel(%arg0: i32, %arg1: memref<128x2048xf32, #tpu.memory_space<vmem>>, %arg2: memref<128x2048xf32, #tpu.memory_space<vmem>>, %arg3: memref<128x2048xf32, #tpu.memory_space<vmem>>, %arg4: memref<128x2048xf32, #tpu.memory_space<vmem>>) attributes {dimension_semantics = [#tpu.dimension_semantics<parallel>], iteration_bounds = array<i64: 2>, scalar_prefetch = 0 : i64, scratch_operands = 0 : i64, tpu.core_type = #tpu.core_type<tc>, window_params = [{transform_indices = @transform_0, window_bounds = array<i64: 128, 2048>}, {transform_indices = @transform_1, window_bounds = array<i64: 128, 2048>}, {transform_indices = @transform_2, window_bounds = array<i64: 128, 2048>}, {transform_indices = @transform_3, window_bounds = array<i64: 128, 2048>}]} {
    %c0 = arith.constant 0 : index
    %c0_0 = arith.constant 0 : index
    %0 = vector.load %arg1[%c0, %c0_0] : memref<128x2048xf32, #tpu.memory_space<vmem>>, vector<128x2048xf32>
    %c0_1 = arith.constant 0 : index
    %c0_2 = arith.constant 0 : index
    %1 = vector.load %arg2[%c0_1, %c0_2] : memref<128x2048xf32, #tpu.memory_space<vmem>>, vector<128x2048xf32>
    %2 = arith.subf %0, %1 : vector<128x2048xf32>
    %c0_3 = arith.constant 0 : index
    %c0_4 = arith.constant 0 : index
    %3 = vector.load %arg3[%c0_3, %c0_4] : memref<128x2048xf32, #tpu.memory_space<vmem>>, vector<128x2048xf32>
    %cst = arith.constant 0.000000e+00 : f32
    %cst_5 = arith.constant 1.000000e+00 : f32
    %4 = vector.broadcast %cst : f32 to vector<128x2048xf32>
    %5 = arith.maximumf %4, %3 : vector<128x2048xf32>
    %6 = vector.broadcast %cst_5 : f32 to vector<128x2048xf32>
    %7 = arith.minimumf %6, %5 : vector<128x2048xf32>
    %8 = arith.mulf %2, %2 : vector<128x2048xf32>
    %9 = arith.mulf %8, %7 : vector<128x2048xf32>
    %c0_6 = arith.constant 0 : index
    %c0_7 = arith.constant 0 : index
    %10 = vector.load %arg4[%c0_6, %c0_7] : memref<128x2048xf32, #tpu.memory_space<vmem>>, vector<128x2048xf32>
    tpu.vector_store %arg4[%c0_6, %c0_7], %9 {strides = array<i32>} : memref<128x2048xf32, #tpu.memory_space<vmem>>, vector<128x2048xf32>,
    return
  }
  func.func @transform_0(%arg0: i32) -> (i32, i32) {
    %c0_i32 = arith.constant 0 : i32
    %c0_i32_0 = arith.constant 0 : i32
    return %arg0, %c0_i32 : i32, i32
  }
  func.func @transform_1(%arg0: i32) -> (i32, i32) {
    %c0_i32 = arith.constant 0 : i32
    %c0_i32_0 = arith.constant 0 : i32
    return %arg0, %c0_i32 : i32, i32
  }
  func.func @transform_2(%arg0: i32) -> (i32, i32) {
    %c0_i32 = arith.constant 0 : i32
    %c0_i32_0 = arith.constant 0 : i32
    return %arg0, %c0_i32 : i32, i32
  }
  func.func @transform_3(%arg0: i32) -> (i32, i32) {
    %c0_i32 = arith.constant 0 : i32
    %c0_i32_0 = arith.constant 0 : i32
    return %arg0, %c0_i32 : i32, i32
  }
}

</mosaic_0001>

<bundles_post_ra>
// kernel: tpu_custom_call.1
= control target key start
LH: loop header
LB: loop body
LE: loop exit
PB: predicated region body
PF: predicated region fallthrough
CT: control target
= control target key end

     0   :  { %s4286_s0 = inlined_call_operand.hbm [shape: f32[256,2048], index: 0, kind: input, shape index: {}]   ;;  %s4287_s1 = inlined_call_operand.hbm [shape: f32[256,2048], index: 1, kind: input, shape index: {}]   ;;  %s4288_s2 = inlined_call_operand.hbm [shape: f32[256,2048], index: 2, kind: input, shape index: {}]   ;;  %s4289_s3 = inlined_call_operand.hbm [shape: f32[256,2048], index: 3, kind: output, shape index: {}]  }
   0x1   :  { %4296 = sst [smem:[#allocation12_spill]] %s4286_s0 }
   0x2   :  { %8 = vsyncpa [#allocation3], 0 }
   0x3   :  { %10 = vsyncpa [#allocation3 + $0x1], 0 }
   0x4   :  { %11 = vsyncpa [#allocation6], 0 }
   0x5   :  { %13 = vsyncpa [#allocation6 + $0x1], 0 }
   0x6   :  { %14 = vsyncpa [#allocation4], 0 }
   0x7   :  { %16 = vsyncpa [#allocation4 + $0x1], 0  ;;  %s2992_s12 = smov 0   ;;  %s2994_s13 = smov 0  }
   0x8   :  { %s2996_s14 = smov 0   ;;  %s2998_s15 = smov 0  }
   0x9 LB: > { %s3013_s16 = sadd.s32 4294967295, %s2962_s15   ;;  %s2708_s17 = sadd.s32 4294967294, %s2962_s15   ;;  %s2962_s15 = sphi %s2998_s15, %s4315_s15   ;;  %s2958_s14 = sphi %s2996_s14, %s4314_s14   ;;  %s2954_s13 = sphi %s2994_s13, %s4313_s13   ;;  %s2950_s12 = sphi %s2992_s12, %s4312_s12  }
   0xa   : > { %s3017_s18 = sadd.s32 1, %s2962_s15   ;;  %s29_s19 = sadd.s32 1, %s2958_s14 }
   0xb   : > { %s26_s20 = ssub.s32 %s2962_s15, %s3017_s18  ;;  %p36_p0 = scmp.ne.s32.totalorder %s2958_s14, %s2954_s13 }
   0xc   : > { %p27_p1 = scmp.eq.s32.totalorder %s26_s20, 0  ;;  %p37_p2 = scmp.eq.s32.totalorder %s2962_s15, 0 }
   0xd   : > { %p42_p3 = scmp.ne.s32.totalorder %s2954_s13, %s2950_s12  ;;  %p43_p4 = scmp.eq.s32.totalorder %s3013_s16, 0 }
   0xe   : > { %s3029_s21 = scalar_select %p27_p1, %s2958_s14, %s29_s19  }
   0xf   : > { %p38_p5 = por %p37_p2, %p36_p0  ;;  %p3031_p6 = por %p43_p4, %p42_p3 }
  0x10   : > { %p118_p7 = scmp.eq.s32.totalorder %s3013_s16, 1  ;;  %p124_p8 = scmp.eq.s32.totalorder %s2708_s17, 1 }
  0x11   : > { %s4297_s22 = scalar_select %p3031_p6, 1, 0 }
  0x12   : > { %p2764_p10 = scmp.lt.s32.totalorder %s2962_s15, 2  ;;  %p3038_p11 = por %p118_p7, %p36_p0 }
  0x13   : > { %p3042_p12 = por %p124_p8, %p42_p3  ;;  %s144_s25 = sand.u32 1, %s2958_s14  }
  0x14   : > { %s4298_s23 = scalar_select %p3038_p11, 1, 0 }
  0x15   : > { %s4299_s24 = scalar_select %p3042_p12, 1, 0 }
  0x16   : > { %s3048_s26 = sshll.u32 %s2962_s15, 15  ;;  %s3052_s27 = sshll.u32 %s144_s25, 11 }
  0x17   : > { %p3054_p13 = pnand %p2764_p10, %p38_p5  ;;  %s166_s29 = sand.u32 1, %s2962_s15  }
  0x18   : > { %s3063_s5 = scalar_lea.hbm %s4287_s1, %s3048_s26  ;;  %s170_s6 = scalar_lea.vmem [#allocation5], %s3052_s27 }
  0x19   : > { %s178_s7 = sshll.u32 %s170_s6, 4  ;;  %s3069_s8 = scalar_lea.sflag [#allocation6], %s166_s29  ;;  %s3066_s7 = int_to_ptr.vmem [resolvable:$true] %s178_s7 }
  0x1a   : > { %s2802_s9 = scalar_lea.hbm %s3063_s5, 32768  ;;  %p3075_p2 = pneg %p3054_p13 }
  0x1b   : > { %p2803_p1 = scmp.ne.s32.totalorder %s3063_s5, %s2802_s9  ;;  %s2807_s19 = scalar_lea.hbm %s4287_s1, 65536 }
  0x1c   : > { %p2808_p5 = scmp.lt.u32.totalorder %s3063_s5, %s4287_s1  ;;  %p2809_p7 = scmp.lt.u32.totalorder %s2807_s19, %s2802_s9 }
  0x1d   : > { %p2805_p3 = pnand %p3075_p2, %p2803_p1  ;;  %p2811_p10 = scmp.lt.u32.totalorder %s2802_s9, %s3063_s5 }
  0x1e   : > { %p2810_p8 = por %p2809_p7, %p2808_p5 }
  0x1f   : > { %p2806_p4 = pneg %p2805_p3 }
  0x20   : > { %p2812_p9 = por %p2811_p10, %p2810_p8 }
  0x22   : > { %p2813_p0 = pnand %p2812_p9, %p2806_p4 }
  0x24   : > { %2816 = shalt.err (!%p2813_p0)
}
  0x25   : > { %s2817_s29 = scalar_lea.vmem %s3066_s7, 32768  ;;  %s2964_s4 = smov [#allocation5]  }
  0x26   : > { %p2818_p1 = scmp.ne.s32.totalorder %s3066_s7, %s2817_s29  ;;  %s2822_s6 = sshll.u32 %s2964_s4, 4  ;;  %s2823_s6 = int_to_ptr.vmem [resolvable:$false] %s2822_s6 }
  0x27   : > { %s2824_s11 = scalar_lea.vmem %s2823_s6, 65536  ;;  %p2825_p11 = scmp.lt.s32.totalorder %s3066_s7, %s2823_s6 }
  0x28   : > { %p2820_p3 = pnand %p2818_p1, %p3075_p2  ;;  %p2826_p6 = scmp.lt.s32.totalorder %s2824_s11, %s2817_s29 }
  0x2a   : > { %p2821_p12 = pneg %p2820_p3  ;;  %p2827_p5 = por %p2826_p6, %p2825_p11 }
  0x2c   : > { %p2828_p7 = pnand %p2827_p5, %p2821_p12 }
  0x2e   : > { %2831 = shalt.err (!%p2828_p7)
}
  0x2f   : > { %s4292_s9 = smov 2048   ;;  %s4294_s17 = smov 128  }
  0x30   : > { %2756 = dma.hbm_to_vmem [thread:$0]  (!%p3054_p13), %s3063_s5, 32768, %s3066_s7, %s3069_s8, %s4292_s9, %s4292_s9, %s4294_s17  }
  0x31   : > { %p208_p6 = scmp.lt.s32.totalorder %s2962_s15, 3  ;;  %s4302_s0 = sld [smem:[#allocation12_spill]] }
  0x32   : > { %p4303_p9 = scmp.ge.s32.totalorder %s2962_s15, 1  ;;  %s148_s4 = scalar_lea.vmem [#allocation2], %s3052_s27 }
  0x33   : > { %s156_s6 = sshll.u32 %s148_s4, 4  ;;  %s3120_s5 = scalar_lea.sflag [#allocation3], %s144_s25  ;;  %s3116_s6 = int_to_ptr.vmem [resolvable:$true] %s156_s6 }
  0x34   : > { %p3111_p11 = pnand %p4303_p9, %p208_p6 }
  0x36   : > { %s4304_s29 = scalar_select %p3111_p11, 1, 0 }
  0x37   : > { %s3107_s30 = scalar_lea.hbm %s4302_s0, %s3048_s26  ;;  %s2837_s20 = scalar_lea.hbm %s4302_s0, 65536 }
  0x38   : > { %s2832_s7 = scalar_lea.hbm %s3107_s30, 32768  ;;  %p2838_p8 = scmp.lt.u32.totalorder %s3107_s30, %s4302_s0 }
  0x39   : > { %p2833_p12 = scmp.ne.s32.totalorder %s3107_s30, %s2832_s7  ;;  %p2839_p10 = scmp.lt.u32.totalorder %s2837_s20, %s2832_s7 }
  0x3a   : > { %p2841_p3 = scmp.lt.u32.totalorder %s2832_s7, %s3107_s30 }
  0x3b   : > { %p2835_p0 = pnand %p2833_p12, %p3075_p2  ;;  %p2840_p1 = por %p2839_p10, %p2838_p8 }
  0x3d   : > { %p2836_p4 = pneg %p2835_p0  ;;  %p2842_p5 = por %p2841_p3, %p2840_p1 }
  0x3f   : > { %p2843_p7 = pnand %p2842_p5, %p2836_p4 }
  0x41   : > { %2846 = shalt.err (!%p2843_p7)
}
  0x42   : > { %s2847_s25 = scalar_lea.vmem %s3116_s6, 32768  ;;  %s2967_s4 = smov [#allocation2]  }
  0x43   : > { %p2848_p6 = scmp.ne.s32.totalorder %s3116_s6, %s2847_s25  ;;  %s2852_s11 = sshll.u32 %s2967_s4, 4  ;;  %s2853_s11 = int_to_ptr.vmem [resolvable:$false] %s2852_s11 }
  0x44   : > { %s2854_s9 = scalar_lea.vmem %s2853_s11, 65536  ;;  %p2855_p0 = scmp.lt.s32.totalorder %s3116_s6, %s2853_s11 }
  0x45   : > { %p2850_p9 = pnand %p2848_p6, %p3075_p2  ;;  %p2856_p11 = scmp.lt.s32.totalorder %s2854_s9, %s2847_s25 }
  0x47   : > { %p2851_p12 = pneg %p2850_p9  ;;  %p2857_p8 = por %p2856_p11, %p2855_p0 }
  0x49   : > { %p2858_p10 = pnand %p2857_p8, %p2851_p12 }
  0x4b   : > { %2861 = shalt.err (!%p2858_p10)
}
  0x4c   : > { %s4305_s17 = smov 128   ;;  %s4306_s7 = smov 2048  }
  0x4d   : > { %2753 = dma.hbm_to_vmem [thread:$0]  (!%p3054_p13), %s3107_s30, 32768, %s3116_s6, %s3120_s5, %s4306_s7, %s4306_s7, %s4305_s17  }
  0x4e   : > { %s3151_s4 = scalar_lea.hbm %s4288_s2, %s3048_s26  ;;  %s192_s25 = scalar_lea.vmem [#allocation7], %s3052_s27 }
  0x4f   : > { %s200_s11 = sshll.u32 %s192_s25, 4  ;;  %s2862_s9 = scalar_lea.hbm %s3151_s4, 32768  ;;  %s3154_s11 = int_to_ptr.vmem [resolvable:$true] %s200_s11 }
  0x50   : > { %p2863_p11 = scmp.ne.s32.totalorder %s3151_s4, %s2862_s9  ;;  %s2867_s6 = scalar_lea.hbm %s4288_s2, 65536 }
  0x51   : > { %p2868_p3 = scmp.lt.u32.totalorder %s3151_s4, %s4288_s2  ;;  %p2869_p5 = scmp.lt.u32.totalorder %s2867_s6, %s2862_s9 }
  0x52   : > { %p2865_p4 = pnand %p2863_p11, %p3075_p2  ;;  %p2871_p6 = scmp.lt.u32.totalorder %s2862_s9, %s3151_s4 }
  0x53   : > { %p2870_p7 = por %p2869_p5, %p2868_p3 }
  0x54   : > { %p2866_p1 = pneg %p2865_p4 }
  0x55   : > { %p2872_p9 = por %p2871_p6, %p2870_p7 }
  0x57   : > { %p2873_p12 = pnand %p2872_p9, %p2866_p1 }
  0x59   : > { %2876 = shalt.err (!%p2873_p12)
}
  0x5a   : > { %s2877_s27 = scalar_lea.vmem %s3154_s11, 32768  ;;  %s2968_s0 = smov [#allocation7]  }
  0x5b   : > { %p2878_p0 = scmp.ne.s32.totalorder %s3154_s11, %s2877_s27  ;;  %s2882_s19 = sshll.u32 %s2968_s0, 4  ;;  %s2883_s19 = int_to_ptr.vmem [resolvable:$false] %s2882_s19 }
  0x5c   : > { %s2884_s20 = scalar_lea.vmem %s2883_s19, 65536  ;;  %p2885_p11 = scmp.lt.s32.totalorder %s3154_s11, %s2883_s19 }
  0x5d   : > { %p2880_p8 = pnand %p2878_p0, %p3075_p2  ;;  %p2886_p4 = scmp.lt.s32.totalorder %s2884_s20, %s2877_s27 }
  0x5f   : > { %p2881_p10 = pneg %p2880_p8  ;;  %p2887_p3 = por %p2886_p4, %p2885_p11 }
  0x61   : > { %p2888_p5 = pnand %p2887_p3, %p2881_p10 }
  0x63   : > { %2891 = shalt.err (!%p2888_p5)
}
  0x64   : > { %2759 = dma.hbm_to_vmem [thread:$0]  (!%p3054_p13), %s3151_s4, 32768, %s3154_s11, %s3069_s8, %s4306_s7, %s4306_s7, %s4305_s17  }
  0x65   : > { %p4307_p2 = scmp.ne.s32.totalorder %s4304_s29, 0 }
  0x66   : > { %s3184_s10 = sand.u32 (!%p4307_p2), 1, %s2954_s13   ;;  %p4308_p1 = scmp.ne.s32.totalorder (!%p4307_p2), %s4297_s22, 0 }
  0x67   : > { %212 = sbr.rel (%p4307_p2) target bundleno = 455 (0x1c7), region = 32  ;;  %s3187_s25 = sshll.u32 (!%p4307_p2), %s3184_s10, 11 }
  0x68   : > { %s215_s28 = scalar_lea.sflag (!%p4307_p2), [#allocation3], %s3184_s10  ;;  %s3191_s9 = scalar_lea.vmem (!%p4307_p2), [#allocation2], %s3187_s25 }
  0x6e   : > { %2937 = dma.done.wait (%p4308_p1), %s215_s28, 32768  }
  0x6f   : > { %2939 = vsyncadd (%p4308_p1), %s215_s28, 4294934528  ;;  %s223_s8 = sand.u32 1, %s3013_s16   ;;  %s3199_s17 = scalar_lea.vmem [#allocation5], %s3187_s25 }
  0x70   : > { %s224_s29 = scalar_lea.sflag [#allocation6], %s223_s8 }
  0x71   : > { %2941 = dma.done.wait (%p4308_p1), %s224_s29, 65536  }
  0x72   : > { %2943 = vsyncadd (%p4308_p1), %s224_s29, 4294901760  ;;  %v273_v0 = vld [vmem:[%s3191_s9] sm:$0xff]  ;;  %s3208_s7 = scalar_lea.vmem [#allocation7], %s3187_s25  ;;  %v274_v5 = vld [vmem:[%s3191_s9 + $0x8] sm:$0xff]  ;;  %s3230_s22 = scalar_lea.vmem [#allocation8], %s3187_s25 }
  0x73   : > { %v529_v1 = vld [vmem:[%s3199_s17] sm:$0xff]  ;;  %v530_v6 = vld [vmem:[%s3199_s17 + $0x8] sm:$0xff]  ;;  %v275_v10 = vld [vmem:[%s3191_s9 + $0x10] sm:$0xff]  ;;  %s2741_s4 = sshll.u32 %s3013_s16, 15  ;;  %s2592_s11 = sshll.u32 %s3230_s22, 4  ;;  %s4239_s11 = int_to_ptr.vmem [resolvable:$true] %s2592_s11 }
  0x74   : > { %v1041_v2 = vld [vmem:[%s3208_s7] sm:$0xff]  ;;  %v785_v3 = vsub.f32 %v273_v0, %v529_v1  ;;  %v1042_v7 = vld [vmem:[%s3208_s7 + $0x8] sm:$0xff]  ;;  %v786_v8 = vsub.f32 %v274_v5, %v530_v6  ;;  %v531_v11 = vld [vmem:[%s3199_s17 + $0x10] sm:$0xff]  ;;  %s4237_s5 = scalar_lea.hbm %s4289_s3, %s2741_s4  ;;  %s2578_s16 = scalar_lea.sflag [#allocation4], %s3184_s10 }
  0x75   : > { %v1297_v4 = vmax.f32 %v1041_v2, 0.0  ;;  %v1298_v9 = vmax.f32 %v1042_v7, 0.0  ;;  %v1043_v12 = vld [vmem:[%s3208_s7 + $0x10] sm:$0xff]  ;;  %v787_v15 = vsub.f32 %v275_v10, %v531_v11  ;;  %v276_v17 = vld [vmem:[%s3191_s9 + $0x18] sm:$0xff]  ;;  %v277_v24 = vld [vmem:[%s3191_s9 + $0x20] sm:$0xff]  ;;  %s2892_s26 = scalar_lea.vmem %s4239_s11, 32768 }
  0x76   : > { %v1809_v14 = vmul.f32 %v785_v3, %v785_v3  ;;  %v1299_v16 = vmax.f32 %v1043_v12, 0.0  ;;  %v532_v18 = vld [vmem:[%s3199_s17 + $0x18] sm:$0xff]  ;;  %v1810_v21 = vmul.f32 %v786_v8, %v786_v8  ;;  %v533_v25 = vld [vmem:[%s3199_s17 + $0x20] sm:$0xff]  ;;  %v278_v31 = vld [vmem:[%s3191_s9 + $0x28] sm:$0xff]  ;;  %p2893_p13 = scmp.ne.s32.totalorder %s4239_s11, %s2892_s26  ;;  %p4309_p7 = scmp.ne.s32.totalorder %s4298_s23, 0 }
  0x77   : > { %v1553_v13 = vmin.f32 %v1297_v4, 1.0  ;;  %v1044_v19 = vld [vmem:[%s3208_s7 + $0x18] sm:$0xff]  ;;  %v1554_v20 = vmin.f32 %v1298_v9, 1.0  ;;  %v788_v22 = vsub.f32 %v276_v17, %v532_v18  ;;  %v1045_v26 = vld [vmem:[%s3208_s7 + $0x20] sm:$0xff]  ;;  %v1811_v29 = vmul.f32 %v787_v15, %v787_v15  ;;  %v534_v32 = vld [vmem:[%s3199_s17 + $0x28] sm:$0xff]  ;;  %s2969_s27 = smov [#allocation8]  }
  0x78   : > { %v1300_v23 = vmax.f32 %v1044_v19, 0.0  ;;  %v1555_v28 = vmin.f32 %v1299_v16, 1.0  ;;  %v789_v30 = vsub.f32 %v277_v24, %v533_v25  ;;  %v1046_v33 = vld [vmem:[%s3208_s7 + $0x28] sm:$0xff]  ;;  %v1301_v37 = vmax.f32 %v1045_v26, 0.0  ;;  %v279_v38 = vld [vmem:[%s3191_s9 + $0x30] sm:$0xff]  ;;  %v280_v45 = vld [vmem:[%s3191_s9 + $0x38] sm:$0xff]  ;;  %p2894_p6 = pnand %p2893_p13, %p4309_p7 }
  0x79   : > { %v2065_v27 = vmul.f32 %v1809_v14, %v1553_v13  ;;  %v2066_v34 = vmul.f32 %v1810_v21, %v1554_v20  ;;  %v1812_v36 = vmul.f32 %v788_v22, %v788_v22  ;;  %v535_v39 = vld [vmem:[%s3199_s17 + $0x30] sm:$0xff]  ;;  %v790_v43 = vsub.f32 %v278_v31, %v534_v32  ;;  %v536_v46 = vld [vmem:[%s3199_s17 + $0x38] sm:$0xff]  ;;  %v281_v52 = vld [vmem:[%s3191_s9 + $0x40] sm:$0xff]  ;;  %s2896_s0 = sshll.u32 %s2969_s27, 4  ;;  %s2897_s0 = int_to_ptr.vmem [resolvable:$false] %s2896_s0 }
  0x7a   : > { %v1556_v35 = vmin.f32 %v1300_v23, 1.0  ;;  %v1047_v40 = vld [vmem:[%s3208_s7 + $0x30] sm:$0xff]  ;;  %v2067_v41 = vmul.f32 %v1811_v29, %v1555_v28  ;;  %v1813_v42 = vmul.f32 %v789_v30, %v789_v30  ;;  %v1302_v44 = vmax.f32 %v1046_v33, 0.0  ;;  %v1048_v47 = vld [vmem:[%s3208_s7 + $0x38] sm:$0xff]  ;;  %v537_v53 = vld [vmem:[%s3199_s17 + $0x40] sm:$0xff]  ;;  %p2895_p9 = pneg %p2894_p6  ;;  %s2898_s19 = scalar_lea.vmem %s2897_s0, 65536 }
  0x7b   : > { %2321 = vst [vmem:[%s3230_s22] sm:$0xff] %v2065_v27  ;;  %2322 = vst [vmem:[%s3230_s22 + $0x8] sm:$0xff] %v2066_v34  ;;  %v1557_v49 = vmin.f32 %v1301_v37, 1.0  ;;  %v791_v50 = vsub.f32 %v279_v38, %v535_v39  ;;  %v1303_v51 = vmax.f32 %v1047_v40, 0.0  ;;  %v1049_v54 = vld [vmem:[%s3208_s7 + $0x40] sm:$0xff]  ;;  %v1814_v56 = vmul.f32 %v790_v43, %v790_v43  ;;  %v282_v59 = vld [vmem:[%s3191_s9 + $0x48] sm:$0xff]  ;;  %p2899_p12 = scmp.lt.s32.totalorder %s4239_s11, %s2897_s0  ;;  %p2900_p0 = scmp.lt.s32.totalorder %s2898_s19, %s2892_s26 }
  0x7c   : > { %v2068_v48 = vmul.f32 %v1812_v36, %v1556_v35  ;;  %2323 = vst [vmem:[%s3230_s22 + $0x10] sm:$0xff] %v2067_v41  ;;  %v1558_v55 = vmin.f32 %v1302_v44, 1.0  ;;  %v792_v57 = vsub.f32 %v280_v45, %v536_v46  ;;  %v1304_v58 = vmax.f32 %v1048_v47, 0.0  ;;  %v538_v60 = vld [vmem:[%s3199_s17 + $0x48] sm:$0xff]  ;;  %v283_v2 = vld [vmem:[%s3191_s9 + $0x50] sm:$0xff]  ;;  %v284_v9 = vld [vmem:[%s3191_s9 + $0x58] sm:$0xff] }
  0x7d   : > { %v1050_v61 = vld [vmem:[%s3208_s7 + $0x48] sm:$0xff]  ;;  %v2069_v62 = vmul.f32 %v1813_v42, %v1557_v49  ;;  %v1559_v63 = vmin.f32 %v1303_v51, 1.0  ;;  %v1815_v0 = vmul.f32 %v791_v50, %v791_v50  ;;  %v793_v1 = vsub.f32 %v281_v52, %v537_v53  ;;  %v539_v3 = vld [vmem:[%s3199_s17 + $0x50] sm:$0xff]  ;;  %v540_v10 = vld [vmem:[%s3199_s17 + $0x58] sm:$0xff]  ;;  %p2901_p8 = por %p2900_p0, %p2899_p12 }
  0x7e   : > { %2324 = vst [vmem:[%s3230_s22 + $0x18] sm:$0xff] %v2068_v48  ;;  %v1051_v4 = vld [vmem:[%s3208_s7 + $0x50] sm:$0xff]  ;;  %v2070_v5 = vmul.f32 %v1814_v56, %v1558_v55  ;;  %v1560_v6 = vmin.f32 %v1304_v58, 1.0  ;;  %v1816_v7 = vmul.f32 %v792_v57, %v792_v57  ;;  %v1305_v8 = vmax.f32 %v1049_v54, 0.0  ;;  %v1052_v11 = vld [vmem:[%s3208_s7 + $0x58] sm:$0xff]  ;;  %v285_v16 = vld [vmem:[%s3191_s9 + $0x60] sm:$0xff] }
  0x7f   : > { %2325 = vst [vmem:[%s3230_s22 + $0x20] sm:$0xff] %v2069_v62  ;;  %v2071_v12 = vmul.f32 %v1815_v0, %v1559_v63  ;;  %v1817_v13 = vmul.f32 %v793_v1, %v793_v1  ;;  %v794_v14 = vsub.f32 %v282_v59, %v538_v60  ;;  %v1306_v15 = vmax.f32 %v1050_v61, 0.0  ;;  %v541_v17 = vld [vmem:[%s3199_s17 + $0x60] sm:$0xff]  ;;  %v286_v27 = vld [vmem:[%s3191_s9 + $0x68] sm:$0xff]  ;;  %v287_v34 = vld [vmem:[%s3191_s9 + $0x70] sm:$0xff]  ;;  %p2902_p10 = pnand %p2901_p8, %p2895_p9 }
  0x80   : > { %2326 = vst [vmem:[%s3230_s22 + $0x28] sm:$0xff] %v2070_v5  ;;  %v2072_v18 = vmul.f32 %v1816_v7, %v1560_v6  ;;  %v1561_v19 = vmin.f32 %v1305_v8, 1.0  ;;  %v795_v20 = vsub.f32 %v283_v2, %v539_v3  ;;  %v1307_v21 = vmax.f32 %v1051_v4, 0.0  ;;  %v1053_v22 = vld [vmem:[%s3208_s7 + $0x60] sm:$0xff]  ;;  %v542_v28 = vld [vmem:[%s3199_s17 + $0x68] sm:$0xff]  ;;  %v543_v35 = vld [vmem:[%s3199_s17 + $0x70] sm:$0xff] }
  0x81   : > { %2327 = vst [vmem:[%s3230_s22 + $0x30] sm:$0xff] %v2071_v12  ;;  %v1562_v23 = vmin.f32 %v1306_v15, 1.0  ;;  %v1818_v24 = vmul.f32 %v794_v14, %v794_v14  ;;  %v796_v25 = vsub.f32 %v284_v9, %v540_v10  ;;  %v1308_v26 = vmax.f32 %v1052_v11, 0.0  ;;  %v1054_v29 = vld [vmem:[%s3208_s7 + $0x68] sm:$0xff]  ;;  %v1055_v36 = vld [vmem:[%s3208_s7 + $0x70] sm:$0xff]  ;;  %v288_v41 = vld [vmem:[%s3191_s9 + $0x78] sm:$0xff] }
  0x82   : > { %2328 = vst [vmem:[%s3230_s22 + $0x38] sm:$0xff] %v2072_v18  ;;  %v2073_v30 = vmul.f32 %v1817_v13, %v1561_v19  ;;  %v1563_v31 = vmin.f32 %v1307_v21, 1.0  ;;  %v1819_v32 = vmul.f32 %v795_v20, %v795_v20  ;;  %v797_v33 = vsub.f32 %v285_v16, %v541_v17  ;;  %v544_v42 = vld [vmem:[%s3199_s17 + $0x78] sm:$0xff]  ;;  %v289_v48 = vld [vmem:[%s3191_s9 + $0x80] sm:$0xff]  ;;  %v290_v59 = vld [vmem:[%s3191_s9 + $0x88] sm:$0xff] }
  0x83   : > { %v2074_v37 = vmul.f32 %v1818_v24, %v1562_v23  ;;  %v1564_v38 = vmin.f32 %v1308_v26, 1.0  ;;  %v1820_v39 = vmul.f32 %v796_v25, %v796_v25  ;;  %v1309_v40 = vmax.f32 %v1053_v22, 0.0  ;;  %v1056_v43 = vld [vmem:[%s3208_s7 + $0x78] sm:$0xff]  ;;  %v545_v49 = vld [vmem:[%s3199_s17 + $0x80] sm:$0xff]  ;;  %v546_v60 = vld [vmem:[%s3199_s17 + $0x88] sm:$0xff] }
  0x84   : > { %2329 = vst [vmem:[%s3230_s22 + $0x40] sm:$0xff] %v2073_v30  ;;  %v2075_v44 = vmul.f32 %v1819_v32, %v1563_v31  ;;  %v1821_v45 = vmul.f32 %v797_v33, %v797_v33  ;;  %v798_v46 = vsub.f32 %v286_v27, %v542_v28  ;;  %v1310_v47 = vmax.f32 %v1054_v29, 0.0  ;;  %v1057_v54 = vld [vmem:[%s3208_s7 + $0x80] sm:$0xff]  ;;  %v1058_v61 = vld [vmem:[%s3208_s7 + $0x88] sm:$0xff]  ;;  %v291_v2 = vld [vmem:[%s3191_s9 + $0x90] sm:$0xff] }
  0x85   : > { %2330 = vst [vmem:[%s3230_s22 + $0x48] sm:$0xff] %v2074_v37  ;;  %v2076_v50 = vmul.f32 %v1820_v39, %v1564_v38  ;;  %v1565_v51 = vmin.f32 %v1309_v40, 1.0  ;;  %v799_v52 = vsub.f32 %v287_v34, %v543_v35  ;;  %v1311_v53 = vmax.f32 %v1055_v36, 0.0  ;;  %v547_v3 = vld [vmem:[%s3199_s17 + $0x90] sm:$0xff]  ;;  %v292_v9 = vld [vmem:[%s3191_s9 + $0x98] sm:$0xff]  ;;  %v293_v16 = vld [vmem:[%s3191_s9 + $0xa0] sm:$0xff] }
  0x86   : > { %2331 = vst [vmem:[%s3230_s22 + $0x50] sm:$0xff] %v2075_v44  ;;  %v1566_v55 = vmin.f32 %v1310_v47, 1.0  ;;  %v1822_v56 = vmul.f32 %v798_v46, %v798_v46  ;;  %v800_v57 = vsub.f32 %v288_v41, %v544_v42  ;;  %v1312_v58 = vmax.f32 %v1056_v43, 0.0  ;;  %v1059_v4 = vld [vmem:[%s3208_s7 + $0x90] sm:$0xff]  ;;  %v548_v10 = vld [vmem:[%s3199_s17 + $0x98] sm:$0xff]  ;;  %v549_v17 = vld [vmem:[%s3199_s17 + $0xa0] sm:$0xff] }
  0x87   : > { %2332 = vst [vmem:[%s3230_s22 + $0x58] sm:$0xff] %v2076_v50  ;;  %v2077_v62 = vmul.f32 %v1821_v45, %v1565_v51  ;;  %v1567_v63 = vmin.f32 %v1311_v53, 1.0  ;;  %v1823_v0 = vmul.f32 %v799_v52, %v799_v52  ;;  %v801_v1 = vsub.f32 %v289_v48, %v545_v49  ;;  %v1060_v11 = vld [vmem:[%s3208_s7 + $0x98] sm:$0xff]  ;;  %v1061_v22 = vld [vmem:[%s3208_s7 + $0xa0] sm:$0xff]  ;;  %v294_v27 = vld [vmem:[%s3191_s9 + $0xa8] sm:$0xff] }
  0x88   : > { %v2078_v5 = vmul.f32 %v1822_v56, %v1566_v55  ;;  %v1568_v6 = vmin.f32 %v1312_v58, 1.0  ;;  %v1824_v7 = vmul.f32 %v800_v57, %v800_v57  ;;  %v1313_v8 = vmax.f32 %v1057_v54, 0.0  ;;  %v550_v28 = vld [vmem:[%s3199_s17 + $0xa8] sm:$0xff]  ;;  %v295_v34 = vld [vmem:[%s3191_s9 + $0xb0] sm:$0xff]  ;;  %v296_v41 = vld [vmem:[%s3191_s9 + $0xb8] sm:$0xff] }
  0x89   : > { %2333 = vst [vmem:[%s3230_s22 + $0x60] sm:$0xff] %v2077_v62  ;;  %v2079_v12 = vmul.f32 %v1823_v0, %v1567_v63  ;;  %v1825_v13 = vmul.f32 %v801_v1, %v801_v1  ;;  %v802_v14 = vsub.f32 %v290_v59, %v546_v60  ;;  %v1314_v15 = vmax.f32 %v1058_v61, 0.0  ;;  %v1062_v29 = vld [vmem:[%s3208_s7 + $0xa8] sm:$0xff]  ;;  %v551_v35 = vld [vmem:[%s3199_s17 + $0xb0] sm:$0xff]  ;;  %v552_v42 = vld [vmem:[%s3199_s17 + $0xb8] sm:$0xff] }
  0x8a   : > { %2334 = vst [vmem:[%s3230_s22 + $0x68] sm:$0xff] %v2078_v5  ;;  %v2080_v18 = vmul.f32 %v1824_v7, %v1568_v6  ;;  %v1569_v19 = vmin.f32 %v1313_v8, 1.0  ;;  %v803_v20 = vsub.f32 %v291_v2, %v547_v3  ;;  %v1315_v21 = vmax.f32 %v1059_v4, 0.0  ;;  %v1063_v36 = vld [vmem:[%s3208_s7 + $0xb0] sm:$0xff]  ;;  %v1064_v43 = vld [vmem:[%s3208_s7 + $0xb8] sm:$0xff]  ;;  %v297_v48 = vld [vmem:[%s3191_s9 + $0xc0] sm:$0xff] }
  0x8b   : > { %2335 = vst [vmem:[%s3230_s22 + $0x70] sm:$0xff] %v2079_v12  ;;  %v1570_v23 = vmin.f32 %v1314_v15, 1.0  ;;  %v1826_v24 = vmul.f32 %v802_v14, %v802_v14  ;;  %v804_v25 = vsub.f32 %v292_v9, %v548_v10  ;;  %v1316_v26 = vmax.f32 %v1060_v11, 0.0  ;;  %v553_v49 = vld [vmem:[%s3199_s17 + $0xc0] sm:$0xff]  ;;  %v298_v59 = vld [vmem:[%s3191_s9 + $0xc8] sm:$0xff]  ;;  %v299_v2 = vld [vmem:[%s3191_s9 + $0xd0] sm:$0xff] }
  0x8c   : > { %2336 = vst [vmem:[%s3230_s22 + $0x78] sm:$0xff] %v2080_v18  ;;  %v2081_v30 = vmul.f32 %v1825_v13, %v1569_v19  ;;  %v1571_v31 = vmin.f32 %v1315_v21, 1.0  ;;  %v1827_v32 = vmul.f32 %v803_v20, %v803_v20  ;;  %v805_v33 = vsub.f32 %v293_v16, %v549_v17  ;;  %v1065_v54 = vld [vmem:[%s3208_s7 + $0xc0] sm:$0xff]  ;;  %v554_v60 = vld [vmem:[%s3199_s17 + $0xc8] sm:$0xff]  ;;  %v555_v3 = vld [vmem:[%s3199_s17 + $0xd0] sm:$0xff] }
  0x8d   : > { %v2082_v37 = vmul.f32 %v1826_v24, %v1570_v23  ;;  %v1572_v38 = vmin.f32 %v1316_v26, 1.0  ;;  %v1828_v39 = vmul.f32 %v804_v25, %v804_v25  ;;  %v1317_v40 = vmax.f32 %v1061_v22, 0.0  ;;  %v1066_v61 = vld [vmem:[%s3208_s7 + $0xc8] sm:$0xff]  ;;  %v1067_v4 = vld [vmem:[%s3208_s7 + $0xd0] sm:$0xff]  ;;  %v300_v9 = vld [vmem:[%s3191_s9 + $0xd8] sm:$0xff] }
  0x8e   : > { %2337 = vst [vmem:[%s3230_s22 + $0x80] sm:$0xff] %v2081_v30  ;;  %v2083_v44 = vmul.f32 %v1827_v32, %v1571_v31  ;;  %v1829_v45 = vmul.f32 %v805_v33, %v805_v33  ;;  %v806_v46 = vsub.f32 %v294_v27, %v550_v28  ;;  %v1318_v47 = vmax.f32 %v1062_v29, 0.0  ;;  %v556_v10 = vld [vmem:[%s3199_s17 + $0xd8] sm:$0xff]  ;;  %v301_v16 = vld [vmem:[%s3191_s9 + $0xe0] sm:$0xff]  ;;  %v302_v27 = vld [vmem:[%s3191_s9 + $0xe8] sm:$0xff] }
  0x8f   : > { %2338 = vst [vmem:[%s3230_s22 + $0x88] sm:$0xff] %v2082_v37  ;;  %v2084_v50 = vmul.f32 %v1828_v39, %v1572_v38  ;;  %v1573_v51 = vmin.f32 %v1317_v40, 1.0  ;;  %v807_v52 = vsub.f32 %v295_v34, %v551_v35  ;;  %v1319_v53 = vmax.f32 %v1063_v36, 0.0  ;;  %v1068_v11 = vld [vmem:[%s3208_s7 + $0xd8] sm:$0xff]  ;;  %v557_v17 = vld [vmem:[%s3199_s17 + $0xe0] sm:$0xff]  ;;  %v558_v28 = vld [vmem:[%s3199_s17 + $0xe8] sm:$0xff] }
  0x90   : > { %2339 = vst [vmem:[%s3230_s22 + $0x90] sm:$0xff] %v2083_v44  ;;  %v1574_v55 = vmin.f32 %v1318_v47, 1.0  ;;  %v1830_v56 = vmul.f32 %v806_v46, %v806_v46  ;;  %v808_v57 = vsub.f32 %v296_v41, %v552_v42  ;;  %v1320_v58 = vmax.f32 %v1064_v43, 0.0  ;;  %v1069_v22 = vld [vmem:[%s3208_s7 + $0xe0] sm:$0xff]  ;;  %v1070_v29 = vld [vmem:[%s3208_s7 + $0xe8] sm:$0xff]  ;;  %v303_v34 = vld [vmem:[%s3191_s9 + $0xf0] sm:$0xff] }
  0x91   : > { %2340 = vst [vmem:[%s3230_s22 + $0x98] sm:$0xff] %v2084_v50  ;;  %v2085_v62 = vmul.f32 %v1829_v45, %v1573_v51  ;;  %v1575_v63 = vmin.f32 %v1319_v53, 1.0  ;;  %v1831_v0 = vmul.f32 %v807_v52, %v807_v52  ;;  %v809_v1 = vsub.f32 %v297_v48, %v553_v49  ;;  %v559_v35 = vld [vmem:[%s3199_s17 + $0xf0] sm:$0xff]  ;;  %v304_v41 = vld [vmem:[%s3191_s9 + $0xf8] sm:$0xff]  ;;  %v305_v48 = vld [vmem:[%s3191_s9 + $0x100] sm:$0xff] }
  0x92   : > { %v2086_v5 = vmul.f32 %v1830_v56, %v1574_v55  ;;  %v1576_v6 = vmin.f32 %v1320_v58, 1.0  ;;  %v1832_v7 = vmul.f32 %v808_v57, %v808_v57  ;;  %v1321_v8 = vmax.f32 %v1065_v54, 0.0  ;;  %v1071_v36 = vld [vmem:[%s3208_s7 + $0xf0] sm:$0xff]  ;;  %v560_v42 = vld [vmem:[%s3199_s17 + $0xf8] sm:$0xff]  ;;  %v561_v49 = vld [vmem:[%s3199_s17 + $0x100] sm:$0xff] }
  0x93   : > { %2341 = vst [vmem:[%s3230_s22 + $0xa0] sm:$0xff] %v2085_v62  ;;  %v2087_v12 = vmul.f32 %v1831_v0, %v1575_v63  ;;  %v1833_v13 = vmul.f32 %v809_v1, %v809_v1  ;;  %v810_v14 = vsub.f32 %v298_v59, %v554_v60  ;;  %v1322_v15 = vmax.f32 %v1066_v61, 0.0  ;;  %v1072_v43 = vld [vmem:[%s3208_s7 + $0xf8] sm:$0xff]  ;;  %v1073_v54 = vld [vmem:[%s3208_s7 + $0x100] sm:$0xff]  ;;  %v306_v59 = vld [vmem:[%s3191_s9 + $0x108] sm:$0xff] }
  0x94   : > { %2342 = vst [vmem:[%s3230_s22 + $0xa8] sm:$0xff] %v2086_v5  ;;  %v2088_v18 = vmul.f32 %v1832_v7, %v1576_v6  ;;  %v1577_v19 = vmin.f32 %v1321_v8, 1.0  ;;  %v811_v20 = vsub.f32 %v299_v2, %v555_v3  ;;  %v1323_v21 = vmax.f32 %v1067_v4, 0.0  ;;  %v562_v60 = vld [vmem:[%s3199_s17 + $0x108] sm:$0xff]  ;;  %v307_v2 = vld [vmem:[%s3191_s9 + $0x110] sm:$0xff] }
  0x95   : > { %2343 = vst [vmem:[%s3230_s22 + $0xb0] sm:$0xff] %v2087_v12  ;;  %v1578_v23 = vmin.f32 %v1322_v15, 1.0  ;;  %v1834_v24 = vmul.f32 %v810_v14, %v810_v14  ;;  %v812_v25 = vsub.f32 %v300_v9, %v556_v10  ;;  %v1324_v26 = vmax.f32 %v1068_v11, 0.0  ;;  %v1074_v61 = vld [vmem:[%s3208_s7 + $0x108] sm:$0xff]  ;;  %v563_v3 = vld [vmem:[%s3199_s17 + $0x110] sm:$0xff]  ;;  %v308_v9 = vld [vmem:[%s3191_s9 + $0x118] sm:$0xff] }
  0x96   : > { %2344 = vst [vmem:[%s3230_s22 + $0xb8] sm:$0xff] %v2088_v18  ;;  %v2089_v30 = vmul.f32 %v1833_v13, %v1577_v19  ;;  %v1579_v31 = vmin.f32 %v1323_v21, 1.0  ;;  %v1835_v32 = vmul.f32 %v811_v20, %v811_v20  ;;  %v813_v33 = vsub.f32 %v301_v16, %v557_v17  ;;  %v1075_v4 = vld [vmem:[%s3208_s7 + $0x110] sm:$0xff]  ;;  %v564_v10 = vld [vmem:[%s3199_s17 + $0x118] sm:$0xff]  ;;  %v309_v16 = vld [vmem:[%s3191_s9 + $0x120] sm:$0xff] }
  0x97   : > { %v2090_v37 = vmul.f32 %v1834_v24, %v1578_v23  ;;  %v1580_v38 = vmin.f32 %v1324_v26, 1.0  ;;  %v1836_v39 = vmul.f32 %v812_v25, %v812_v25  ;;  %v1325_v40 = vmax.f32 %v1069_v22, 0.0  ;;  %v1076_v11 = vld [vmem:[%s3208_s7 + $0x118] sm:$0xff]  ;;  %v565_v17 = vld [vmem:[%s3199_s17 + $0x120] sm:$0xff] }
  0x98   : > { %2345 = vst [vmem:[%s3230_s22 + $0xc0] sm:$0xff] %v2089_v30  ;;  %v2091_v44 = vmul.f32 %v1835_v32, %v1579_v31  ;;  %v1837_v45 = vmul.f32 %v813_v33, %v813_v33  ;;  %v814_v46 = vsub.f32 %v302_v27, %v558_v28  ;;  %v1326_v47 = vmax.f32 %v1070_v29, 0.0  ;;  %v1077_v22 = vld [vmem:[%s3208_s7 + $0x120] sm:$0xff]  ;;  %v310_v27 = vld [vmem:[%s3191_s9 + $0x128] sm:$0xff] }
  0x99   : > { %2346 = vst [vmem:[%s3230_s22 + $0xc8] sm:$0xff] %v2090_v37  ;;  %v2092_v50 = vmul.f32 %v1836_v39, %v1580_v38  ;;  %v1581_v51 = vmin.f32 %v1325_v40, 1.0  ;;  %v815_v52 = vsub.f32 %v303_v34, %v559_v35  ;;  %v1327_v53 = vmax.f32 %v1071_v36, 0.0  ;;  %v566_v28 = vld [vmem:[%s3199_s17 + $0x128] sm:$0xff]  ;;  %v311_v34 = vld [vmem:[%s3191_s9 + $0x130] sm:$0xff] }
  0x9a   : > { %2347 = vst [vmem:[%s3230_s22 + $0xd0] sm:$0xff] %v2091_v44  ;;  %v1582_v55 = vmin.f32 %v1326_v47, 1.0  ;;  %v1838_v56 = vmul.f32 %v814_v46, %v814_v46  ;;  %v816_v57 = vsub.f32 %v304_v41, %v560_v42  ;;  %v1328_v58 = vmax.f32 %v1072_v43, 0.0  ;;  %v1078_v29 = vld [vmem:[%s3208_s7 + $0x128] sm:$0xff]  ;;  %v567_v35 = vld [vmem:[%s3199_s17 + $0x130] sm:$0xff]  ;;  %v312_v41 = vld [vmem:[%s3191_s9 + $0x138] sm:$0xff] }
  0x9b   : > { %2348 = vst [vmem:[%s3230_s22 + $0xd8] sm:$0xff] %v2092_v50  ;;  %v2093_v62 = vmul.f32 %v1837_v45, %v1581_v51  ;;  %v1583_v63 = vmin.f32 %v1327_v53, 1.0  ;;  %v1839_v0 = vmul.f32 %v815_v52, %v815_v52  ;;  %v817_v1 = vsub.f32 %v305_v48, %v561_v49  ;;  %v1079_v36 = vld [vmem:[%s3208_s7 + $0x130] sm:$0xff]  ;;  %v568_v42 = vld [vmem:[%s3199_s17 + $0x138] sm:$0xff]  ;;  %v313_v48 = vld [vmem:[%s3191_s9 + $0x140] sm:$0xff] }
  0x9c   : > { %v2094_v5 = vmul.f32 %v1838_v56, %v1582_v55  ;;  %v1584_v6 = vmin.f32 %v1328_v58, 1.0  ;;  %v1840_v7 = vmul.f32 %v816_v57, %v816_v57  ;;  %v1329_v8 = vmax.f32 %v1073_v54, 0.0  ;;  %v1080_v43 = vld [vmem:[%s3208_s7 + $0x138] sm:$0xff]  ;;  %v569_v49 = vld [vmem:[%s3199_s17 + $0x140] sm:$0xff] }
  0x9d   : > { %2349 = vst [vmem:[%s3230_s22 + $0xe0] sm:$0xff] %v2093_v62  ;;  %v2095_v12 = vmul.f32 %v1839_v0, %v1583_v63  ;;  %v1841_v13 = vmul.f32 %v817_v1, %v817_v1  ;;  %v818_v14 = vsub.f32 %v306_v59, %v562_v60  ;;  %v1330_v15 = vmax.f32 %v1074_v61, 0.0  ;;  %v1081_v54 = vld [vmem:[%s3208_s7 + $0x140] sm:$0xff]  ;;  %v314_v59 = vld [vmem:[%s3191_s9 + $0x148] sm:$0xff] }
  0x9e   : > { %2350 = vst [vmem:[%s3230_s22 + $0xe8] sm:$0xff] %v2094_v5  ;;  %v2096_v18 = vmul.f32 %v1840_v7, %v1584_v6  ;;  %v1585_v19 = vmin.f32 %v1329_v8, 1.0  ;;  %v819_v20 = vsub.f32 %v307_v2, %v563_v3  ;;  %v1331_v21 = vmax.f32 %v1075_v4, 0.0  ;;  %v570_v60 = vld [vmem:[%s3199_s17 + $0x148] sm:$0xff]  ;;  %v315_v2 = vld [vmem:[%s3191_s9 + $0x150] sm:$0xff] }
  0x9f   : > { %2351 = vst [vmem:[%s3230_s22 + $0xf0] sm:$0xff] %v2095_v12  ;;  %v1586_v23 = vmin.f32 %v1330_v15, 1.0  ;;  %v1842_v24 = vmul.f32 %v818_v14, %v818_v14  ;;  %v820_v25 = vsub.f32 %v308_v9, %v564_v10  ;;  %v1332_v26 = vmax.f32 %v1076_v11, 0.0  ;;  %v1082_v61 = vld [vmem:[%s3208_s7 + $0x148] sm:$0xff]  ;;  %v571_v3 = vld [vmem:[%s3199_s17 + $0x150] sm:$0xff]  ;;  %v316_v9 = vld [vmem:[%s3191_s9 + $0x158] sm:$0xff] }
  0xa0   : > { %2352 = vst [vmem:[%s3230_s22 + $0xf8] sm:$0xff] %v2096_v18  ;;  %v2097_v30 = vmul.f32 %v1841_v13, %v1585_v19  ;;  %v1587_v31 = vmin.f32 %v1331_v21, 1.0  ;;  %v1843_v32 = vmul.f32 %v819_v20, %v819_v20  ;;  %v821_v33 = vsub.f32 %v309_v16, %v565_v17  ;;  %v1083_v4 = vld [vmem:[%s3208_s7 + $0x150] sm:$0xff]  ;;  %v572_v10 = vld [vmem:[%s3199_s17 + $0x158] sm:$0xff]  ;;  %v317_v16 = vld [vmem:[%s3191_s9 + $0x160] sm:$0xff] }
  0xa1   : > { %v2098_v37 = vmul.f32 %v1842_v24, %v1586_v23  ;;  %v1588_v38 = vmin.f32 %v1332_v26, 1.0  ;;  %v1844_v39 = vmul.f32 %v820_v25, %v820_v25  ;;  %v1333_v40 = vmax.f32 %v1077_v22, 0.0  ;;  %v1084_v11 = vld [vmem:[%s3208_s7 + $0x158] sm:$0xff]  ;;  %v573_v17 = vld [vmem:[%s3199_s17 + $0x160] sm:$0xff] }
  0xa2   : > { %2353 = vst [vmem:[%s3230_s22 + $0x100] sm:$0xff] %v2097_v30  ;;  %v2099_v44 = vmul.f32 %v1843_v32, %v1587_v31  ;;  %v1845_v45 = vmul.f32 %v821_v33, %v821_v33  ;;  %v822_v46 = vsub.f32 %v310_v27, %v566_v28  ;;  %v1334_v47 = vmax.f32 %v1078_v29, 0.0  ;;  %v1085_v22 = vld [vmem:[%s3208_s7 + $0x160] sm:$0xff]  ;;  %v318_v27 = vld [vmem:[%s3191_s9 + $0x168] sm:$0xff] }
  0xa3   : > { %2354 = vst [vmem:[%s3230_s22 + $0x108] sm:$0xff] %v2098_v37  ;;  %v2100_v50 = vmul.f32 %v1844_v39, %v1588_v38  ;;  %v1589_v51 = vmin.f32 %v1333_v40, 1.0  ;;  %v823_v52 = vsub.f32 %v311_v34, %v567_v35  ;;  %v1335_v53 = vmax.f32 %v1079_v36, 0.0  ;;  %v574_v28 = vld [vmem:[%s3199_s17 + $0x168] sm:$0xff]  ;;  %v319_v34 = vld [vmem:[%s3191_s9 + $0x170] sm:$0xff] }
  0xa4   : > { %2355 = vst [vmem:[%s3230_s22 + $0x110] sm:$0xff] %v2099_v44  ;;  %v1590_v55 = vmin.f32 %v1334_v47, 1.0  ;;  %v1846_v56 = vmul.f32 %v822_v46, %v822_v46  ;;  %v824_v57 = vsub.f32 %v312_v41, %v568_v42  ;;  %v1336_v58 = vmax.f32 %v1080_v43, 0.0  ;;  %v1086_v29 = vld [vmem:[%s3208_s7 + $0x168] sm:$0xff]  ;;  %v575_v35 = vld [vmem:[%s3199_s17 + $0x170] sm:$0xff]  ;;  %v320_v41 = vld [vmem:[%s3191_s9 + $0x178] sm:$0xff] }
  0xa5   : > { %2356 = vst [vmem:[%s3230_s22 + $0x118] sm:$0xff] %v2100_v50  ;;  %v2101_v62 = vmul.f32 %v1845_v45, %v1589_v51  ;;  %v1591_v63 = vmin.f32 %v1335_v53, 1.0  ;;  %v1847_v0 = vmul.f32 %v823_v52, %v823_v52  ;;  %v825_v1 = vsub.f32 %v313_v48, %v569_v49  ;;  %v1087_v36 = vld [vmem:[%s3208_s7 + $0x170] sm:$0xff]  ;;  %v576_v42 = vld [vmem:[%s3199_s17 + $0x178] sm:$0xff]  ;;  %v321_v48 = vld [vmem:[%s3191_s9 + $0x180] sm:$0xff] }
  0xa6   : > { %v2102_v5 = vmul.f32 %v1846_v56, %v1590_v55  ;;  %v1592_v6 = vmin.f32 %v1336_v58, 1.0  ;;  %v1848_v7 = vmul.f32 %v824_v57, %v824_v57  ;;  %v1337_v8 = vmax.f32 %v1081_v54, 0.0  ;;  %v1088_v43 = vld [vmem:[%s3208_s7 + $0x178] sm:$0xff]  ;;  %v577_v49 = vld [vmem:[%s3199_s17 + $0x180] sm:$0xff] }
  0xa7   : > { %2357 = vst [vmem:[%s3230_s22 + $0x120] sm:$0xff] %v2101_v62  ;;  %v2103_v12 = vmul.f32 %v1847_v0, %v1591_v63  ;;  %v1849_v13 = vmul.f32 %v825_v1, %v825_v1  ;;  %v826_v14 = vsub.f32 %v314_v59, %v570_v60  ;;  %v1338_v15 = vmax.f32 %v1082_v61, 0.0  ;;  %v1089_v54 = vld [vmem:[%s3208_s7 + $0x180] sm:$0xff]  ;;  %v322_v59 = vld [vmem:[%s3191_s9 + $0x188] sm:$0xff] }
  0xa8   : > { %2358 = vst [vmem:[%s3230_s22 + $0x128] sm:$0xff] %v2102_v5  ;;  %v2104_v18 = vmul.f32 %v1848_v7, %v1592_v6  ;;  %v1593_v19 = vmin.f32 %v1337_v8, 1.0  ;;  %v827_v20 = vsub.f32 %v315_v2, %v571_v3  ;;  %v1339_v21 = vmax.f32 %v1083_v4, 0.0  ;;  %v578_v60 = vld [vmem:[%s3199_s17 + $0x188] sm:$0xff]  ;;  %v323_v2 = vld [vmem:[%s3191_s9 + $0x190] sm:$0xff] }
  0xa9   : > { %2359 = vst [vmem:[%s3230_s22 + $0x130] sm:$0xff] %v2103_v12  ;;  %v1594_v23 = vmin.f32 %v1338_v15, 1.0  ;;  %v1850_v24 = vmul.f32 %v826_v14, %v826_v14  ;;  %v828_v25 = vsub.f32 %v316_v9, %v572_v10  ;;  %v1340_v26 = vmax.f32 %v1084_v11, 0.0  ;;  %v1090_v61 = vld [vmem:[%s3208_s7 + $0x188] sm:$0xff]  ;;  %v579_v3 = vld [vmem:[%s3199_s17 + $0x190] sm:$0xff]  ;;  %v324_v9 = vld [vmem:[%s3191_s9 + $0x198] sm:$0xff] }
  0xaa   : > { %2360 = vst [vmem:[%s3230_s22 + $0x138] sm:$0xff] %v2104_v18  ;;  %v2105_v30 = vmul.f32 %v1849_v13, %v1593_v19  ;;  %v1595_v31 = vmin.f32 %v1339_v21, 1.0  ;;  %v1851_v32 = vmul.f32 %v827_v20, %v827_v20  ;;  %v829_v33 = vsub.f32 %v317_v16, %v573_v17  ;;  %v1091_v4 = vld [vmem:[%s3208_s7 + $0x190] sm:$0xff]  ;;  %v580_v10 = vld [vmem:[%s3199_s17 + $0x198] sm:$0xff]  ;;  %v325_v16 = vld [vmem:[%s3191_s9 + $0x1a0] sm:$0xff] }
  0xab   : > { %v2106_v37 = vmul.f32 %v1850_v24, %v1594_v23  ;;  %v1596_v38 = vmin.f32 %v1340_v26, 1.0  ;;  %v1852_v39 = vmul.f32 %v828_v25, %v828_v25  ;;  %v1341_v40 = vmax.f32 %v1085_v22, 0.0  ;;  %v1092_v11 = vld [vmem:[%s3208_s7 + $0x198] sm:$0xff]  ;;  %v581_v17 = vld [vmem:[%s3199_s17 + $0x1a0] sm:$0xff] }
  0xac   : > { %2361 = vst [vmem:[%s3230_s22 + $0x140] sm:$0xff] %v2105_v30  ;;  %v2107_v44 = vmul.f32 %v1851_v32, %v1595_v31  ;;  %v1853_v45 = vmul.f32 %v829_v33, %v829_v33  ;;  %v830_v46 = vsub.f32 %v318_v27, %v574_v28  ;;  %v1342_v47 = vmax.f32 %v1086_v29, 0.0  ;;  %v1093_v22 = vld [vmem:[%s3208_s7 + $0x1a0] sm:$0xff]  ;;  %v326_v27 = vld [vmem:[%s3191_s9 + $0x1a8] sm:$0xff] }
  0xad   : > { %2362 = vst [vmem:[%s3230_s22 + $0x148] sm:$0xff] %v2106_v37  ;;  %v2108_v50 = vmul.f32 %v1852_v39, %v1596_v38  ;;  %v1597_v51 = vmin.f32 %v1341_v40, 1.0  ;;  %v831_v52 = vsub.f32 %v319_v34, %v575_v35  ;;  %v1343_v53 = vmax.f32 %v1087_v36, 0.0  ;;  %v582_v28 = vld [vmem:[%s3199_s17 + $0x1a8] sm:$0xff]  ;;  %v327_v34 = vld [vmem:[%s3191_s9 + $0x1b0] sm:$0xff] }
  0xae   : > { %2363 = vst [vmem:[%s3230_s22 + $0x150] sm:$0xff] %v2107_v44  ;;  %v1598_v55 = vmin.f32 %v1342_v47, 1.0  ;;  %v1854_v56 = vmul.f32 %v830_v46, %v830_v46  ;;  %v832_v57 = vsub.f32 %v320_v41, %v576_v42  ;;  %v1344_v58 = vmax.f32 %v1088_v43, 0.0  ;;  %v1094_v29 = vld [vmem:[%s3208_s7 + $0x1a8] sm:$0xff]  ;;  %v583_v35 = vld [vmem:[%s3199_s17 + $0x1b0] sm:$0xff]  ;;  %v328_v41 = vld [vmem:[%s3191_s9 + $0x1b8] sm:$0xff] }
  0xaf   : > { %2364 = vst [vmem:[%s3230_s22 + $0x158] sm:$0xff] %v2108_v50  ;;  %v2109_v62 = vmul.f32 %v1853_v45, %v1597_v51  ;;  %v1599_v63 = vmin.f32 %v1343_v53, 1.0  ;;  %v1855_v0 = vmul.f32 %v831_v52, %v831_v52  ;;  %v833_v1 = vsub.f32 %v321_v48, %v577_v49  ;;  %v1095_v36 = vld [vmem:[%s3208_s7 + $0x1b0] sm:$0xff]  ;;  %v584_v42 = vld [vmem:[%s3199_s17 + $0x1b8] sm:$0xff]  ;;  %v329_v48 = vld [vmem:[%s3191_s9 + $0x1c0] sm:$0xff] }
  0xb0   : > { %v2110_v5 = vmul.f32 %v1854_v56, %v1598_v55  ;;  %v1600_v6 = vmin.f32 %v1344_v58, 1.0  ;;  %v1856_v7 = vmul.f32 %v832_v57, %v832_v57  ;;  %v1345_v8 = vmax.f32 %v1089_v54, 0.0  ;;  %v1096_v43 = vld [vmem:[%s3208_s7 + $0x1b8] sm:$0xff]  ;;  %v585_v49 = vld [vmem:[%s3199_s17 + $0x1c0] sm:$0xff] }
  0xb1   : > { %2365 = vst [vmem:[%s3230_s22 + $0x160] sm:$0xff] %v2109_v62  ;;  %v2111_v12 = vmul.f32 %v1855_v0, %v1599_v63  ;;  %v1857_v13 = vmul.f32 %v833_v1, %v833_v1  ;;  %v834_v14 = vsub.f32 %v322_v59, %v578_v60  ;;  %v1346_v15 = vmax.f32 %v1090_v61, 0.0  ;;  %v1097_v54 = vld [vmem:[%s3208_s7 + $0x1c0] sm:$0xff]  ;;  %v330_v59 = vld [vmem:[%s3191_s9 + $0x1c8] sm:$0xff] }
  0xb2   : > { %2366 = vst [vmem:[%s3230_s22 + $0x168] sm:$0xff] %v2110_v5  ;;  %v2112_v18 = vmul.f32 %v1856_v7, %v1600_v6  ;;  %v1601_v19 = vmin.f32 %v1345_v8, 1.0  ;;  %v835_v20 = vsub.f32 %v323_v2, %v579_v3  ;;  %v1347_v21 = vmax.f32 %v1091_v4, 0.0  ;;  %v586_v60 = vld [vmem:[%s3199_s17 + $0x1c8] sm:$0xff]  ;;  %v331_v2 = vld [vmem:[%s3191_s9 + $0x1d0] sm:$0xff] }
  0xb3   : > { %2367 = vst [vmem:[%s3230_s22 + $0x170] sm:$0xff] %v2111_v12  ;;  %v1602_v23 = vmin.f32 %v1346_v15, 1.0  ;;  %v1858_v24 = vmul.f32 %v834_v14, %v834_v14  ;;  %v836_v25 = vsub.f32 %v324_v9, %v580_v10  ;;  %v1348_v26 = vmax.f32 %v1092_v11, 0.0  ;;  %v1098_v61 = vld [vmem:[%s3208_s7 + $0x1c8] sm:$0xff]  ;;  %v587_v3 = vld [vmem:[%s3199_s17 + $0x1d0] sm:$0xff]  ;;  %v332_v9 = vld [vmem:[%s3191_s9 + $0x1d8] sm:$0xff] }
  0xb4   : > { %2368 = vst [vmem:[%s3230_s22 + $0x178] sm:$0xff] %v2112_v18  ;;  %v2113_v30 = vmul.f32 %v1857_v13, %v1601_v19  ;;  %v1603_v31 = vmin.f32 %v1347_v21, 1.0  ;;  %v1859_v32 = vmul.f32 %v835_v20, %v835_v20  ;;  %v837_v33 = vsub.f32 %v325_v16, %v581_v17  ;;  %v1099_v4 = vld [vmem:[%s3208_s7 + $0x1d0] sm:$0xff]  ;;  %v588_v10 = vld [vmem:[%s3199_s17 + $0x1d8] sm:$0xff]  ;;  %v333_v16 = vld [vmem:[%s3191_s9 + $0x1e0] sm:$0xff] }
  0xb5   : > { %v2114_v37 = vmul.f32 %v1858_v24, %v1602_v23  ;;  %v1604_v38 = vmin.f32 %v1348_v26, 1.0  ;;  %v1860_v39 = vmul.f32 %v836_v25, %v836_v25  ;;  %v1349_v40 = vmax.f32 %v1093_v22, 0.0  ;;  %v1100_v11 = vld [vmem:[%s3208_s7 + $0x1d8] sm:$0xff]  ;;  %v589_v17 = vld [vmem:[%s3199_s17 + $0x1e0] sm:$0xff] }
  0xb6   : > { %2369 = vst [vmem:[%s3230_s22 + $0x180] sm:$0xff] %v2113_v30  ;;  %v2115_v44 = vmul.f32 %v1859_v32, %v1603_v31  ;;  %v1861_v45 = vmul.f32 %v837_v33, %v837_v33  ;;  %v838_v46 = vsub.f32 %v326_v27, %v582_v28  ;;  %v1350_v47 = vmax.f32 %v1094_v29, 0.0  ;;  %v1101_v22 = vld [vmem:[%s3208_s7 + $0x1e0] sm:$0xff]  ;;  %v334_v27 = vld [vmem:[%s3191_s9 + $0x1e8] sm:$0xff] }
  0xb7   : > { %2370 = vst [vmem:[%s3230_s22 + $0x188] sm:$0xff] %v2114_v37  ;;  %v2116_v50 = vmul.f32 %v1860_v39, %v1604_v38  ;;  %v1605_v51 = vmin.f32 %v1349_v40, 1.0  ;;  %v839_v52 = vsub.f32 %v327_v34, %v583_v35  ;;  %v1351_v53 = vmax.f32 %v1095_v36, 0.0  ;;  %v590_v28 = vld [vmem:[%s3199_s17 + $0x1e8] sm:$0xff]  ;;  %v335_v34 = vld [vmem:[%s3191_s9 + $0x1f0] sm:$0xff] }
  0xb8   : > { %2371 = vst [vmem:[%s3230_s22 + $0x190] sm:$0xff] %v2115_v44  ;;  %v1606_v55 = vmin.f32 %v1350_v47, 1.0  ;;  %v1862_v56 = vmul.f32 %v838_v46, %v838_v46  ;;  %v840_v57 = vsub.f32 %v328_v41, %v584_v42  ;;  %v1352_v58 = vmax.f32 %v1096_v43, 0.0  ;;  %v1102_v29 = vld [vmem:[%s3208_s7 + $0x1e8] sm:$0xff]  ;;  %v591_v35 = vld [vmem:[%s3199_s17 + $0x1f0] sm:$0xff]  ;;  %v336_v41 = vld [vmem:[%s3191_s9 + $0x1f8] sm:$0xff] }
  0xb9   : > { %2372 = vst [vmem:[%s3230_s22 + $0x198] sm:$0xff] %v2116_v50  ;;  %v2117_v62 = vmul.f32 %v1861_v45, %v1605_v51  ;;  %v1607_v63 = vmin.f32 %v1351_v53, 1.0  ;;  %v1863_v0 = vmul.f32 %v839_v52, %v839_v52  ;;  %v841_v1 = vsub.f32 %v329_v48, %v585_v49  ;;  %v1103_v36 = vld [vmem:[%s3208_s7 + $0x1f0] sm:$0xff]  ;;  %v592_v42 = vld [vmem:[%s3199_s17 + $0x1f8] sm:$0xff]  ;;  %v337_v48 = vld [vmem:[%s3191_s9 + $0x200] sm:$0xff] }
  0xba   : > { %v2118_v5 = vmul.f32 %v1862_v56, %v1606_v55  ;;  %v1608_v6 = vmin.f32 %v1352_v58, 1.0  ;;  %v1864_v7 = vmul.f32 %v840_v57, %v840_v57  ;;  %v1353_v8 = vmax.f32 %v1097_v54, 0.0  ;;  %v1104_v43 = vld [vmem:[%s3208_s7 + $0x1f8] sm:$0xff]  ;;  %v593_v49 = vld [vmem:[%s3199_s17 + $0x200] sm:$0xff] }
  0xbb   : > { %2373 = vst [vmem:[%s3230_s22 + $0x1a0] sm:$0xff] %v2117_v62  ;;  %v2119_v12 = vmul.f32 %v1863_v0, %v1607_v63  ;;  %v1865_v13 = vmul.f32 %v841_v1, %v841_v1  ;;  %v842_v14 = vsub.f32 %v330_v59, %v586_v60  ;;  %v1354_v15 = vmax.f32 %v1098_v61, 0.0  ;;  %v1105_v54 = vld [vmem:[%s3208_s7 + $0x200] sm:$0xff]  ;;  %v338_v59 = vld [vmem:[%s3191_s9 + $0x208] sm:$0xff] }
  0xbc   : > { %2374 = vst [vmem:[%s3230_s22 + $0x1a8] sm:$0xff] %v2118_v5  ;;  %v2120_v18 = vmul.f32 %v1864_v7, %v1608_v6  ;;  %v1609_v19 = vmin.f32 %v1353_v8, 1.0  ;;  %v843_v20 = vsub.f32 %v331_v2, %v587_v3  ;;  %v1355_v21 = vmax.f32 %v1099_v4, 0.0  ;;  %v594_v60 = vld [vmem:[%s3199_s17 + $0x208] sm:$0xff]  ;;  %v339_v2 = vld [vmem:[%s3191_s9 + $0x210] sm:$0xff] }
  0xbd   : > { %2375 = vst [vmem:[%s3230_s22 + $0x1b0] sm:$0xff] %v2119_v12  ;;  %v1610_v23 = vmin.f32 %v1354_v15, 1.0  ;;  %v1866_v24 = vmul.f32 %v842_v14, %v842_v14  ;;  %v844_v25 = vsub.f32 %v332_v9, %v588_v10  ;;  %v1356_v26 = vmax.f32 %v1100_v11, 0.0  ;;  %v1106_v61 = vld [vmem:[%s3208_s7 + $0x208] sm:$0xff]  ;;  %v595_v3 = vld [vmem:[%s3199_s17 + $0x210] sm:$0xff]  ;;  %v340_v9 = vld [vmem:[%s3191_s9 + $0x218] sm:$0xff] }
  0xbe   : > { %2376 = vst [vmem:[%s3230_s22 + $0x1b8] sm:$0xff] %v2120_v18  ;;  %v2121_v30 = vmul.f32 %v1865_v13, %v1609_v19  ;;  %v1611_v31 = vmin.f32 %v1355_v21, 1.0  ;;  %v1867_v32 = vmul.f32 %v843_v20, %v843_v20  ;;  %v845_v33 = vsub.f32 %v333_v16, %v589_v17  ;;  %v1107_v4 = vld [vmem:[%s3208_s7 + $0x210] sm:$0xff]  ;;  %v596_v10 = vld [vmem:[%s3199_s17 + $0x218] sm:$0xff]  ;;  %v341_v16 = vld [vmem:[%s3191_s9 + $0x220] sm:$0xff] }
  0xbf   : > { %v2122_v37 = vmul.f32 %v1866_v24, %v1610_v23  ;;  %v1612_v38 = vmin.f32 %v1356_v26, 1.0  ;;  %v1868_v39 = vmul.f32 %v844_v25, %v844_v25  ;;  %v1357_v40 = vmax.f32 %v1101_v22, 0.0  ;;  %v1108_v11 = vld [vmem:[%s3208_s7 + $0x218] sm:$0xff]  ;;  %v597_v17 = vld [vmem:[%s3199_s17 + $0x220] sm:$0xff] }
  0xc0   : > { %2377 = vst [vmem:[%s3230_s22 + $0x1c0] sm:$0xff] %v2121_v30  ;;  %v2123_v44 = vmul.f32 %v1867_v32, %v1611_v31  ;;  %v1869_v45 = vmul.f32 %v845_v33, %v845_v33  ;;  %v846_v46 = vsub.f32 %v334_v27, %v590_v28  ;;  %v1358_v47 = vmax.f32 %v1102_v29, 0.0  ;;  %v1109_v22 = vld [vmem:[%s3208_s7 + $0x220] sm:$0xff]  ;;  %v342_v27 = vld [vmem:[%s3191_s9 + $0x228] sm:$0xff] }
  0xc1   : > { %2378 = vst [vmem:[%s3230_s22 + $0x1c8] sm:$0xff] %v2122_v37  ;;  %v2124_v50 = vmul.f32 %v1868_v39, %v1612_v38  ;;  %v1613_v51 = vmin.f32 %v1357_v40, 1.0  ;;  %v847_v52 = vsub.f32 %v335_v34, %v591_v35  ;;  %v1359_v53 = vmax.f32 %v1103_v36, 0.0  ;;  %v598_v28 = vld [vmem:[%s3199_s17 + $0x228] sm:$0xff]  ;;  %v343_v34 = vld [vmem:[%s3191_s9 + $0x230] sm:$0xff] }
  0xc2   : > { %2379 = vst [vmem:[%s3230_s22 + $0x1d0] sm:$0xff] %v2123_v44  ;;  %v1614_v55 = vmin.f32 %v1358_v47, 1.0  ;;  %v1870_v56 = vmul.f32 %v846_v46, %v846_v46  ;;  %v848_v57 = vsub.f32 %v336_v41, %v592_v42  ;;  %v1360_v58 = vmax.f32 %v1104_v43, 0.0  ;;  %v1110_v29 = vld [vmem:[%s3208_s7 + $0x228] sm:$0xff]  ;;  %v599_v35 = vld [vmem:[%s3199_s17 + $0x230] sm:$0xff]  ;;  %v344_v41 = vld [vmem:[%s3191_s9 + $0x238] sm:$0xff] }
  0xc3   : > { %2380 = vst [vmem:[%s3230_s22 + $0x1d8] sm:$0xff] %v2124_v50  ;;  %v2125_v62 = vmul.f32 %v1869_v45, %v1613_v51  ;;  %v1615_v63 = vmin.f32 %v1359_v53, 1.0  ;;  %v1871_v0 = vmul.f32 %v847_v52, %v847_v52  ;;  %v849_v1 = vsub.f32 %v337_v48, %v593_v49  ;;  %v1111_v36 = vld [vmem:[%s3208_s7 + $0x230] sm:$0xff]  ;;  %v600_v42 = vld [vmem:[%s3199_s17 + $0x238] sm:$0xff]  ;;  %v345_v48 = vld [vmem:[%s3191_s9 + $0x240] sm:$0xff] }
  0xc4   : > { %v2126_v5 = vmul.f32 %v1870_v56, %v1614_v55  ;;  %v1616_v6 = vmin.f32 %v1360_v58, 1.0  ;;  %v1872_v7 = vmul.f32 %v848_v57, %v848_v57  ;;  %v1361_v8 = vmax.f32 %v1105_v54, 0.0  ;;  %v1112_v43 = vld [vmem:[%s3208_s7 + $0x238] sm:$0xff]  ;;  %v601_v49 = vld [vmem:[%s3199_s17 + $0x240] sm:$0xff] }
  0xc5   : > { %2381 = vst [vmem:[%s3230_s22 + $0x1e0] sm:$0xff] %v2125_v62  ;;  %v2127_v12 = vmul.f32 %v1871_v0, %v1615_v63  ;;  %v1873_v13 = vmul.f32 %v849_v1, %v849_v1  ;;  %v850_v14 = vsub.f32 %v338_v59, %v594_v60  ;;  %v1362_v15 = vmax.f32 %v1106_v61, 0.0  ;;  %v1113_v54 = vld [vmem:[%s3208_s7 + $0x240] sm:$0xff]  ;;  %v346_v59 = vld [vmem:[%s3191_s9 + $0x248] sm:$0xff] }
  0xc6   : > { %2382 = vst [vmem:[%s3230_s22 + $0x1e8] sm:$0xff] %v2126_v5  ;;  %v2128_v18 = vmul.f32 %v1872_v7, %v1616_v6  ;;  %v1617_v19 = vmin.f32 %v1361_v8, 1.0  ;;  %v851_v20 = vsub.f32 %v339_v2, %v595_v3  ;;  %v1363_v21 = vmax.f32 %v1107_v4, 0.0  ;;  %v602_v60 = vld [vmem:[%s3199_s17 + $0x248] sm:$0xff]  ;;  %v347_v2 = vld [vmem:[%s3191_s9 + $0x250] sm:$0xff] }
  0xc7   : > { %2383 = vst [vmem:[%s3230_s22 + $0x1f0] sm:$0xff] %v2127_v12  ;;  %v1618_v23 = vmin.f32 %v1362_v15, 1.0  ;;  %v1874_v24 = vmul.f32 %v850_v14, %v850_v14  ;;  %v852_v25 = vsub.f32 %v340_v9, %v596_v10  ;;  %v1364_v26 = vmax.f32 %v1108_v11, 0.0  ;;  %v1114_v61 = vld [vmem:[%s3208_s7 + $0x248] sm:$0xff]  ;;  %v603_v3 = vld [vmem:[%s3199_s17 + $0x250] sm:$0xff]  ;;  %v348_v9 = vld [vmem:[%s3191_s9 + $0x258] sm:$0xff] }
  0xc8   : > { %2384 = vst [vmem:[%s3230_s22 + $0x1f8] sm:$0xff] %v2128_v18  ;;  %v2129_v30 = vmul.f32 %v1873_v13, %v1617_v19  ;;  %v1619_v31 = vmin.f32 %v1363_v21, 1.0  ;;  %v1875_v32 = vmul.f32 %v851_v20, %v851_v20  ;;  %v853_v33 = vsub.f32 %v341_v16, %v597_v17  ;;  %v1115_v4 = vld [vmem:[%s3208_s7 + $0x250] sm:$0xff]  ;;  %v604_v10 = vld [vmem:[%s3199_s17 + $0x258] sm:$0xff]  ;;  %v349_v16 = vld [vmem:[%s3191_s9 + $0x260] sm:$0xff] }
  0xc9   : > { %v2130_v37 = vmul.f32 %v1874_v24, %v1618_v23  ;;  %v1620_v38 = vmin.f32 %v1364_v26, 1.0  ;;  %v1876_v39 = vmul.f32 %v852_v25, %v852_v25  ;;  %v1365_v40 = vmax.f32 %v1109_v22, 0.0  ;;  %v1116_v11 = vld [vmem:[%s3208_s7 + $0x258] sm:$0xff]  ;;  %v605_v17 = vld [vmem:[%s3199_s17 + $0x260] sm:$0xff] }
  0xca   : > { %2385 = vst [vmem:[%s3230_s22 + $0x200] sm:$0xff] %v2129_v30  ;;  %v2131_v44 = vmul.f32 %v1875_v32, %v1619_v31  ;;  %v1877_v45 = vmul.f32 %v853_v33, %v853_v33  ;;  %v854_v46 = vsub.f32 %v342_v27, %v598_v28  ;;  %v1366_v47 = vmax.f32 %v1110_v29, 0.0  ;;  %v1117_v22 = vld [vmem:[%s3208_s7 + $0x260] sm:$0xff]  ;;  %v350_v27 = vld [vmem:[%s3191_s9 + $0x268] sm:$0xff] }
  0xcb   : > { %2386 = vst [vmem:[%s3230_s22 + $0x208] sm:$0xff] %v2130_v37  ;;  %v2132_v50 = vmul.f32 %v1876_v39, %v1620_v38  ;;  %v1621_v51 = vmin.f32 %v1365_v40, 1.0  ;;  %v855_v52 = vsub.f32 %v343_v34, %v599_v35  ;;  %v1367_v53 = vmax.f32 %v1111_v36, 0.0  ;;  %v606_v28 = vld [vmem:[%s3199_s17 + $0x268] sm:$0xff]  ;;  %v351_v34 = vld [vmem:[%s3191_s9 + $0x270] sm:$0xff] }
  0xcc   : > { %2387 = vst [vmem:[%s3230_s22 + $0x210] sm:$0xff] %v2131_v44  ;;  %v1622_v55 = vmin.f32 %v1366_v47, 1.0  ;;  %v1878_v56 = vmul.f32 %v854_v46, %v854_v46  ;;  %v856_v57 = vsub.f32 %v344_v41, %v600_v42  ;;  %v1368_v58 = vmax.f32 %v1112_v43, 0.0  ;;  %v1118_v29 = vld [vmem:[%s3208_s7 + $0x268] sm:$0xff]  ;;  %v607_v35 = vld [vmem:[%s3199_s17 + $0x270] sm:$0xff]  ;;  %v352_v41 = vld [vmem:[%s3191_s9 + $0x278] sm:$0xff] }
  0xcd   : > { %2388 = vst [vmem:[%s3230_s22 + $0x218] sm:$0xff] %v2132_v50  ;;  %v2133_v62 = vmul.f32 %v1877_v45, %v1621_v51  ;;  %v1623_v63 = vmin.f32 %v1367_v53, 1.0  ;;  %v1879_v0 = vmul.f32 %v855_v52, %v855_v52  ;;  %v857_v1 = vsub.f32 %v345_v48, %v601_v49  ;;  %v1119_v36 = vld [vmem:[%s3208_s7 + $0x270] sm:$0xff]  ;;  %v608_v42 = vld [vmem:[%s3199_s17 + $0x278] sm:$0xff]  ;;  %v353_v48 = vld [vmem:[%s3191_s9 + $0x280] sm:$0xff] }
  0xce   : > { %v2134_v5 = vmul.f32 %v1878_v56, %v1622_v55  ;;  %v1624_v6 = vmin.f32 %v1368_v58, 1.0  ;;  %v1880_v7 = vmul.f32 %v856_v57, %v856_v57  ;;  %v1369_v8 = vmax.f32 %v1113_v54, 0.0  ;;  %v1120_v43 = vld [vmem:[%s3208_s7 + $0x278] sm:$0xff]  ;;  %v609_v49 = vld [vmem:[%s3199_s17 + $0x280] sm:$0xff] }
  0xcf   : > { %2389 = vst [vmem:[%s3230_s22 + $0x220] sm:$0xff] %v2133_v62  ;;  %v2135_v12 = vmul.f32 %v1879_v0, %v1623_v63  ;;  %v1881_v13 = vmul.f32 %v857_v1, %v857_v1  ;;  %v858_v14 = vsub.f32 %v346_v59, %v602_v60  ;;  %v1370_v15 = vmax.f32 %v1114_v61, 0.0  ;;  %v1121_v54 = vld [vmem:[%s3208_s7 + $0x280] sm:$0xff]  ;;  %v354_v59 = vld [vmem:[%s3191_s9 + $0x288] sm:$0xff] }
  0xd0   : > { %2390 = vst [vmem:[%s3230_s22 + $0x228] sm:$0xff] %v2134_v5  ;;  %v2136_v18 = vmul.f32 %v1880_v7, %v1624_v6  ;;  %v1625_v19 = vmin.f32 %v1369_v8, 1.0  ;;  %v859_v20 = vsub.f32 %v347_v2, %v603_v3  ;;  %v1371_v21 = vmax.f32 %v1115_v4, 0.0  ;;  %v610_v60 = vld [vmem:[%s3199_s17 + $0x288] sm:$0xff]  ;;  %v355_v2 = vld [vmem:[%s3191_s9 + $0x290] sm:$0xff] }
  0xd1   : > { %2391 = vst [vmem:[%s3230_s22 + $0x230] sm:$0xff] %v2135_v12  ;;  %v1626_v23 = vmin.f32 %v1370_v15, 1.0  ;;  %v1882_v24 = vmul.f32 %v858_v14, %v858_v14  ;;  %v860_v25 = vsub.f32 %v348_v9, %v604_v10  ;;  %v1372_v26 = vmax.f32 %v1116_v11, 0.0  ;;  %v1122_v61 = vld [vmem:[%s3208_s7 + $0x288] sm:$0xff]  ;;  %v611_v3 = vld [vmem:[%s3199_s17 + $0x290] sm:$0xff]  ;;  %v356_v9 = vld [vmem:[%s3191_s9 + $0x298] sm:$0xff] }
  0xd2   : > { %2392 = vst [vmem:[%s3230_s22 + $0x238] sm:$0xff] %v2136_v18  ;;  %v2137_v30 = vmul.f32 %v1881_v13, %v1625_v19  ;;  %v1627_v31 = vmin.f32 %v1371_v21, 1.0  ;;  %v1883_v32 = vmul.f32 %v859_v20, %v859_v20  ;;  %v861_v33 = vsub.f32 %v349_v16, %v605_v17  ;;  %v1123_v4 = vld [vmem:[%s3208_s7 + $0x290] sm:$0xff]  ;;  %v612_v10 = vld [vmem:[%s3199_s17 + $0x298] sm:$0xff]  ;;  %v357_v16 = vld [vmem:[%s3191_s9 + $0x2a0] sm:$0xff] }
  0xd3   : > { %v2138_v37 = vmul.f32 %v1882_v24, %v1626_v23  ;;  %v1628_v38 = vmin.f32 %v1372_v26, 1.0  ;;  %v1884_v39 = vmul.f32 %v860_v25, %v860_v25  ;;  %v1373_v40 = vmax.f32 %v1117_v22, 0.0  ;;  %v1124_v11 = vld [vmem:[%s3208_s7 + $0x298] sm:$0xff]  ;;  %v613_v17 = vld [vmem:[%s3199_s17 + $0x2a0] sm:$0xff] }
  0xd4   : > { %2393 = vst [vmem:[%s3230_s22 + $0x240] sm:$0xff] %v2137_v30  ;;  %v2139_v44 = vmul.f32 %v1883_v32, %v1627_v31  ;;  %v1885_v45 = vmul.f32 %v861_v33, %v861_v33  ;;  %v862_v46 = vsub.f32 %v350_v27, %v606_v28  ;;  %v1374_v47 = vmax.f32 %v1118_v29, 0.0  ;;  %v1125_v22 = vld [vmem:[%s3208_s7 + $0x2a0] sm:$0xff]  ;;  %v358_v27 = vld [vmem:[%s3191_s9 + $0x2a8] sm:$0xff] }
  0xd5   : > { %2394 = vst [vmem:[%s3230_s22 + $0x248] sm:$0xff] %v2138_v37  ;;  %v2140_v50 = vmul.f32 %v1884_v39, %v1628_v38  ;;  %v1629_v51 = vmin.f32 %v1373_v40, 1.0  ;;  %v863_v52 = vsub.f32 %v351_v34, %v607_v35  ;;  %v1375_v53 = vmax.f32 %v1119_v36, 0.0  ;;  %v614_v28 = vld [vmem:[%s3199_s17 + $0x2a8] sm:$0xff]  ;;  %v359_v34 = vld [vmem:[%s3191_s9 + $0x2b0] sm:$0xff] }
  0xd6   : > { %2395 = vst [vmem:[%s3230_s22 + $0x250] sm:$0xff] %v2139_v44  ;;  %v1630_v55 = vmin.f32 %v1374_v47, 1.0  ;;  %v1886_v56 = vmul.f32 %v862_v46, %v862_v46  ;;  %v864_v57 = vsub.f32 %v352_v41, %v608_v42  ;;  %v1376_v58 = vmax.f32 %v1120_v43, 0.0  ;;  %v1126_v29 = vld [vmem:[%s3208_s7 + $0x2a8] sm:$0xff]  ;;  %v615_v35 = vld [vmem:[%s3199_s17 + $0x2b0] sm:$0xff]  ;;  %v360_v41 = vld [vmem:[%s3191_s9 + $0x2b8] sm:$0xff] }
  0xd7   : > { %2396 = vst [vmem:[%s3230_s22 + $0x258] sm:$0xff] %v2140_v50  ;;  %v2141_v62 = vmul.f32 %v1885_v45, %v1629_v51  ;;  %v1631_v63 = vmin.f32 %v1375_v53, 1.0  ;;  %v1887_v0 = vmul.f32 %v863_v52, %v863_v52  ;;  %v865_v1 = vsub.f32 %v353_v48, %v609_v49  ;;  %v1127_v36 = vld [vmem:[%s3208_s7 + $0x2b0] sm:$0xff]  ;;  %v616_v42 = vld [vmem:[%s3199_s17 + $0x2b8] sm:$0xff]  ;;  %v361_v48 = vld [vmem:[%s3191_s9 + $0x2c0] sm:$0xff] }
  0xd8   : > { %v2142_v5 = vmul.f32 %v1886_v56, %v1630_v55  ;;  %v1632_v6 = vmin.f32 %v1376_v58, 1.0  ;;  %v1888_v7 = vmul.f32 %v864_v57, %v864_v57  ;;  %v1377_v8 = vmax.f32 %v1121_v54, 0.0  ;;  %v1128_v43 = vld [vmem:[%s3208_s7 + $0x2b8] sm:$0xff]  ;;  %v617_v49 = vld [vmem:[%s3199_s17 + $0x2c0] sm:$0xff] }
  0xd9   : > { %2397 = vst [vmem:[%s3230_s22 + $0x260] sm:$0xff] %v2141_v62  ;;  %v2143_v12 = vmul.f32 %v1887_v0, %v1631_v63  ;;  %v1889_v13 = vmul.f32 %v865_v1, %v865_v1  ;;  %v866_v14 = vsub.f32 %v354_v59, %v610_v60  ;;  %v1378_v15 = vmax.f32 %v1122_v61, 0.0  ;;  %v1129_v54 = vld [vmem:[%s3208_s7 + $0x2c0] sm:$0xff]  ;;  %v362_v59 = vld [vmem:[%s3191_s9 + $0x2c8] sm:$0xff] }
  0xda   : > { %2398 = vst [vmem:[%s3230_s22 + $0x268] sm:$0xff] %v2142_v5  ;;  %v2144_v18 = vmul.f32 %v1888_v7, %v1632_v6  ;;  %v1633_v19 = vmin.f32 %v1377_v8, 1.0  ;;  %v867_v20 = vsub.f32 %v355_v2, %v611_v3  ;;  %v1379_v21 = vmax.f32 %v1123_v4, 0.0  ;;  %v618_v60 = vld [vmem:[%s3199_s17 + $0x2c8] sm:$0xff]  ;;  %v363_v2 = vld [vmem:[%s3191_s9 + $0x2d0] sm:$0xff] }
  0xdb   : > { %2399 = vst [vmem:[%s3230_s22 + $0x270] sm:$0xff] %v2143_v12  ;;  %v1634_v23 = vmin.f32 %v1378_v15, 1.0  ;;  %v1890_v24 = vmul.f32 %v866_v14, %v866_v14  ;;  %v868_v25 = vsub.f32 %v356_v9, %v612_v10  ;;  %v1380_v26 = vmax.f32 %v1124_v11, 0.0  ;;  %v1130_v61 = vld [vmem:[%s3208_s7 + $0x2c8] sm:$0xff]  ;;  %v619_v3 = vld [vmem:[%s3199_s17 + $0x2d0] sm:$0xff]  ;;  %v364_v9 = vld [vmem:[%s3191_s9 + $0x2d8] sm:$0xff] }
  0xdc   : > { %2400 = vst [vmem:[%s3230_s22 + $0x278] sm:$0xff] %v2144_v18  ;;  %v2145_v30 = vmul.f32 %v1889_v13, %v1633_v19  ;;  %v1635_v31 = vmin.f32 %v1379_v21, 1.0  ;;  %v1891_v32 = vmul.f32 %v867_v20, %v867_v20  ;;  %v869_v33 = vsub.f32 %v357_v16, %v613_v17  ;;  %v1131_v4 = vld [vmem:[%s3208_s7 + $0x2d0] sm:$0xff]  ;;  %v620_v10 = vld [vmem:[%s3199_s17 + $0x2d8] sm:$0xff]  ;;  %v365_v16 = vld [vmem:[%s3191_s9 + $0x2e0] sm:$0xff] }
  0xdd   : > { %v2146_v37 = vmul.f32 %v1890_v24, %v1634_v23  ;;  %v1636_v38 = vmin.f32 %v1380_v26, 1.0  ;;  %v1892_v39 = vmul.f32 %v868_v25, %v868_v25  ;;  %v1381_v40 = vmax.f32 %v1125_v22, 0.0  ;;  %v1132_v11 = vld [vmem:[%s3208_s7 + $0x2d8] sm:$0xff]  ;;  %v621_v17 = vld [vmem:[%s3199_s17 + $0x2e0] sm:$0xff] }
  0xde   : > { %2401 = vst [vmem:[%s3230_s22 + $0x280] sm:$0xff] %v2145_v30  ;;  %v2147_v44 = vmul.f32 %v1891_v32, %v1635_v31  ;;  %v1893_v45 = vmul.f32 %v869_v33, %v869_v33  ;;  %v870_v46 = vsub.f32 %v358_v27, %v614_v28  ;;  %v1382_v47 = vmax.f32 %v1126_v29, 0.0  ;;  %v1133_v22 = vld [vmem:[%s3208_s7 + $0x2e0] sm:$0xff]  ;;  %v366_v27 = vld [vmem:[%s3191_s9 + $0x2e8] sm:$0xff] }
  0xdf   : > { %2402 = vst [vmem:[%s3230_s22 + $0x288] sm:$0xff] %v2146_v37  ;;  %v2148_v50 = vmul.f32 %v1892_v39, %v1636_v38  ;;  %v1637_v51 = vmin.f32 %v1381_v40, 1.0  ;;  %v871_v52 = vsub.f32 %v359_v34, %v615_v35  ;;  %v1383_v53 = vmax.f32 %v1127_v36, 0.0  ;;  %v622_v28 = vld [vmem:[%s3199_s17 + $0x2e8] sm:$0xff]  ;;  %v367_v34 = vld [vmem:[%s3191_s9 + $0x2f0] sm:$0xff] }
  0xe0   : > { %2403 = vst [vmem:[%s3230_s22 + $0x290] sm:$0xff] %v2147_v44  ;;  %v1638_v55 = vmin.f32 %v1382_v47, 1.0  ;;  %v1894_v56 = vmul.f32 %v870_v46, %v870_v46  ;;  %v872_v57 = vsub.f32 %v360_v41, %v616_v42  ;;  %v1384_v58 = vmax.f32 %v1128_v43, 0.0  ;;  %v1134_v29 = vld [vmem:[%s3208_s7 + $0x2e8] sm:$0xff]  ;;  %v623_v35 = vld [vmem:[%s3199_s17 + $0x2f0] sm:$0xff]  ;;  %v368_v41 = vld [vmem:[%s3191_s9 + $0x2f8] sm:$0xff] }
  0xe1   : > { %2404 = vst [vmem:[%s3230_s22 + $0x298] sm:$0xff] %v2148_v50  ;;  %v2149_v62 = vmul.f32 %v1893_v45, %v1637_v51  ;;  %v1639_v63 = vmin.f32 %v1383_v53, 1.0  ;;  %v1895_v0 = vmul.f32 %v871_v52, %v871_v52  ;;  %v873_v1 = vsub.f32 %v361_v48, %v617_v49  ;;  %v1135_v36 = vld [vmem:[%s3208_s7 + $0x2f0] sm:$0xff]  ;;  %v624_v42 = vld [vmem:[%s3199_s17 + $0x2f8] sm:$0xff]  ;;  %v369_v48 = vld [vmem:[%s3191_s9 + $0x300] sm:$0xff] }
  0xe2   : > { %v2150_v5 = vmul.f32 %v1894_v56, %v1638_v55  ;;  %v1640_v6 = vmin.f32 %v1384_v58, 1.0  ;;  %v1896_v7 = vmul.f32 %v872_v57, %v872_v57  ;;  %v1385_v8 = vmax.f32 %v1129_v54, 0.0  ;;  %v1136_v43 = vld [vmem:[%s3208_s7 + $0x2f8] sm:$0xff]  ;;  %v625_v49 = vld [vmem:[%s3199_s17 + $0x300] sm:$0xff] }
  0xe3   : > { %2405 = vst [vmem:[%s3230_s22 + $0x2a0] sm:$0xff] %v2149_v62  ;;  %v2151_v12 = vmul.f32 %v1895_v0, %v1639_v63  ;;  %v1897_v13 = vmul.f32 %v873_v1, %v873_v1  ;;  %v874_v14 = vsub.f32 %v362_v59, %v618_v60  ;;  %v1386_v15 = vmax.f32 %v1130_v61, 0.0  ;;  %v1137_v54 = vld [vmem:[%s3208_s7 + $0x300] sm:$0xff]  ;;  %v370_v59 = vld [vmem:[%s3191_s9 + $0x308] sm:$0xff] }
  0xe4   : > { %2406 = vst [vmem:[%s3230_s22 + $0x2a8] sm:$0xff] %v2150_v5  ;;  %v2152_v18 = vmul.f32 %v1896_v7, %v1640_v6  ;;  %v1641_v19 = vmin.f32 %v1385_v8, 1.0  ;;  %v875_v20 = vsub.f32 %v363_v2, %v619_v3  ;;  %v1387_v21 = vmax.f32 %v1131_v4, 0.0  ;;  %v626_v60 = vld [vmem:[%s3199_s17 + $0x308] sm:$0xff]  ;;  %v371_v2 = vld [vmem:[%s3191_s9 + $0x310] sm:$0xff] }
  0xe5   : > { %2407 = vst [vmem:[%s3230_s22 + $0x2b0] sm:$0xff] %v2151_v12  ;;  %v1642_v23 = vmin.f32 %v1386_v15, 1.0  ;;  %v1898_v24 = vmul.f32 %v874_v14, %v874_v14  ;;  %v876_v25 = vsub.f32 %v364_v9, %v620_v10  ;;  %v1388_v26 = vmax.f32 %v1132_v11, 0.0  ;;  %v1138_v61 = vld [vmem:[%s3208_s7 + $0x308] sm:$0xff]  ;;  %v627_v3 = vld [vmem:[%s3199_s17 + $0x310] sm:$0xff]  ;;  %v372_v9 = vld [vmem:[%s3191_s9 + $0x318] sm:$0xff] }
  0xe6   : > { %2408 = vst [vmem:[%s3230_s22 + $0x2b8] sm:$0xff] %v2152_v18  ;;  %v2153_v30 = vmul.f32 %v1897_v13, %v1641_v19  ;;  %v1643_v31 = vmin.f32 %v1387_v21, 1.0  ;;  %v1899_v32 = vmul.f32 %v875_v20, %v875_v20  ;;  %v877_v33 = vsub.f32 %v365_v16, %v621_v17  ;;  %v1139_v4 = vld [vmem:[%s3208_s7 + $0x310] sm:$0xff]  ;;  %v628_v10 = vld [vmem:[%s3199_s17 + $0x318] sm:$0xff]  ;;  %v373_v16 = vld [vmem:[%s3191_s9 + $0x320] sm:$0xff] }
  0xe7   : > { %v2154_v37 = vmul.f32 %v1898_v24, %v1642_v23  ;;  %v1644_v38 = vmin.f32 %v1388_v26, 1.0  ;;  %v1900_v39 = vmul.f32 %v876_v25, %v876_v25  ;;  %v1389_v40 = vmax.f32 %v1133_v22, 0.0  ;;  %v1140_v11 = vld [vmem:[%s3208_s7 + $0x318] sm:$0xff]  ;;  %v629_v17 = vld [vmem:[%s3199_s17 + $0x320] sm:$0xff] }
  0xe8   : > { %2409 = vst [vmem:[%s3230_s22 + $0x2c0] sm:$0xff] %v2153_v30  ;;  %v2155_v44 = vmul.f32 %v1899_v32, %v1643_v31  ;;  %v1901_v45 = vmul.f32 %v877_v33, %v877_v33  ;;  %v878_v46 = vsub.f32 %v366_v27, %v622_v28  ;;  %v1390_v47 = vmax.f32 %v1134_v29, 0.0  ;;  %v1141_v22 = vld [vmem:[%s3208_s7 + $0x320] sm:$0xff]  ;;  %v374_v27 = vld [vmem:[%s3191_s9 + $0x328] sm:$0xff] }
  0xe9   : > { %2410 = vst [vmem:[%s3230_s22 + $0x2c8] sm:$0xff] %v2154_v37  ;;  %v2156_v50 = vmul.f32 %v1900_v39, %v1644_v38  ;;  %v1645_v51 = vmin.f32 %v1389_v40, 1.0  ;;  %v879_v52 = vsub.f32 %v367_v34, %v623_v35  ;;  %v1391_v53 = vmax.f32 %v1135_v36, 0.0  ;;  %v630_v28 = vld [vmem:[%s3199_s17 + $0x328] sm:$0xff]  ;;  %v375_v34 = vld [vmem:[%s3191_s9 + $0x330] sm:$0xff] }
  0xea   : > { %2411 = vst [vmem:[%s3230_s22 + $0x2d0] sm:$0xff] %v2155_v44  ;;  %v1646_v55 = vmin.f32 %v1390_v47, 1.0  ;;  %v1902_v56 = vmul.f32 %v878_v46, %v878_v46  ;;  %v880_v57 = vsub.f32 %v368_v41, %v624_v42  ;;  %v1392_v58 = vmax.f32 %v1136_v43, 0.0  ;;  %v1142_v29 = vld [vmem:[%s3208_s7 + $0x328] sm:$0xff]  ;;  %v631_v35 = vld [vmem:[%s3199_s17 + $0x330] sm:$0xff]  ;;  %v376_v41 = vld [vmem:[%s3191_s9 + $0x338] sm:$0xff] }
  0xeb   : > { %2412 = vst [vmem:[%s3230_s22 + $0x2d8] sm:$0xff] %v2156_v50  ;;  %v2157_v62 = vmul.f32 %v1901_v45, %v1645_v51  ;;  %v1647_v63 = vmin.f32 %v1391_v53, 1.0  ;;  %v1903_v0 = vmul.f32 %v879_v52, %v879_v52  ;;  %v881_v1 = vsub.f32 %v369_v48, %v625_v49  ;;  %v1143_v36 = vld [vmem:[%s3208_s7 + $0x330] sm:$0xff]  ;;  %v632_v42 = vld [vmem:[%s3199_s17 + $0x338] sm:$0xff]  ;;  %v377_v48 = vld [vmem:[%s3191_s9 + $0x340] sm:$0xff] }
  0xec   : > { %v2158_v5 = vmul.f32 %v1902_v56, %v1646_v55  ;;  %v1648_v6 = vmin.f32 %v1392_v58, 1.0  ;;  %v1904_v7 = vmul.f32 %v880_v57, %v880_v57  ;;  %v1393_v8 = vmax.f32 %v1137_v54, 0.0  ;;  %v1144_v43 = vld [vmem:[%s3208_s7 + $0x338] sm:$0xff]  ;;  %v633_v49 = vld [vmem:[%s3199_s17 + $0x340] sm:$0xff] }
  0xed   : > { %2413 = vst [vmem:[%s3230_s22 + $0x2e0] sm:$0xff] %v2157_v62  ;;  %v2159_v12 = vmul.f32 %v1903_v0, %v1647_v63  ;;  %v1905_v13 = vmul.f32 %v881_v1, %v881_v1  ;;  %v882_v14 = vsub.f32 %v370_v59, %v626_v60  ;;  %v1394_v15 = vmax.f32 %v1138_v61, 0.0  ;;  %v1145_v54 = vld [vmem:[%s3208_s7 + $0x340] sm:$0xff]  ;;  %v378_v59 = vld [vmem:[%s3191_s9 + $0x348] sm:$0xff] }
  0xee   : > { %2414 = vst [vmem:[%s3230_s22 + $0x2e8] sm:$0xff] %v2158_v5  ;;  %v2160_v18 = vmul.f32 %v1904_v7, %v1648_v6  ;;  %v1649_v19 = vmin.f32 %v1393_v8, 1.0  ;;  %v883_v20 = vsub.f32 %v371_v2, %v627_v3  ;;  %v1395_v21 = vmax.f32 %v1139_v4, 0.0  ;;  %v634_v60 = vld [vmem:[%s3199_s17 + $0x348] sm:$0xff]  ;;  %v379_v2 = vld [vmem:[%s3191_s9 + $0x350] sm:$0xff] }
  0xef   : > { %2415 = vst [vmem:[%s3230_s22 + $0x2f0] sm:$0xff] %v2159_v12  ;;  %v1650_v23 = vmin.f32 %v1394_v15, 1.0  ;;  %v1906_v24 = vmul.f32 %v882_v14, %v882_v14  ;;  %v884_v25 = vsub.f32 %v372_v9, %v628_v10  ;;  %v1396_v26 = vmax.f32 %v1140_v11, 0.0  ;;  %v1146_v61 = vld [vmem:[%s3208_s7 + $0x348] sm:$0xff]  ;;  %v635_v3 = vld [vmem:[%s3199_s17 + $0x350] sm:$0xff]  ;;  %v380_v9 = vld [vmem:[%s3191_s9 + $0x358] sm:$0xff] }
  0xf0   : > { %2416 = vst [vmem:[%s3230_s22 + $0x2f8] sm:$0xff] %v2160_v18  ;;  %v2161_v30 = vmul.f32 %v1905_v13, %v1649_v19  ;;  %v1651_v31 = vmin.f32 %v1395_v21, 1.0  ;;  %v1907_v32 = vmul.f32 %v883_v20, %v883_v20  ;;  %v885_v33 = vsub.f32 %v373_v16, %v629_v17  ;;  %v1147_v4 = vld [vmem:[%s3208_s7 + $0x350] sm:$0xff]  ;;  %v636_v10 = vld [vmem:[%s3199_s17 + $0x358] sm:$0xff]  ;;  %v381_v16 = vld [vmem:[%s3191_s9 + $0x360] sm:$0xff] }
  0xf1   : > { %v2162_v37 = vmul.f32 %v1906_v24, %v1650_v23  ;;  %v1652_v38 = vmin.f32 %v1396_v26, 1.0  ;;  %v1908_v39 = vmul.f32 %v884_v25, %v884_v25  ;;  %v1397_v40 = vmax.f32 %v1141_v22, 0.0  ;;  %v1148_v11 = vld [vmem:[%s3208_s7 + $0x358] sm:$0xff]  ;;  %v637_v17 = vld [vmem:[%s3199_s17 + $0x360] sm:$0xff] }
  0xf2   : > { %2417 = vst [vmem:[%s3230_s22 + $0x300] sm:$0xff] %v2161_v30  ;;  %v2163_v44 = vmul.f32 %v1907_v32, %v1651_v31  ;;  %v1909_v45 = vmul.f32 %v885_v33, %v885_v33  ;;  %v886_v46 = vsub.f32 %v374_v27, %v630_v28  ;;  %v1398_v47 = vmax.f32 %v1142_v29, 0.0  ;;  %v1149_v22 = vld [vmem:[%s3208_s7 + $0x360] sm:$0xff]  ;;  %v382_v27 = vld [vmem:[%s3191_s9 + $0x368] sm:$0xff] }
  0xf3   : > { %2418 = vst [vmem:[%s3230_s22 + $0x308] sm:$0xff] %v2162_v37  ;;  %v2164_v50 = vmul.f32 %v1908_v39, %v1652_v38  ;;  %v1653_v51 = vmin.f32 %v1397_v40, 1.0  ;;  %v887_v52 = vsub.f32 %v375_v34, %v631_v35  ;;  %v1399_v53 = vmax.f32 %v1143_v36, 0.0  ;;  %v638_v28 = vld [vmem:[%s3199_s17 + $0x368] sm:$0xff]  ;;  %v383_v34 = vld [vmem:[%s3191_s9 + $0x370] sm:$0xff] }
  0xf4   : > { %2419 = vst [vmem:[%s3230_s22 + $0x310] sm:$0xff] %v2163_v44  ;;  %v1654_v55 = vmin.f32 %v1398_v47, 1.0  ;;  %v1910_v56 = vmul.f32 %v886_v46, %v886_v46  ;;  %v888_v57 = vsub.f32 %v376_v41, %v632_v42  ;;  %v1400_v58 = vmax.f32 %v1144_v43, 0.0  ;;  %v1150_v29 = vld [vmem:[%s3208_s7 + $0x368] sm:$0xff]  ;;  %v639_v35 = vld [vmem:[%s3199_s17 + $0x370] sm:$0xff]  ;;  %v384_v41 = vld [vmem:[%s3191_s9 + $0x378] sm:$0xff] }
  0xf5   : > { %2420 = vst [vmem:[%s3230_s22 + $0x318] sm:$0xff] %v2164_v50  ;;  %v2165_v62 = vmul.f32 %v1909_v45, %v1653_v51  ;;  %v1655_v63 = vmin.f32 %v1399_v53, 1.0  ;;  %v1911_v0 = vmul.f32 %v887_v52, %v887_v52  ;;  %v889_v1 = vsub.f32 %v377_v48, %v633_v49  ;;  %v1151_v36 = vld [vmem:[%s3208_s7 + $0x370] sm:$0xff]  ;;  %v640_v42 = vld [vmem:[%s3199_s17 + $0x378] sm:$0xff]  ;;  %v385_v48 = vld [vmem:[%s3191_s9 + $0x380] sm:$0xff] }
  0xf6   : > { %v2166_v5 = vmul.f32 %v1910_v56, %v1654_v55  ;;  %v1656_v6 = vmin.f32 %v1400_v58, 1.0  ;;  %v1912_v7 = vmul.f32 %v888_v57, %v888_v57  ;;  %v1401_v8 = vmax.f32 %v1145_v54, 0.0  ;;  %v1152_v43 = vld [vmem:[%s3208_s7 + $0x378] sm:$0xff]  ;;  %v641_v49 = vld [vmem:[%s3199_s17 + $0x380] sm:$0xff] }
  0xf7   : > { %2421 = vst [vmem:[%s3230_s22 + $0x320] sm:$0xff] %v2165_v62  ;;  %v2167_v12 = vmul.f32 %v1911_v0, %v1655_v63  ;;  %v1913_v13 = vmul.f32 %v889_v1, %v889_v1  ;;  %v890_v14 = vsub.f32 %v378_v59, %v634_v60  ;;  %v1402_v15 = vmax.f32 %v1146_v61, 0.0  ;;  %v1153_v54 = vld [vmem:[%s3208_s7 + $0x380] sm:$0xff]  ;;  %v386_v59 = vld [vmem:[%s3191_s9 + $0x388] sm:$0xff] }
  0xf8   : > { %2422 = vst [vmem:[%s3230_s22 + $0x328] sm:$0xff] %v2166_v5  ;;  %v2168_v18 = vmul.f32 %v1912_v7, %v1656_v6  ;;  %v1657_v19 = vmin.f32 %v1401_v8, 1.0  ;;  %v891_v20 = vsub.f32 %v379_v2, %v635_v3  ;;  %v1403_v21 = vmax.f32 %v1147_v4, 0.0  ;;  %v642_v60 = vld [vmem:[%s3199_s17 + $0x388] sm:$0xff]  ;;  %v387_v2 = vld [vmem:[%s3191_s9 + $0x390] sm:$0xff] }
  0xf9   : > { %2423 = vst [vmem:[%s3230_s22 + $0x330] sm:$0xff] %v2167_v12  ;;  %v1658_v23 = vmin.f32 %v1402_v15, 1.0  ;;  %v1914_v24 = vmul.f32 %v890_v14, %v890_v14  ;;  %v892_v25 = vsub.f32 %v380_v9, %v636_v10  ;;  %v1404_v26 = vmax.f32 %v1148_v11, 0.0  ;;  %v1154_v61 = vld [vmem:[%s3208_s7 + $0x388] sm:$0xff]  ;;  %v643_v3 = vld [vmem:[%s3199_s17 + $0x390] sm:$0xff]  ;;  %v388_v9 = vld [vmem:[%s3191_s9 + $0x398] sm:$0xff] }
  0xfa   : > { %2424 = vst [vmem:[%s3230_s22 + $0x338] sm:$0xff] %v2168_v18  ;;  %v2169_v30 = vmul.f32 %v1913_v13, %v1657_v19  ;;  %v1659_v31 = vmin.f32 %v1403_v21, 1.0  ;;  %v1915_v32 = vmul.f32 %v891_v20, %v891_v20  ;;  %v893_v33 = vsub.f32 %v381_v16, %v637_v17  ;;  %v1155_v4 = vld [vmem:[%s3208_s7 + $0x390] sm:$0xff]  ;;  %v644_v10 = vld [vmem:[%s3199_s17 + $0x398] sm:$0xff]  ;;  %v389_v16 = vld [vmem:[%s3191_s9 + $0x3a0] sm:$0xff] }
  0xfb   : > { %v2170_v37 = vmul.f32 %v1914_v24, %v1658_v23  ;;  %v1660_v38 = vmin.f32 %v1404_v26, 1.0  ;;  %v1916_v39 = vmul.f32 %v892_v25, %v892_v25  ;;  %v1405_v40 = vmax.f32 %v1149_v22, 0.0  ;;  %v1156_v11 = vld [vmem:[%s3208_s7 + $0x398] sm:$0xff]  ;;  %v645_v17 = vld [vmem:[%s3199_s17 + $0x3a0] sm:$0xff] }
  0xfc   : > { %2425 = vst [vmem:[%s3230_s22 + $0x340] sm:$0xff] %v2169_v30  ;;  %v2171_v44 = vmul.f32 %v1915_v32, %v1659_v31  ;;  %v1917_v45 = vmul.f32 %v893_v33, %v893_v33  ;;  %v894_v46 = vsub.f32 %v382_v27, %v638_v28  ;;  %v1406_v47 = vmax.f32 %v1150_v29, 0.0  ;;  %v1157_v22 = vld [vmem:[%s3208_s7 + $0x3a0] sm:$0xff]  ;;  %v390_v27 = vld [vmem:[%s3191_s9 + $0x3a8] sm:$0xff] }
  0xfd   : > { %2426 = vst [vmem:[%s3230_s22 + $0x348] sm:$0xff] %v2170_v37  ;;  %v2172_v50 = vmul.f32 %v1916_v39, %v1660_v38  ;;  %v1661_v51 = vmin.f32 %v1405_v40, 1.0  ;;  %v895_v52 = vsub.f32 %v383_v34, %v639_v35  ;;  %v1407_v53 = vmax.f32 %v1151_v36, 0.0  ;;  %v646_v28 = vld [vmem:[%s3199_s17 + $0x3a8] sm:$0xff]  ;;  %v391_v34 = vld [vmem:[%s3191_s9 + $0x3b0] sm:$0xff] }
  0xfe   : > { %2427 = vst [vmem:[%s3230_s22 + $0x350] sm:$0xff] %v2171_v44  ;;  %v1662_v55 = vmin.f32 %v1406_v47, 1.0  ;;  %v1918_v56 = vmul.f32 %v894_v46, %v894_v46  ;;  %v896_v57 = vsub.f32 %v384_v41, %v640_v42  ;;  %v1408_v58 = vmax.f32 %v1152_v43, 0.0  ;;  %v1158_v29 = vld [vmem:[%s3208_s7 + $0x3a8] sm:$0xff]  ;;  %v647_v35 = vld [vmem:[%s3199_s17 + $0x3b0] sm:$0xff]  ;;  %v392_v41 = vld [vmem:[%s3191_s9 + $0x3b8] sm:$0xff] }
  0xff   : > { %2428 = vst [vmem:[%s3230_s22 + $0x358] sm:$0xff] %v2172_v50  ;;  %v2173_v62 = vmul.f32 %v1917_v45, %v1661_v51  ;;  %v1663_v63 = vmin.f32 %v1407_v53, 1.0  ;;  %v1919_v0 = vmul.f32 %v895_v52, %v895_v52  ;;  %v897_v1 = vsub.f32 %v385_v48, %v641_v49  ;;  %v1159_v36 = vld [vmem:[%s3208_s7 + $0x3b0] sm:$0xff]  ;;  %v648_v42 = vld [vmem:[%s3199_s17 + $0x3b8] sm:$0xff]  ;;  %v393_v48 = vld [vmem:[%s3191_s9 + $0x3c0] sm:$0xff] }
 0x100   : > { %v2174_v5 = vmul.f32 %v1918_v56, %v1662_v55  ;;  %v1664_v6 = vmin.f32 %v1408_v58, 1.0  ;;  %v1920_v7 = vmul.f32 %v896_v57, %v896_v57  ;;  %v1409_v8 = vmax.f32 %v1153_v54, 0.0  ;;  %v1160_v43 = vld [vmem:[%s3208_s7 + $0x3b8] sm:$0xff]  ;;  %v649_v49 = vld [vmem:[%s3199_s17 + $0x3c0] sm:$0xff] }
 0x101   : > { %2429 = vst [vmem:[%s3230_s22 + $0x360] sm:$0xff] %v2173_v62  ;;  %v2175_v12 = vmul.f32 %v1919_v0, %v1663_v63  ;;  %v1921_v13 = vmul.f32 %v897_v1, %v897_v1  ;;  %v898_v14 = vsub.f32 %v386_v59, %v642_v60  ;;  %v1410_v15 = vmax.f32 %v1154_v61, 0.0  ;;  %v1161_v54 = vld [vmem:[%s3208_s7 + $0x3c0] sm:$0xff]  ;;  %v394_v59 = vld [vmem:[%s3191_s9 + $0x3c8] sm:$0xff] }
 0x102   : > { %2430 = vst [vmem:[%s3230_s22 + $0x368] sm:$0xff] %v2174_v5  ;;  %v2176_v18 = vmul.f32 %v1920_v7, %v1664_v6  ;;  %v1665_v19 = vmin.f32 %v1409_v8, 1.0  ;;  %v899_v20 = vsub.f32 %v387_v2, %v643_v3  ;;  %v1411_v21 = vmax.f32 %v1155_v4, 0.0  ;;  %v650_v60 = vld [vmem:[%s3199_s17 + $0x3c8] sm:$0xff]  ;;  %v395_v2 = vld [vmem:[%s3191_s9 + $0x3d0] sm:$0xff] }
 0x103   : > { %2431 = vst [vmem:[%s3230_s22 + $0x370] sm:$0xff] %v2175_v12  ;;  %v1666_v23 = vmin.f32 %v1410_v15, 1.0  ;;  %v1922_v24 = vmul.f32 %v898_v14, %v898_v14  ;;  %v900_v25 = vsub.f32 %v388_v9, %v644_v10  ;;  %v1412_v26 = vmax.f32 %v1156_v11, 0.0  ;;  %v1162_v61 = vld [vmem:[%s3208_s7 + $0x3c8] sm:$0xff]  ;;  %v651_v3 = vld [vmem:[%s3199_s17 + $0x3d0] sm:$0xff]  ;;  %v396_v9 = vld [vmem:[%s3191_s9 + $0x3d8] sm:$0xff] }
 0x104   : > { %2432 = vst [vmem:[%s3230_s22 + $0x378] sm:$0xff] %v2176_v18  ;;  %v2177_v30 = vmul.f32 %v1921_v13, %v1665_v19  ;;  %v1667_v31 = vmin.f32 %v1411_v21, 1.0  ;;  %v1923_v32 = vmul.f32 %v899_v20, %v899_v20  ;;  %v901_v33 = vsub.f32 %v389_v16, %v645_v17  ;;  %v1163_v4 = vld [vmem:[%s3208_s7 + $0x3d0] sm:$0xff]  ;;  %v652_v10 = vld [vmem:[%s3199_s17 + $0x3d8] sm:$0xff]  ;;  %v397_v16 = vld [vmem:[%s3191_s9 + $0x3e0] sm:$0xff] }
 0x105   : > { %v2178_v37 = vmul.f32 %v1922_v24, %v1666_v23  ;;  %v1668_v38 = vmin.f32 %v1412_v26, 1.0  ;;  %v1924_v39 = vmul.f32 %v900_v25, %v900_v25  ;;  %v1413_v40 = vmax.f32 %v1157_v22, 0.0  ;;  %v1164_v11 = vld [vmem:[%s3208_s7 + $0x3d8] sm:$0xff]  ;;  %v653_v17 = vld [vmem:[%s3199_s17 + $0x3e0] sm:$0xff] }
 0x106   : > { %2433 = vst [vmem:[%s3230_s22 + $0x380] sm:$0xff] %v2177_v30  ;;  %v2179_v44 = vmul.f32 %v1923_v32, %v1667_v31  ;;  %v1925_v45 = vmul.f32 %v901_v33, %v901_v33  ;;  %v902_v46 = vsub.f32 %v390_v27, %v646_v28  ;;  %v1414_v47 = vmax.f32 %v1158_v29, 0.0  ;;  %v1165_v22 = vld [vmem:[%s3208_s7 + $0x3e0] sm:$0xff]  ;;  %v398_v27 = vld [vmem:[%s3191_s9 + $0x3e8] sm:$0xff] }
 0x107   : > { %2434 = vst [vmem:[%s3230_s22 + $0x388] sm:$0xff] %v2178_v37  ;;  %v2180_v50 = vmul.f32 %v1924_v39, %v1668_v38  ;;  %v1669_v51 = vmin.f32 %v1413_v40, 1.0  ;;  %v903_v52 = vsub.f32 %v391_v34, %v647_v35  ;;  %v1415_v53 = vmax.f32 %v1159_v36, 0.0  ;;  %v654_v28 = vld [vmem:[%s3199_s17 + $0x3e8] sm:$0xff]  ;;  %v399_v34 = vld [vmem:[%s3191_s9 + $0x3f0] sm:$0xff] }
 0x108   : > { %2435 = vst [vmem:[%s3230_s22 + $0x390] sm:$0xff] %v2179_v44  ;;  %v1670_v55 = vmin.f32 %v1414_v47, 1.0  ;;  %v1926_v56 = vmul.f32 %v902_v46, %v902_v46  ;;  %v904_v57 = vsub.f32 %v392_v41, %v648_v42  ;;  %v1416_v58 = vmax.f32 %v1160_v43, 0.0  ;;  %v1166_v29 = vld [vmem:[%s3208_s7 + $0x3e8] sm:$0xff]  ;;  %v655_v35 = vld [vmem:[%s3199_s17 + $0x3f0] sm:$0xff]  ;;  %v400_v41 = vld [vmem:[%s3191_s9 + $0x3f8] sm:$0xff] }
 0x109   : > { %2436 = vst [vmem:[%s3230_s22 + $0x398] sm:$0xff] %v2180_v50  ;;  %v2181_v62 = vmul.f32 %v1925_v45, %v1669_v51  ;;  %v1671_v63 = vmin.f32 %v1415_v53, 1.0  ;;  %v1927_v0 = vmul.f32 %v903_v52, %v903_v52  ;;  %v905_v1 = vsub.f32 %v393_v48, %v649_v49  ;;  %v1167_v36 = vld [vmem:[%s3208_s7 + $0x3f0] sm:$0xff]  ;;  %v656_v42 = vld [vmem:[%s3199_s17 + $0x3f8] sm:$0xff]  ;;  %v401_v48 = vld [vmem:[%s3191_s9 + $0x400] sm:$0xff] }
 0x10a   : > { %v2182_v5 = vmul.f32 %v1926_v56, %v1670_v55  ;;  %v1672_v6 = vmin.f32 %v1416_v58, 1.0  ;;  %v1928_v7 = vmul.f32 %v904_v57, %v904_v57  ;;  %v1417_v8 = vmax.f32 %v1161_v54, 0.0  ;;  %v1168_v43 = vld [vmem:[%s3208_s7 + $0x3f8] sm:$0xff]  ;;  %v657_v49 = vld [vmem:[%s3199_s17 + $0x400] sm:$0xff] }
 0x10b   : > { %2437 = vst [vmem:[%s3230_s22 + $0x3a0] sm:$0xff] %v2181_v62  ;;  %v2183_v12 = vmul.f32 %v1927_v0, %v1671_v63  ;;  %v1929_v13 = vmul.f32 %v905_v1, %v905_v1  ;;  %v906_v14 = vsub.f32 %v394_v59, %v650_v60  ;;  %v1418_v15 = vmax.f32 %v1162_v61, 0.0  ;;  %v1169_v54 = vld [vmem:[%s3208_s7 + $0x400] sm:$0xff]  ;;  %v402_v59 = vld [vmem:[%s3191_s9 + $0x408] sm:$0xff] }
 0x10c   : > { %2438 = vst [vmem:[%s3230_s22 + $0x3a8] sm:$0xff] %v2182_v5  ;;  %v2184_v18 = vmul.f32 %v1928_v7, %v1672_v6  ;;  %v1673_v19 = vmin.f32 %v1417_v8, 1.0  ;;  %v907_v20 = vsub.f32 %v395_v2, %v651_v3  ;;  %v1419_v21 = vmax.f32 %v1163_v4, 0.0  ;;  %v658_v60 = vld [vmem:[%s3199_s17 + $0x408] sm:$0xff]  ;;  %v403_v2 = vld [vmem:[%s3191_s9 + $0x410] sm:$0xff] }
 0x10d   : > { %2439 = vst [vmem:[%s3230_s22 + $0x3b0] sm:$0xff] %v2183_v12  ;;  %v1674_v23 = vmin.f32 %v1418_v15, 1.0  ;;  %v1930_v24 = vmul.f32 %v906_v14, %v906_v14  ;;  %v908_v25 = vsub.f32 %v396_v9, %v652_v10  ;;  %v1420_v26 = vmax.f32 %v1164_v11, 0.0  ;;  %v1170_v61 = vld [vmem:[%s3208_s7 + $0x408] sm:$0xff]  ;;  %v659_v3 = vld [vmem:[%s3199_s17 + $0x410] sm:$0xff]  ;;  %v404_v9 = vld [vmem:[%s3191_s9 + $0x418] sm:$0xff] }
 0x10e   : > { %2440 = vst [vmem:[%s3230_s22 + $0x3b8] sm:$0xff] %v2184_v18  ;;  %v2185_v30 = vmul.f32 %v1929_v13, %v1673_v19  ;;  %v1675_v31 = vmin.f32 %v1419_v21, 1.0  ;;  %v1931_v32 = vmul.f32 %v907_v20, %v907_v20  ;;  %v909_v33 = vsub.f32 %v397_v16, %v653_v17  ;;  %v1171_v4 = vld [vmem:[%s3208_s7 + $0x410] sm:$0xff]  ;;  %v660_v10 = vld [vmem:[%s3199_s17 + $0x418] sm:$0xff]  ;;  %v405_v16 = vld [vmem:[%s3191_s9 + $0x420] sm:$0xff] }
 0x10f   : > { %v2186_v37 = vmul.f32 %v1930_v24, %v1674_v23  ;;  %v1676_v38 = vmin.f32 %v1420_v26, 1.0  ;;  %v1932_v39 = vmul.f32 %v908_v25, %v908_v25  ;;  %v1421_v40 = vmax.f32 %v1165_v22, 0.0  ;;  %v1172_v11 = vld [vmem:[%s3208_s7 + $0x418] sm:$0xff]  ;;  %v661_v17 = vld [vmem:[%s3199_s17 + $0x420] sm:$0xff] }
 0x110   : > { %2441 = vst [vmem:[%s3230_s22 + $0x3c0] sm:$0xff] %v2185_v30  ;;  %v2187_v44 = vmul.f32 %v1931_v32, %v1675_v31  ;;  %v1933_v45 = vmul.f32 %v909_v33, %v909_v33  ;;  %v910_v46 = vsub.f32 %v398_v27, %v654_v28  ;;  %v1422_v47 = vmax.f32 %v1166_v29, 0.0  ;;  %v1173_v22 = vld [vmem:[%s3208_s7 + $0x420] sm:$0xff]  ;;  %v406_v27 = vld [vmem:[%s3191_s9 + $0x428] sm:$0xff] }
 0x111   : > { %2442 = vst [vmem:[%s3230_s22 + $0x3c8] sm:$0xff] %v2186_v37  ;;  %v2188_v50 = vmul.f32 %v1932_v39, %v1676_v38  ;;  %v1677_v51 = vmin.f32 %v1421_v40, 1.0  ;;  %v911_v52 = vsub.f32 %v399_v34, %v655_v35  ;;  %v1423_v53 = vmax.f32 %v1167_v36, 0.0  ;;  %v662_v28 = vld [vmem:[%s3199_s17 + $0x428] sm:$0xff]  ;;  %v407_v34 = vld [vmem:[%s3191_s9 + $0x430] sm:$0xff] }
 0x112   : > { %2443 = vst [vmem:[%s3230_s22 + $0x3d0] sm:$0xff] %v2187_v44  ;;  %v1678_v55 = vmin.f32 %v1422_v47, 1.0  ;;  %v1934_v56 = vmul.f32 %v910_v46, %v910_v46  ;;  %v912_v57 = vsub.f32 %v400_v41, %v656_v42  ;;  %v1424_v58 = vmax.f32 %v1168_v43, 0.0  ;;  %v1174_v29 = vld [vmem:[%s3208_s7 + $0x428] sm:$0xff]  ;;  %v663_v35 = vld [vmem:[%s3199_s17 + $0x430] sm:$0xff]  ;;  %v408_v41 = vld [vmem:[%s3191_s9 + $0x438] sm:$0xff] }
 0x113   : > { %2444 = vst [vmem:[%s3230_s22 + $0x3d8] sm:$0xff] %v2188_v50  ;;  %v2189_v62 = vmul.f32 %v1933_v45, %v1677_v51  ;;  %v1679_v63 = vmin.f32 %v1423_v53, 1.0  ;;  %v1935_v0 = vmul.f32 %v911_v52, %v911_v52  ;;  %v913_v1 = vsub.f32 %v401_v48, %v657_v49  ;;  %v1175_v36 = vld [vmem:[%s3208_s7 + $0x430] sm:$0xff]  ;;  %v664_v42 = vld [vmem:[%s3199_s17 + $0x438] sm:$0xff]  ;;  %v409_v48 = vld [vmem:[%s3191_s9 + $0x440] sm:$0xff] }
 0x114   : > { %v2190_v5 = vmul.f32 %v1934_v56, %v1678_v55  ;;  %v1680_v6 = vmin.f32 %v1424_v58, 1.0  ;;  %v1936_v7 = vmul.f32 %v912_v57, %v912_v57  ;;  %v1425_v8 = vmax.f32 %v1169_v54, 0.0  ;;  %v1176_v43 = vld [vmem:[%s3208_s7 + $0x438] sm:$0xff]  ;;  %v665_v49 = vld [vmem:[%s3199_s17 + $0x440] sm:$0xff] }
 0x115   : > { %2445 = vst [vmem:[%s3230_s22 + $0x3e0] sm:$0xff] %v2189_v62  ;;  %v2191_v12 = vmul.f32 %v1935_v0, %v1679_v63  ;;  %v1937_v13 = vmul.f32 %v913_v1, %v913_v1  ;;  %v914_v14 = vsub.f32 %v402_v59, %v658_v60  ;;  %v1426_v15 = vmax.f32 %v1170_v61, 0.0  ;;  %v1177_v54 = vld [vmem:[%s3208_s7 + $0x440] sm:$0xff]  ;;  %v410_v59 = vld [vmem:[%s3191_s9 + $0x448] sm:$0xff] }
 0x116   : > { %2446 = vst [vmem:[%s3230_s22 + $0x3e8] sm:$0xff] %v2190_v5  ;;  %v2192_v18 = vmul.f32 %v1936_v7, %v1680_v6  ;;  %v1681_v19 = vmin.f32 %v1425_v8, 1.0  ;;  %v915_v20 = vsub.f32 %v403_v2, %v659_v3  ;;  %v1427_v21 = vmax.f32 %v1171_v4, 0.0  ;;  %v666_v60 = vld [vmem:[%s3199_s17 + $0x448] sm:$0xff]  ;;  %v411_v2 = vld [vmem:[%s3191_s9 + $0x450] sm:$0xff] }
 0x117   : > { %2447 = vst [vmem:[%s3230_s22 + $0x3f0] sm:$0xff] %v2191_v12  ;;  %v1682_v23 = vmin.f32 %v1426_v15, 1.0  ;;  %v1938_v24 = vmul.f32 %v914_v14, %v914_v14  ;;  %v916_v25 = vsub.f32 %v404_v9, %v660_v10  ;;  %v1428_v26 = vmax.f32 %v1172_v11, 0.0  ;;  %v1178_v61 = vld [vmem:[%s3208_s7 + $0x448] sm:$0xff]  ;;  %v667_v3 = vld [vmem:[%s3199_s17 + $0x450] sm:$0xff]  ;;  %v412_v9 = vld [vmem:[%s3191_s9 + $0x458] sm:$0xff] }
 0x118   : > { %2448 = vst [vmem:[%s3230_s22 + $0x3f8] sm:$0xff] %v2192_v18  ;;  %v2193_v30 = vmul.f32 %v1937_v13, %v1681_v19  ;;  %v1683_v31 = vmin.f32 %v1427_v21, 1.0  ;;  %v1939_v32 = vmul.f32 %v915_v20, %v915_v20  ;;  %v917_v33 = vsub.f32 %v405_v16, %v661_v17  ;;  %v1179_v4 = vld [vmem:[%s3208_s7 + $0x450] sm:$0xff]  ;;  %v668_v10 = vld [vmem:[%s3199_s17 + $0x458] sm:$0xff]  ;;  %v413_v16 = vld [vmem:[%s3191_s9 + $0x460] sm:$0xff] }
 0x119   : > { %v2194_v37 = vmul.f32 %v1938_v24, %v1682_v23  ;;  %v1684_v38 = vmin.f32 %v1428_v26, 1.0  ;;  %v1940_v39 = vmul.f32 %v916_v25, %v916_v25  ;;  %v1429_v40 = vmax.f32 %v1173_v22, 0.0  ;;  %v1180_v11 = vld [vmem:[%s3208_s7 + $0x458] sm:$0xff]  ;;  %v669_v17 = vld [vmem:[%s3199_s17 + $0x460] sm:$0xff] }
 0x11a   : > { %2449 = vst [vmem:[%s3230_s22 + $0x400] sm:$0xff] %v2193_v30  ;;  %v2195_v44 = vmul.f32 %v1939_v32, %v1683_v31  ;;  %v1941_v45 = vmul.f32 %v917_v33, %v917_v33  ;;  %v918_v46 = vsub.f32 %v406_v27, %v662_v28  ;;  %v1430_v47 = vmax.f32 %v1174_v29, 0.0  ;;  %v1181_v22 = vld [vmem:[%s3208_s7 + $0x460] sm:$0xff]  ;;  %v414_v27 = vld [vmem:[%s3191_s9 + $0x468] sm:$0xff] }
 0x11b   : > { %2450 = vst [vmem:[%s3230_s22 + $0x408] sm:$0xff] %v2194_v37  ;;  %v2196_v50 = vmul.f32 %v1940_v39, %v1684_v38  ;;  %v1685_v51 = vmin.f32 %v1429_v40, 1.0  ;;  %v919_v52 = vsub.f32 %v407_v34, %v663_v35  ;;  %v1431_v53 = vmax.f32 %v1175_v36, 0.0  ;;  %v670_v28 = vld [vmem:[%s3199_s17 + $0x468] sm:$0xff]  ;;  %v415_v34 = vld [vmem:[%s3191_s9 + $0x470] sm:$0xff] }
 0x11c   : > { %2451 = vst [vmem:[%s3230_s22 + $0x410] sm:$0xff] %v2195_v44  ;;  %v1686_v55 = vmin.f32 %v1430_v47, 1.0  ;;  %v1942_v56 = vmul.f32 %v918_v46, %v918_v46  ;;  %v920_v57 = vsub.f32 %v408_v41, %v664_v42  ;;  %v1432_v58 = vmax.f32 %v1176_v43, 0.0  ;;  %v1182_v29 = vld [vmem:[%s3208_s7 + $0x468] sm:$0xff]  ;;  %v671_v35 = vld [vmem:[%s3199_s17 + $0x470] sm:$0xff]  ;;  %v416_v41 = vld [vmem:[%s3191_s9 + $0x478] sm:$0xff] }
 0x11d   : > { %2452 = vst [vmem:[%s3230_s22 + $0x418] sm:$0xff] %v2196_v50  ;;  %v2197_v62 = vmul.f32 %v1941_v45, %v1685_v51  ;;  %v1687_v63 = vmin.f32 %v1431_v53, 1.0  ;;  %v1943_v0 = vmul.f32 %v919_v52, %v919_v52  ;;  %v921_v1 = vsub.f32 %v409_v48, %v665_v49  ;;  %v1183_v36 = vld [vmem:[%s3208_s7 + $0x470] sm:$0xff]  ;;  %v672_v42 = vld [vmem:[%s3199_s17 + $0x478] sm:$0xff]  ;;  %v417_v48 = vld [vmem:[%s3191_s9 + $0x480] sm:$0xff] }
 0x11e   : > { %v2198_v5 = vmul.f32 %v1942_v56, %v1686_v55  ;;  %v1688_v6 = vmin.f32 %v1432_v58, 1.0  ;;  %v1944_v7 = vmul.f32 %v920_v57, %v920_v57  ;;  %v1433_v8 = vmax.f32 %v1177_v54, 0.0  ;;  %v1184_v43 = vld [vmem:[%s3208_s7 + $0x478] sm:$0xff]  ;;  %v673_v49 = vld [vmem:[%s3199_s17 + $0x480] sm:$0xff] }
 0x11f   : > { %2453 = vst [vmem:[%s3230_s22 + $0x420] sm:$0xff] %v2197_v62  ;;  %v2199_v12 = vmul.f32 %v1943_v0, %v1687_v63  ;;  %v1945_v13 = vmul.f32 %v921_v1, %v921_v1  ;;  %v922_v14 = vsub.f32 %v410_v59, %v666_v60  ;;  %v1434_v15 = vmax.f32 %v1178_v61, 0.0  ;;  %v1185_v54 = vld [vmem:[%s3208_s7 + $0x480] sm:$0xff]  ;;  %v418_v59 = vld [vmem:[%s3191_s9 + $0x488] sm:$0xff] }
 0x120   : > { %2454 = vst [vmem:[%s3230_s22 + $0x428] sm:$0xff] %v2198_v5  ;;  %v2200_v18 = vmul.f32 %v1944_v7, %v1688_v6  ;;  %v1689_v19 = vmin.f32 %v1433_v8, 1.0  ;;  %v923_v20 = vsub.f32 %v411_v2, %v667_v3  ;;  %v1435_v21 = vmax.f32 %v1179_v4, 0.0  ;;  %v674_v60 = vld [vmem:[%s3199_s17 + $0x488] sm:$0xff]  ;;  %v419_v2 = vld [vmem:[%s3191_s9 + $0x490] sm:$0xff] }
 0x121   : > { %2455 = vst [vmem:[%s3230_s22 + $0x430] sm:$0xff] %v2199_v12  ;;  %v1690_v23 = vmin.f32 %v1434_v15, 1.0  ;;  %v1946_v24 = vmul.f32 %v922_v14, %v922_v14  ;;  %v924_v25 = vsub.f32 %v412_v9, %v668_v10  ;;  %v1436_v26 = vmax.f32 %v1180_v11, 0.0  ;;  %v1186_v61 = vld [vmem:[%s3208_s7 + $0x488] sm:$0xff]  ;;  %v675_v3 = vld [vmem:[%s3199_s17 + $0x490] sm:$0xff]  ;;  %v420_v9 = vld [vmem:[%s3191_s9 + $0x498] sm:$0xff] }
 0x122   : > { %2456 = vst [vmem:[%s3230_s22 + $0x438] sm:$0xff] %v2200_v18  ;;  %v2201_v30 = vmul.f32 %v1945_v13, %v1689_v19  ;;  %v1691_v31 = vmin.f32 %v1435_v21, 1.0  ;;  %v1947_v32 = vmul.f32 %v923_v20, %v923_v20  ;;  %v925_v33 = vsub.f32 %v413_v16, %v669_v17  ;;  %v1187_v4 = vld [vmem:[%s3208_s7 + $0x490] sm:$0xff]  ;;  %v676_v10 = vld [vmem:[%s3199_s17 + $0x498] sm:$0xff]  ;;  %v421_v16 = vld [vmem:[%s3191_s9 + $0x4a0] sm:$0xff] }
 0x123   : > { %v2202_v37 = vmul.f32 %v1946_v24, %v1690_v23  ;;  %v1692_v38 = vmin.f32 %v1436_v26, 1.0  ;;  %v1948_v39 = vmul.f32 %v924_v25, %v924_v25  ;;  %v1437_v40 = vmax.f32 %v1181_v22, 0.0  ;;  %v1188_v11 = vld [vmem:[%s3208_s7 + $0x498] sm:$0xff]  ;;  %v677_v17 = vld [vmem:[%s3199_s17 + $0x4a0] sm:$0xff] }
 0x124   : > { %2457 = vst [vmem:[%s3230_s22 + $0x440] sm:$0xff] %v2201_v30  ;;  %v2203_v44 = vmul.f32 %v1947_v32, %v1691_v31  ;;  %v1949_v45 = vmul.f32 %v925_v33, %v925_v33  ;;  %v926_v46 = vsub.f32 %v414_v27, %v670_v28  ;;  %v1438_v47 = vmax.f32 %v1182_v29, 0.0  ;;  %v1189_v22 = vld [vmem:[%s3208_s7 + $0x4a0] sm:$0xff]  ;;  %v422_v27 = vld [vmem:[%s3191_s9 + $0x4a8] sm:$0xff] }
 0x125   : > { %2458 = vst [vmem:[%s3230_s22 + $0x448] sm:$0xff] %v2202_v37  ;;  %v2204_v50 = vmul.f32 %v1948_v39, %v1692_v38  ;;  %v1693_v51 = vmin.f32 %v1437_v40, 1.0  ;;  %v927_v52 = vsub.f32 %v415_v34, %v671_v35  ;;  %v1439_v53 = vmax.f32 %v1183_v36, 0.0  ;;  %v678_v28 = vld [vmem:[%s3199_s17 + $0x4a8] sm:$0xff]  ;;  %v423_v34 = vld [vmem:[%s3191_s9 + $0x4b0] sm:$0xff] }
 0x126   : > { %2459 = vst [vmem:[%s3230_s22 + $0x450] sm:$0xff] %v2203_v44  ;;  %v1694_v55 = vmin.f32 %v1438_v47, 1.0  ;;  %v1950_v56 = vmul.f32 %v926_v46, %v926_v46  ;;  %v928_v57 = vsub.f32 %v416_v41, %v672_v42  ;;  %v1440_v58 = vmax.f32 %v1184_v43, 0.0  ;;  %v1190_v29 = vld [vmem:[%s3208_s7 + $0x4a8] sm:$0xff]  ;;  %v679_v35 = vld [vmem:[%s3199_s17 + $0x4b0] sm:$0xff]  ;;  %v424_v41 = vld [vmem:[%s3191_s9 + $0x4b8] sm:$0xff] }
 0x127   : > { %2460 = vst [vmem:[%s3230_s22 + $0x458] sm:$0xff] %v2204_v50  ;;  %v2205_v62 = vmul.f32 %v1949_v45, %v1693_v51  ;;  %v1695_v63 = vmin.f32 %v1439_v53, 1.0  ;;  %v1951_v0 = vmul.f32 %v927_v52, %v927_v52  ;;  %v929_v1 = vsub.f32 %v417_v48, %v673_v49  ;;  %v1191_v36 = vld [vmem:[%s3208_s7 + $0x4b0] sm:$0xff]  ;;  %v680_v42 = vld [vmem:[%s3199_s17 + $0x4b8] sm:$0xff]  ;;  %v425_v48 = vld [vmem:[%s3191_s9 + $0x4c0] sm:$0xff] }
 0x128   : > { %v2206_v5 = vmul.f32 %v1950_v56, %v1694_v55  ;;  %v1696_v6 = vmin.f32 %v1440_v58, 1.0  ;;  %v1952_v7 = vmul.f32 %v928_v57, %v928_v57  ;;  %v1441_v8 = vmax.f32 %v1185_v54, 0.0  ;;  %v1192_v43 = vld [vmem:[%s3208_s7 + $0x4b8] sm:$0xff]  ;;  %v681_v49 = vld [vmem:[%s3199_s17 + $0x4c0] sm:$0xff] }
 0x129   : > { %2461 = vst [vmem:[%s3230_s22 + $0x460] sm:$0xff] %v2205_v62  ;;  %v2207_v12 = vmul.f32 %v1951_v0, %v1695_v63  ;;  %v1953_v13 = vmul.f32 %v929_v1, %v929_v1  ;;  %v930_v14 = vsub.f32 %v418_v59, %v674_v60  ;;  %v1442_v15 = vmax.f32 %v1186_v61, 0.0  ;;  %v1193_v54 = vld [vmem:[%s3208_s7 + $0x4c0] sm:$0xff]  ;;  %v426_v59 = vld [vmem:[%s3191_s9 + $0x4c8] sm:$0xff] }
 0x12a   : > { %2462 = vst [vmem:[%s3230_s22 + $0x468] sm:$0xff] %v2206_v5  ;;  %v2208_v18 = vmul.f32 %v1952_v7, %v1696_v6  ;;  %v1697_v19 = vmin.f32 %v1441_v8, 1.0  ;;  %v931_v20 = vsub.f32 %v419_v2, %v675_v3  ;;  %v1443_v21 = vmax.f32 %v1187_v4, 0.0  ;;  %v682_v60 = vld [vmem:[%s3199_s17 + $0x4c8] sm:$0xff]  ;;  %v427_v2 = vld [vmem:[%s3191_s9 + $0x4d0] sm:$0xff] }
 0x12b   : > { %2463 = vst [vmem:[%s3230_s22 + $0x470] sm:$0xff] %v2207_v12  ;;  %v1698_v23 = vmin.f32 %v1442_v15, 1.0  ;;  %v1954_v24 = vmul.f32 %v930_v14, %v930_v14  ;;  %v932_v25 = vsub.f32 %v420_v9, %v676_v10  ;;  %v1444_v26 = vmax.f32 %v1188_v11, 0.0  ;;  %v1194_v61 = vld [vmem:[%s3208_s7 + $0x4c8] sm:$0xff]  ;;  %v683_v3 = vld [vmem:[%s3199_s17 + $0x4d0] sm:$0xff]  ;;  %v428_v9 = vld [vmem:[%s3191_s9 + $0x4d8] sm:$0xff] }
 0x12c   : > { %2464 = vst [vmem:[%s3230_s22 + $0x478] sm:$0xff] %v2208_v18  ;;  %v2209_v30 = vmul.f32 %v1953_v13, %v1697_v19  ;;  %v1699_v31 = vmin.f32 %v1443_v21, 1.0  ;;  %v1955_v32 = vmul.f32 %v931_v20, %v931_v20  ;;  %v933_v33 = vsub.f32 %v421_v16, %v677_v17  ;;  %v1195_v4 = vld [vmem:[%s3208_s7 + $0x4d0] sm:$0xff]  ;;  %v684_v10 = vld [vmem:[%s3199_s17 + $0x4d8] sm:$0xff]  ;;  %v429_v16 = vld [vmem:[%s3191_s9 + $0x4e0] sm:$0xff] }
 0x12d   : > { %v2210_v37 = vmul.f32 %v1954_v24, %v1698_v23  ;;  %v1700_v38 = vmin.f32 %v1444_v26, 1.0  ;;  %v1956_v39 = vmul.f32 %v932_v25, %v932_v25  ;;  %v1445_v40 = vmax.f32 %v1189_v22, 0.0  ;;  %v1196_v11 = vld [vmem:[%s3208_s7 + $0x4d8] sm:$0xff]  ;;  %v685_v17 = vld [vmem:[%s3199_s17 + $0x4e0] sm:$0xff] }
 0x12e   : > { %2465 = vst [vmem:[%s3230_s22 + $0x480] sm:$0xff] %v2209_v30  ;;  %v2211_v44 = vmul.f32 %v1955_v32, %v1699_v31  ;;  %v1957_v45 = vmul.f32 %v933_v33, %v933_v33  ;;  %v934_v46 = vsub.f32 %v422_v27, %v678_v28  ;;  %v1446_v47 = vmax.f32 %v1190_v29, 0.0  ;;  %v1197_v22 = vld [vmem:[%s3208_s7 + $0x4e0] sm:$0xff]  ;;  %v430_v27 = vld [vmem:[%s3191_s9 + $0x4e8] sm:$0xff] }
 0x12f   : > { %2466 = vst [vmem:[%s3230_s22 + $0x488] sm:$0xff] %v2210_v37  ;;  %v2212_v50 = vmul.f32 %v1956_v39, %v1700_v38  ;;  %v1701_v51 = vmin.f32 %v1445_v40, 1.0  ;;  %v935_v52 = vsub.f32 %v423_v34, %v679_v35  ;;  %v1447_v53 = vmax.f32 %v1191_v36, 0.0  ;;  %v686_v28 = vld [vmem:[%s3199_s17 + $0x4e8] sm:$0xff]  ;;  %v431_v34 = vld [vmem:[%s3191_s9 + $0x4f0] sm:$0xff] }
 0x130   : > { %2467 = vst [vmem:[%s3230_s22 + $0x490] sm:$0xff] %v2211_v44  ;;  %v1702_v55 = vmin.f32 %v1446_v47, 1.0  ;;  %v1958_v56 = vmul.f32 %v934_v46, %v934_v46  ;;  %v936_v57 = vsub.f32 %v424_v41, %v680_v42  ;;  %v1448_v58 = vmax.f32 %v1192_v43, 0.0  ;;  %v1198_v29 = vld [vmem:[%s3208_s7 + $0x4e8] sm:$0xff]  ;;  %v687_v35 = vld [vmem:[%s3199_s17 + $0x4f0] sm:$0xff]  ;;  %v432_v41 = vld [vmem:[%s3191_s9 + $0x4f8] sm:$0xff] }
 0x131   : > { %2468 = vst [vmem:[%s3230_s22 + $0x498] sm:$0xff] %v2212_v50  ;;  %v2213_v62 = vmul.f32 %v1957_v45, %v1701_v51  ;;  %v1703_v63 = vmin.f32 %v1447_v53, 1.0  ;;  %v1959_v0 = vmul.f32 %v935_v52, %v935_v52  ;;  %v937_v1 = vsub.f32 %v425_v48, %v681_v49  ;;  %v1199_v36 = vld [vmem:[%s3208_s7 + $0x4f0] sm:$0xff]  ;;  %v688_v42 = vld [vmem:[%s3199_s17 + $0x4f8] sm:$0xff]  ;;  %v433_v48 = vld [vmem:[%s3191_s9 + $0x500] sm:$0xff] }
 0x132   : > { %v2214_v5 = vmul.f32 %v1958_v56, %v1702_v55  ;;  %v1704_v6 = vmin.f32 %v1448_v58, 1.0  ;;  %v1960_v7 = vmul.f32 %v936_v57, %v936_v57  ;;  %v1449_v8 = vmax.f32 %v1193_v54, 0.0  ;;  %v1200_v43 = vld [vmem:[%s3208_s7 + $0x4f8] sm:$0xff]  ;;  %v689_v49 = vld [vmem:[%s3199_s17 + $0x500] sm:$0xff] }
 0x133   : > { %2469 = vst [vmem:[%s3230_s22 + $0x4a0] sm:$0xff] %v2213_v62  ;;  %v2215_v12 = vmul.f32 %v1959_v0, %v1703_v63  ;;  %v1961_v13 = vmul.f32 %v937_v1, %v937_v1  ;;  %v938_v14 = vsub.f32 %v426_v59, %v682_v60  ;;  %v1450_v15 = vmax.f32 %v1194_v61, 0.0  ;;  %v1201_v54 = vld [vmem:[%s3208_s7 + $0x500] sm:$0xff]  ;;  %v434_v59 = vld [vmem:[%s3191_s9 + $0x508] sm:$0xff] }
 0x134   : > { %2470 = vst [vmem:[%s3230_s22 + $0x4a8] sm:$0xff] %v2214_v5  ;;  %v2216_v18 = vmul.f32 %v1960_v7, %v1704_v6  ;;  %v1705_v19 = vmin.f32 %v1449_v8, 1.0  ;;  %v939_v20 = vsub.f32 %v427_v2, %v683_v3  ;;  %v1451_v21 = vmax.f32 %v1195_v4, 0.0  ;;  %v690_v60 = vld [vmem:[%s3199_s17 + $0x508] sm:$0xff]  ;;  %v435_v2 = vld [vmem:[%s3191_s9 + $0x510] sm:$0xff] }
 0x135   : > { %2471 = vst [vmem:[%s3230_s22 + $0x4b0] sm:$0xff] %v2215_v12  ;;  %v1706_v23 = vmin.f32 %v1450_v15, 1.0  ;;  %v1962_v24 = vmul.f32 %v938_v14, %v938_v14  ;;  %v940_v25 = vsub.f32 %v428_v9, %v684_v10  ;;  %v1452_v26 = vmax.f32 %v1196_v11, 0.0  ;;  %v1202_v61 = vld [vmem:[%s3208_s7 + $0x508] sm:$0xff]  ;;  %v691_v3 = vld [vmem:[%s3199_s17 + $0x510] sm:$0xff]  ;;  %v436_v9 = vld [vmem:[%s3191_s9 + $0x518] sm:$0xff] }
 0x136   : > { %2472 = vst [vmem:[%s3230_s22 + $0x4b8] sm:$0xff] %v2216_v18  ;;  %v2217_v30 = vmul.f32 %v1961_v13, %v1705_v19  ;;  %v1707_v31 = vmin.f32 %v1451_v21, 1.0  ;;  %v1963_v32 = vmul.f32 %v939_v20, %v939_v20  ;;  %v941_v33 = vsub.f32 %v429_v16, %v685_v17  ;;  %v1203_v4 = vld [vmem:[%s3208_s7 + $0x510] sm:$0xff]  ;;  %v692_v10 = vld [vmem:[%s3199_s17 + $0x518] sm:$0xff]  ;;  %v437_v16 = vld [vmem:[%s3191_s9 + $0x520] sm:$0xff] }
 0x137   : > { %v2218_v37 = vmul.f32 %v1962_v24, %v1706_v23  ;;  %v1708_v38 = vmin.f32 %v1452_v26, 1.0  ;;  %v1964_v39 = vmul.f32 %v940_v25, %v940_v25  ;;  %v1453_v40 = vmax.f32 %v1197_v22, 0.0  ;;  %v1204_v11 = vld [vmem:[%s3208_s7 + $0x518] sm:$0xff]  ;;  %v693_v17 = vld [vmem:[%s3199_s17 + $0x520] sm:$0xff] }
 0x138   : > { %2473 = vst [vmem:[%s3230_s22 + $0x4c0] sm:$0xff] %v2217_v30  ;;  %v2219_v44 = vmul.f32 %v1963_v32, %v1707_v31  ;;  %v1965_v45 = vmul.f32 %v941_v33, %v941_v33  ;;  %v942_v46 = vsub.f32 %v430_v27, %v686_v28  ;;  %v1454_v47 = vmax.f32 %v1198_v29, 0.0  ;;  %v1205_v22 = vld [vmem:[%s3208_s7 + $0x520] sm:$0xff]  ;;  %v438_v27 = vld [vmem:[%s3191_s9 + $0x528] sm:$0xff] }
 0x139   : > { %2474 = vst [vmem:[%s3230_s22 + $0x4c8] sm:$0xff] %v2218_v37  ;;  %v2220_v50 = vmul.f32 %v1964_v39, %v1708_v38  ;;  %v1709_v51 = vmin.f32 %v1453_v40, 1.0  ;;  %v943_v52 = vsub.f32 %v431_v34, %v687_v35  ;;  %v1455_v53 = vmax.f32 %v1199_v36, 0.0  ;;  %v694_v28 = vld [vmem:[%s3199_s17 + $0x528] sm:$0xff]  ;;  %v439_v34 = vld [vmem:[%s3191_s9 + $0x530] sm:$0xff] }
 0x13a   : > { %2475 = vst [vmem:[%s3230_s22 + $0x4d0] sm:$0xff] %v2219_v44  ;;  %v1710_v55 = vmin.f32 %v1454_v47, 1.0  ;;  %v1966_v56 = vmul.f32 %v942_v46, %v942_v46  ;;  %v944_v57 = vsub.f32 %v432_v41, %v688_v42  ;;  %v1456_v58 = vmax.f32 %v1200_v43, 0.0  ;;  %v1206_v29 = vld [vmem:[%s3208_s7 + $0x528] sm:$0xff]  ;;  %v695_v35 = vld [vmem:[%s3199_s17 + $0x530] sm:$0xff]  ;;  %v440_v41 = vld [vmem:[%s3191_s9 + $0x538] sm:$0xff] }
 0x13b   : > { %2476 = vst [vmem:[%s3230_s22 + $0x4d8] sm:$0xff] %v2220_v50  ;;  %v2221_v62 = vmul.f32 %v1965_v45, %v1709_v51  ;;  %v1711_v63 = vmin.f32 %v1455_v53, 1.0  ;;  %v1967_v0 = vmul.f32 %v943_v52, %v943_v52  ;;  %v945_v1 = vsub.f32 %v433_v48, %v689_v49  ;;  %v1207_v36 = vld [vmem:[%s3208_s7 + $0x530] sm:$0xff]  ;;  %v696_v42 = vld [vmem:[%s3199_s17 + $0x538] sm:$0xff]  ;;  %v441_v48 = vld [vmem:[%s3191_s9 + $0x540] sm:$0xff] }
 0x13c   : > { %v2222_v5 = vmul.f32 %v1966_v56, %v1710_v55  ;;  %v1712_v6 = vmin.f32 %v1456_v58, 1.0  ;;  %v1968_v7 = vmul.f32 %v944_v57, %v944_v57  ;;  %v1457_v8 = vmax.f32 %v1201_v54, 0.0  ;;  %v1208_v43 = vld [vmem:[%s3208_s7 + $0x538] sm:$0xff]  ;;  %v697_v49 = vld [vmem:[%s3199_s17 + $0x540] sm:$0xff] }
 0x13d   : > { %2477 = vst [vmem:[%s3230_s22 + $0x4e0] sm:$0xff] %v2221_v62  ;;  %v2223_v12 = vmul.f32 %v1967_v0, %v1711_v63  ;;  %v1969_v13 = vmul.f32 %v945_v1, %v945_v1  ;;  %v946_v14 = vsub.f32 %v434_v59, %v690_v60  ;;  %v1458_v15 = vmax.f32 %v1202_v61, 0.0  ;;  %v1209_v54 = vld [vmem:[%s3208_s7 + $0x540] sm:$0xff]  ;;  %v442_v59 = vld [vmem:[%s3191_s9 + $0x548] sm:$0xff] }
 0x13e   : > { %2478 = vst [vmem:[%s3230_s22 + $0x4e8] sm:$0xff] %v2222_v5  ;;  %v2224_v18 = vmul.f32 %v1968_v7, %v1712_v6  ;;  %v1713_v19 = vmin.f32 %v1457_v8, 1.0  ;;  %v947_v20 = vsub.f32 %v435_v2, %v691_v3  ;;  %v1459_v21 = vmax.f32 %v1203_v4, 0.0  ;;  %v698_v60 = vld [vmem:[%s3199_s17 + $0x548] sm:$0xff]  ;;  %v443_v2 = vld [vmem:[%s3191_s9 + $0x550] sm:$0xff] }
 0x13f   : > { %2479 = vst [vmem:[%s3230_s22 + $0x4f0] sm:$0xff] %v2223_v12  ;;  %v1714_v23 = vmin.f32 %v1458_v15, 1.0  ;;  %v1970_v24 = vmul.f32 %v946_v14, %v946_v14  ;;  %v948_v25 = vsub.f32 %v436_v9, %v692_v10  ;;  %v1460_v26 = vmax.f32 %v1204_v11, 0.0  ;;  %v1210_v61 = vld [vmem:[%s3208_s7 + $0x548] sm:$0xff]  ;;  %v699_v3 = vld [vmem:[%s3199_s17 + $0x550] sm:$0xff]  ;;  %v444_v9 = vld [vmem:[%s3191_s9 + $0x558] sm:$0xff] }
 0x140   : > { %2480 = vst [vmem:[%s3230_s22 + $0x4f8] sm:$0xff] %v2224_v18  ;;  %v2225_v30 = vmul.f32 %v1969_v13, %v1713_v19  ;;  %v1715_v31 = vmin.f32 %v1459_v21, 1.0  ;;  %v1971_v32 = vmul.f32 %v947_v20, %v947_v20  ;;  %v949_v33 = vsub.f32 %v437_v16, %v693_v17  ;;  %v1211_v4 = vld [vmem:[%s3208_s7 + $0x550] sm:$0xff]  ;;  %v700_v10 = vld [vmem:[%s3199_s17 + $0x558] sm:$0xff]  ;;  %v445_v16 = vld [vmem:[%s3191_s9 + $0x560] sm:$0xff] }
 0x141   : > { %v2226_v37 = vmul.f32 %v1970_v24, %v1714_v23  ;;  %v1716_v38 = vmin.f32 %v1460_v26, 1.0  ;;  %v1972_v39 = vmul.f32 %v948_v25, %v948_v25  ;;  %v1461_v40 = vmax.f32 %v1205_v22, 0.0  ;;  %v1212_v11 = vld [vmem:[%s3208_s7 + $0x558] sm:$0xff]  ;;  %v701_v17 = vld [vmem:[%s3199_s17 + $0x560] sm:$0xff] }
 0x142   : > { %2481 = vst [vmem:[%s3230_s22 + $0x500] sm:$0xff] %v2225_v30  ;;  %v2227_v44 = vmul.f32 %v1971_v32, %v1715_v31  ;;  %v1973_v45 = vmul.f32 %v949_v33, %v949_v33  ;;  %v950_v46 = vsub.f32 %v438_v27, %v694_v28  ;;  %v1462_v47 = vmax.f32 %v1206_v29, 0.0  ;;  %v1213_v22 = vld [vmem:[%s3208_s7 + $0x560] sm:$0xff]  ;;  %v446_v27 = vld [vmem:[%s3191_s9 + $0x568] sm:$0xff] }
 0x143   : > { %2482 = vst [vmem:[%s3230_s22 + $0x508] sm:$0xff] %v2226_v37  ;;  %v2228_v50 = vmul.f32 %v1972_v39, %v1716_v38  ;;  %v1717_v51 = vmin.f32 %v1461_v40, 1.0  ;;  %v951_v52 = vsub.f32 %v439_v34, %v695_v35  ;;  %v1463_v53 = vmax.f32 %v1207_v36, 0.0  ;;  %v702_v28 = vld [vmem:[%s3199_s17 + $0x568] sm:$0xff]  ;;  %v447_v34 = vld [vmem:[%s3191_s9 + $0x570] sm:$0xff] }
 0x144   : > { %2483 = vst [vmem:[%s3230_s22 + $0x510] sm:$0xff] %v2227_v44  ;;  %v1718_v55 = vmin.f32 %v1462_v47, 1.0  ;;  %v1974_v56 = vmul.f32 %v950_v46, %v950_v46  ;;  %v952_v57 = vsub.f32 %v440_v41, %v696_v42  ;;  %v1464_v58 = vmax.f32 %v1208_v43, 0.0  ;;  %v1214_v29 = vld [vmem:[%s3208_s7 + $0x568] sm:$0xff]  ;;  %v703_v35 = vld [vmem:[%s3199_s17 + $0x570] sm:$0xff]  ;;  %v448_v41 = vld [vmem:[%s3191_s9 + $0x578] sm:$0xff] }
 0x145   : > { %2484 = vst [vmem:[%s3230_s22 + $0x518] sm:$0xff] %v2228_v50  ;;  %v2229_v62 = vmul.f32 %v1973_v45, %v1717_v51  ;;  %v1719_v63 = vmin.f32 %v1463_v53, 1.0  ;;  %v1975_v0 = vmul.f32 %v951_v52, %v951_v52  ;;  %v953_v1 = vsub.f32 %v441_v48, %v697_v49  ;;  %v1215_v36 = vld [vmem:[%s3208_s7 + $0x570] sm:$0xff]  ;;  %v704_v42 = vld [vmem:[%s3199_s17 + $0x578] sm:$0xff]  ;;  %v449_v48 = vld [vmem:[%s3191_s9 + $0x580] sm:$0xff] }
 0x146   : > { %v2230_v5 = vmul.f32 %v1974_v56, %v1718_v55  ;;  %v1720_v6 = vmin.f32 %v1464_v58, 1.0  ;;  %v1976_v7 = vmul.f32 %v952_v57, %v952_v57  ;;  %v1465_v8 = vmax.f32 %v1209_v54, 0.0  ;;  %v1216_v43 = vld [vmem:[%s3208_s7 + $0x578] sm:$0xff]  ;;  %v705_v49 = vld [vmem:[%s3199_s17 + $0x580] sm:$0xff] }
 0x147   : > { %2485 = vst [vmem:[%s3230_s22 + $0x520] sm:$0xff] %v2229_v62  ;;  %v2231_v12 = vmul.f32 %v1975_v0, %v1719_v63  ;;  %v1977_v13 = vmul.f32 %v953_v1, %v953_v1  ;;  %v954_v14 = vsub.f32 %v442_v59, %v698_v60  ;;  %v1466_v15 = vmax.f32 %v1210_v61, 0.0  ;;  %v1217_v54 = vld [vmem:[%s3208_s7 + $0x580] sm:$0xff]  ;;  %v450_v59 = vld [vmem:[%s3191_s9 + $0x588] sm:$0xff] }
 0x148   : > { %2486 = vst [vmem:[%s3230_s22 + $0x528] sm:$0xff] %v2230_v5  ;;  %v2232_v18 = vmul.f32 %v1976_v7, %v1720_v6  ;;  %v1721_v19 = vmin.f32 %v1465_v8, 1.0  ;;  %v955_v20 = vsub.f32 %v443_v2, %v699_v3  ;;  %v1467_v21 = vmax.f32 %v1211_v4, 0.0  ;;  %v706_v60 = vld [vmem:[%s3199_s17 + $0x588] sm:$0xff]  ;;  %v451_v2 = vld [vmem:[%s3191_s9 + $0x590] sm:$0xff] }
 0x149   : > { %2487 = vst [vmem:[%s3230_s22 + $0x530] sm:$0xff] %v2231_v12  ;;  %v1722_v23 = vmin.f32 %v1466_v15, 1.0  ;;  %v1978_v24 = vmul.f32 %v954_v14, %v954_v14  ;;  %v956_v25 = vsub.f32 %v444_v9, %v700_v10  ;;  %v1468_v26 = vmax.f32 %v1212_v11, 0.0  ;;  %v1218_v61 = vld [vmem:[%s3208_s7 + $0x588] sm:$0xff]  ;;  %v707_v3 = vld [vmem:[%s3199_s17 + $0x590] sm:$0xff]  ;;  %v452_v9 = vld [vmem:[%s3191_s9 + $0x598] sm:$0xff] }
 0x14a   : > { %2488 = vst [vmem:[%s3230_s22 + $0x538] sm:$0xff] %v2232_v18  ;;  %v2233_v30 = vmul.f32 %v1977_v13, %v1721_v19  ;;  %v1723_v31 = vmin.f32 %v1467_v21, 1.0  ;;  %v1979_v32 = vmul.f32 %v955_v20, %v955_v20  ;;  %v957_v33 = vsub.f32 %v445_v16, %v701_v17  ;;  %v1219_v4 = vld [vmem:[%s3208_s7 + $0x590] sm:$0xff]  ;;  %v708_v10 = vld [vmem:[%s3199_s17 + $0x598] sm:$0xff]  ;;  %v453_v16 = vld [vmem:[%s3191_s9 + $0x5a0] sm:$0xff] }
 0x14b   : > { %v2234_v37 = vmul.f32 %v1978_v24, %v1722_v23  ;;  %v1724_v38 = vmin.f32 %v1468_v26, 1.0  ;;  %v1980_v39 = vmul.f32 %v956_v25, %v956_v25  ;;  %v1469_v40 = vmax.f32 %v1213_v22, 0.0  ;;  %v1220_v11 = vld [vmem:[%s3208_s7 + $0x598] sm:$0xff]  ;;  %v709_v17 = vld [vmem:[%s3199_s17 + $0x5a0] sm:$0xff] }
 0x14c   : > { %2489 = vst [vmem:[%s3230_s22 + $0x540] sm:$0xff] %v2233_v30  ;;  %v2235_v44 = vmul.f32 %v1979_v32, %v1723_v31  ;;  %v1981_v45 = vmul.f32 %v957_v33, %v957_v33  ;;  %v958_v46 = vsub.f32 %v446_v27, %v702_v28  ;;  %v1470_v47 = vmax.f32 %v1214_v29, 0.0  ;;  %v1221_v22 = vld [vmem:[%s3208_s7 + $0x5a0] sm:$0xff]  ;;  %v454_v27 = vld [vmem:[%s3191_s9 + $0x5a8] sm:$0xff] }
 0x14d   : > { %2490 = vst [vmem:[%s3230_s22 + $0x548] sm:$0xff] %v2234_v37  ;;  %v2236_v50 = vmul.f32 %v1980_v39, %v1724_v38  ;;  %v1725_v51 = vmin.f32 %v1469_v40, 1.0  ;;  %v959_v52 = vsub.f32 %v447_v34, %v703_v35  ;;  %v1471_v53 = vmax.f32 %v1215_v36, 0.0  ;;  %v710_v28 = vld [vmem:[%s3199_s17 + $0x5a8] sm:$0xff]  ;;  %v455_v34 = vld [vmem:[%s3191_s9 + $0x5b0] sm:$0xff] }
 0x14e   : > { %2491 = vst [vmem:[%s3230_s22 + $0x550] sm:$0xff] %v2235_v44  ;;  %v1726_v55 = vmin.f32 %v1470_v47, 1.0  ;;  %v1982_v56 = vmul.f32 %v958_v46, %v958_v46  ;;  %v960_v57 = vsub.f32 %v448_v41, %v704_v42  ;;  %v1472_v58 = vmax.f32 %v1216_v43, 0.0  ;;  %v1222_v29 = vld [vmem:[%s3208_s7 + $0x5a8] sm:$0xff]  ;;  %v711_v35 = vld [vmem:[%s3199_s17 + $0x5b0] sm:$0xff]  ;;  %v456_v41 = vld [vmem:[%s3191_s9 + $0x5b8] sm:$0xff] }
 0x14f   : > { %2492 = vst [vmem:[%s3230_s22 + $0x558] sm:$0xff] %v2236_v50  ;;  %v2237_v62 = vmul.f32 %v1981_v45, %v1725_v51  ;;  %v1727_v63 = vmin.f32 %v1471_v53, 1.0  ;;  %v1983_v0 = vmul.f32 %v959_v52, %v959_v52  ;;  %v961_v1 = vsub.f32 %v449_v48, %v705_v49  ;;  %v1223_v36 = vld [vmem:[%s3208_s7 + $0x5b0] sm:$0xff]  ;;  %v712_v42 = vld [vmem:[%s3199_s17 + $0x5b8] sm:$0xff]  ;;  %v457_v48 = vld [vmem:[%s3191_s9 + $0x5c0] sm:$0xff] }
 0x150   : > { %v2238_v5 = vmul.f32 %v1982_v56, %v1726_v55  ;;  %v1728_v6 = vmin.f32 %v1472_v58, 1.0  ;;  %v1984_v7 = vmul.f32 %v960_v57, %v960_v57  ;;  %v1473_v8 = vmax.f32 %v1217_v54, 0.0  ;;  %v1224_v43 = vld [vmem:[%s3208_s7 + $0x5b8] sm:$0xff]  ;;  %v713_v49 = vld [vmem:[%s3199_s17 + $0x5c0] sm:$0xff] }
 0x151   : > { %2493 = vst [vmem:[%s3230_s22 + $0x560] sm:$0xff] %v2237_v62  ;;  %v2239_v12 = vmul.f32 %v1983_v0, %v1727_v63  ;;  %v1985_v13 = vmul.f32 %v961_v1, %v961_v1  ;;  %v962_v14 = vsub.f32 %v450_v59, %v706_v60  ;;  %v1474_v15 = vmax.f32 %v1218_v61, 0.0  ;;  %v1225_v54 = vld [vmem:[%s3208_s7 + $0x5c0] sm:$0xff]  ;;  %v458_v59 = vld [vmem:[%s3191_s9 + $0x5c8] sm:$0xff] }
 0x152   : > { %2494 = vst [vmem:[%s3230_s22 + $0x568] sm:$0xff] %v2238_v5  ;;  %v2240_v18 = vmul.f32 %v1984_v7, %v1728_v6  ;;  %v1729_v19 = vmin.f32 %v1473_v8, 1.0  ;;  %v963_v20 = vsub.f32 %v451_v2, %v707_v3  ;;  %v1475_v21 = vmax.f32 %v1219_v4, 0.0  ;;  %v714_v60 = vld [vmem:[%s3199_s17 + $0x5c8] sm:$0xff]  ;;  %v459_v2 = vld [vmem:[%s3191_s9 + $0x5d0] sm:$0xff] }
 0x153   : > { %2495 = vst [vmem:[%s3230_s22 + $0x570] sm:$0xff] %v2239_v12  ;;  %v1730_v23 = vmin.f32 %v1474_v15, 1.0  ;;  %v1986_v24 = vmul.f32 %v962_v14, %v962_v14  ;;  %v964_v25 = vsub.f32 %v452_v9, %v708_v10  ;;  %v1476_v26 = vmax.f32 %v1220_v11, 0.0  ;;  %v1226_v61 = vld [vmem:[%s3208_s7 + $0x5c8] sm:$0xff]  ;;  %v715_v3 = vld [vmem:[%s3199_s17 + $0x5d0] sm:$0xff]  ;;  %v460_v9 = vld [vmem:[%s3191_s9 + $0x5d8] sm:$0xff] }
 0x154   : > { %2496 = vst [vmem:[%s3230_s22 + $0x578] sm:$0xff] %v2240_v18  ;;  %v2241_v30 = vmul.f32 %v1985_v13, %v1729_v19  ;;  %v1731_v31 = vmin.f32 %v1475_v21, 1.0  ;;  %v1987_v32 = vmul.f32 %v963_v20, %v963_v20  ;;  %v965_v33 = vsub.f32 %v453_v16, %v709_v17  ;;  %v1227_v4 = vld [vmem:[%s3208_s7 + $0x5d0] sm:$0xff]  ;;  %v716_v10 = vld [vmem:[%s3199_s17 + $0x5d8] sm:$0xff]  ;;  %v461_v16 = vld [vmem:[%s3191_s9 + $0x5e0] sm:$0xff] }
 0x155   : > { %v2242_v37 = vmul.f32 %v1986_v24, %v1730_v23  ;;  %v1732_v38 = vmin.f32 %v1476_v26, 1.0  ;;  %v1988_v39 = vmul.f32 %v964_v25, %v964_v25  ;;  %v1477_v40 = vmax.f32 %v1221_v22, 0.0  ;;  %v1228_v11 = vld [vmem:[%s3208_s7 + $0x5d8] sm:$0xff]  ;;  %v717_v17 = vld [vmem:[%s3199_s17 + $0x5e0] sm:$0xff] }
 0x156   : > { %2497 = vst [vmem:[%s3230_s22 + $0x580] sm:$0xff] %v2241_v30  ;;  %v2243_v44 = vmul.f32 %v1987_v32, %v1731_v31  ;;  %v1989_v45 = vmul.f32 %v965_v33, %v965_v33  ;;  %v966_v46 = vsub.f32 %v454_v27, %v710_v28  ;;  %v1478_v47 = vmax.f32 %v1222_v29, 0.0  ;;  %v1229_v22 = vld [vmem:[%s3208_s7 + $0x5e0] sm:$0xff]  ;;  %v462_v27 = vld [vmem:[%s3191_s9 + $0x5e8] sm:$0xff] }
 0x157   : > { %2498 = vst [vmem:[%s3230_s22 + $0x588] sm:$0xff] %v2242_v37  ;;  %v2244_v50 = vmul.f32 %v1988_v39, %v1732_v38  ;;  %v1733_v51 = vmin.f32 %v1477_v40, 1.0  ;;  %v967_v52 = vsub.f32 %v455_v34, %v711_v35  ;;  %v1479_v53 = vmax.f32 %v1223_v36, 0.0  ;;  %v718_v28 = vld [vmem:[%s3199_s17 + $0x5e8] sm:$0xff]  ;;  %v463_v34 = vld [vmem:[%s3191_s9 + $0x5f0] sm:$0xff] }
 0x158   : > { %2499 = vst [vmem:[%s3230_s22 + $0x590] sm:$0xff] %v2243_v44  ;;  %v1734_v55 = vmin.f32 %v1478_v47, 1.0  ;;  %v1990_v56 = vmul.f32 %v966_v46, %v966_v46  ;;  %v968_v57 = vsub.f32 %v456_v41, %v712_v42  ;;  %v1480_v58 = vmax.f32 %v1224_v43, 0.0  ;;  %v1230_v29 = vld [vmem:[%s3208_s7 + $0x5e8] sm:$0xff]  ;;  %v719_v35 = vld [vmem:[%s3199_s17 + $0x5f0] sm:$0xff]  ;;  %v464_v41 = vld [vmem:[%s3191_s9 + $0x5f8] sm:$0xff] }
 0x159   : > { %2500 = vst [vmem:[%s3230_s22 + $0x598] sm:$0xff] %v2244_v50  ;;  %v2245_v62 = vmul.f32 %v1989_v45, %v1733_v51  ;;  %v1735_v63 = vmin.f32 %v1479_v53, 1.0  ;;  %v1991_v0 = vmul.f32 %v967_v52, %v967_v52  ;;  %v969_v1 = vsub.f32 %v457_v48, %v713_v49  ;;  %v1231_v36 = vld [vmem:[%s3208_s7 + $0x5f0] sm:$0xff]  ;;  %v720_v42 = vld [vmem:[%s3199_s17 + $0x5f8] sm:$0xff]  ;;  %v465_v48 = vld [vmem:[%s3191_s9 + $0x600] sm:$0xff] }
 0x15a   : > { %v2246_v5 = vmul.f32 %v1990_v56, %v1734_v55  ;;  %v1736_v6 = vmin.f32 %v1480_v58, 1.0  ;;  %v1992_v7 = vmul.f32 %v968_v57, %v968_v57  ;;  %v1481_v8 = vmax.f32 %v1225_v54, 0.0  ;;  %v1232_v43 = vld [vmem:[%s3208_s7 + $0x5f8] sm:$0xff]  ;;  %v721_v49 = vld [vmem:[%s3199_s17 + $0x600] sm:$0xff] }
 0x15b   : > { %2501 = vst [vmem:[%s3230_s22 + $0x5a0] sm:$0xff] %v2245_v62  ;;  %v2247_v12 = vmul.f32 %v1991_v0, %v1735_v63  ;;  %v1993_v13 = vmul.f32 %v969_v1, %v969_v1  ;;  %v970_v14 = vsub.f32 %v458_v59, %v714_v60  ;;  %v1482_v15 = vmax.f32 %v1226_v61, 0.0  ;;  %v1233_v54 = vld [vmem:[%s3208_s7 + $0x600] sm:$0xff]  ;;  %v466_v59 = vld [vmem:[%s3191_s9 + $0x608] sm:$0xff] }
 0x15c   : > { %2502 = vst [vmem:[%s3230_s22 + $0x5a8] sm:$0xff] %v2246_v5  ;;  %v2248_v18 = vmul.f32 %v1992_v7, %v1736_v6  ;;  %v1737_v19 = vmin.f32 %v1481_v8, 1.0  ;;  %v971_v20 = vsub.f32 %v459_v2, %v715_v3  ;;  %v1483_v21 = vmax.f32 %v1227_v4, 0.0  ;;  %v722_v60 = vld [vmem:[%s3199_s17 + $0x608] sm:$0xff]  ;;  %v467_v2 = vld [vmem:[%s3191_s9 + $0x610] sm:$0xff] }
 0x15d   : > { %2503 = vst [vmem:[%s3230_s22 + $0x5b0] sm:$0xff] %v2247_v12  ;;  %v1738_v23 = vmin.f32 %v1482_v15, 1.0  ;;  %v1994_v24 = vmul.f32 %v970_v14, %v970_v14  ;;  %v972_v25 = vsub.f32 %v460_v9, %v716_v10  ;;  %v1484_v26 = vmax.f32 %v1228_v11, 0.0  ;;  %v1234_v61 = vld [vmem:[%s3208_s7 + $0x608] sm:$0xff]  ;;  %v723_v3 = vld [vmem:[%s3199_s17 + $0x610] sm:$0xff]  ;;  %v468_v9 = vld [vmem:[%s3191_s9 + $0x618] sm:$0xff] }
 0x15e   : > { %2504 = vst [vmem:[%s3230_s22 + $0x5b8] sm:$0xff] %v2248_v18  ;;  %v2249_v30 = vmul.f32 %v1993_v13, %v1737_v19  ;;  %v1739_v31 = vmin.f32 %v1483_v21, 1.0  ;;  %v1995_v32 = vmul.f32 %v971_v20, %v971_v20  ;;  %v973_v33 = vsub.f32 %v461_v16, %v717_v17  ;;  %v1235_v4 = vld [vmem:[%s3208_s7 + $0x610] sm:$0xff]  ;;  %v724_v10 = vld [vmem:[%s3199_s17 + $0x618] sm:$0xff]  ;;  %v469_v16 = vld [vmem:[%s3191_s9 + $0x620] sm:$0xff] }
 0x15f   : > { %v2250_v37 = vmul.f32 %v1994_v24, %v1738_v23  ;;  %v1740_v38 = vmin.f32 %v1484_v26, 1.0  ;;  %v1996_v39 = vmul.f32 %v972_v25, %v972_v25  ;;  %v1485_v40 = vmax.f32 %v1229_v22, 0.0  ;;  %v1236_v11 = vld [vmem:[%s3208_s7 + $0x618] sm:$0xff]  ;;  %v725_v17 = vld [vmem:[%s3199_s17 + $0x620] sm:$0xff] }
 0x160   : > { %2505 = vst [vmem:[%s3230_s22 + $0x5c0] sm:$0xff] %v2249_v30  ;;  %v2251_v44 = vmul.f32 %v1995_v32, %v1739_v31  ;;  %v1997_v45 = vmul.f32 %v973_v33, %v973_v33  ;;  %v974_v46 = vsub.f32 %v462_v27, %v718_v28  ;;  %v1486_v47 = vmax.f32 %v1230_v29, 0.0  ;;  %v1237_v22 = vld [vmem:[%s3208_s7 + $0x620] sm:$0xff]  ;;  %v470_v27 = vld [vmem:[%s3191_s9 + $0x628] sm:$0xff] }
 0x161   : > { %2506 = vst [vmem:[%s3230_s22 + $0x5c8] sm:$0xff] %v2250_v37  ;;  %v2252_v50 = vmul.f32 %v1996_v39, %v1740_v38  ;;  %v1741_v51 = vmin.f32 %v1485_v40, 1.0  ;;  %v975_v52 = vsub.f32 %v463_v34, %v719_v35  ;;  %v1487_v53 = vmax.f32 %v1231_v36, 0.0  ;;  %v726_v28 = vld [vmem:[%s3199_s17 + $0x628] sm:$0xff]  ;;  %v471_v34 = vld [vmem:[%s3191_s9 + $0x630] sm:$0xff] }
 0x162   : > { %2507 = vst [vmem:[%s3230_s22 + $0x5d0] sm:$0xff] %v2251_v44  ;;  %v1742_v55 = vmin.f32 %v1486_v47, 1.0  ;;  %v1998_v56 = vmul.f32 %v974_v46, %v974_v46  ;;  %v976_v57 = vsub.f32 %v464_v41, %v720_v42  ;;  %v1488_v58 = vmax.f32 %v1232_v43, 0.0  ;;  %v1238_v29 = vld [vmem:[%s3208_s7 + $0x628] sm:$0xff]  ;;  %v727_v35 = vld [vmem:[%s3199_s17 + $0x630] sm:$0xff]  ;;  %v472_v41 = vld [vmem:[%s3191_s9 + $0x638] sm:$0xff] }
 0x163   : > { %2508 = vst [vmem:[%s3230_s22 + $0x5d8] sm:$0xff] %v2252_v50  ;;  %v2253_v62 = vmul.f32 %v1997_v45, %v1741_v51  ;;  %v1743_v63 = vmin.f32 %v1487_v53, 1.0  ;;  %v1999_v0 = vmul.f32 %v975_v52, %v975_v52  ;;  %v977_v1 = vsub.f32 %v465_v48, %v721_v49  ;;  %v1239_v36 = vld [vmem:[%s3208_s7 + $0x630] sm:$0xff]  ;;  %v728_v42 = vld [vmem:[%s3199_s17 + $0x638] sm:$0xff]  ;;  %v473_v48 = vld [vmem:[%s3191_s9 + $0x640] sm:$0xff] }
 0x164   : > { %v2254_v5 = vmul.f32 %v1998_v56, %v1742_v55  ;;  %v1744_v6 = vmin.f32 %v1488_v58, 1.0  ;;  %v2000_v7 = vmul.f32 %v976_v57, %v976_v57  ;;  %v1489_v8 = vmax.f32 %v1233_v54, 0.0  ;;  %v1240_v43 = vld [vmem:[%s3208_s7 + $0x638] sm:$0xff]  ;;  %v729_v49 = vld [vmem:[%s3199_s17 + $0x640] sm:$0xff] }
 0x165   : > { %2509 = vst [vmem:[%s3230_s22 + $0x5e0] sm:$0xff] %v2253_v62  ;;  %v2255_v12 = vmul.f32 %v1999_v0, %v1743_v63  ;;  %v2001_v13 = vmul.f32 %v977_v1, %v977_v1  ;;  %v978_v14 = vsub.f32 %v466_v59, %v722_v60  ;;  %v1490_v15 = vmax.f32 %v1234_v61, 0.0  ;;  %v1241_v54 = vld [vmem:[%s3208_s7 + $0x640] sm:$0xff]  ;;  %v474_v59 = vld [vmem:[%s3191_s9 + $0x648] sm:$0xff] }
 0x166   : > { %2510 = vst [vmem:[%s3230_s22 + $0x5e8] sm:$0xff] %v2254_v5  ;;  %v2256_v18 = vmul.f32 %v2000_v7, %v1744_v6  ;;  %v1745_v19 = vmin.f32 %v1489_v8, 1.0  ;;  %v979_v20 = vsub.f32 %v467_v2, %v723_v3  ;;  %v1491_v21 = vmax.f32 %v1235_v4, 0.0  ;;  %v730_v60 = vld [vmem:[%s3199_s17 + $0x648] sm:$0xff]  ;;  %v475_v2 = vld [vmem:[%s3191_s9 + $0x650] sm:$0xff] }
 0x167   : > { %2511 = vst [vmem:[%s3230_s22 + $0x5f0] sm:$0xff] %v2255_v12  ;;  %v1746_v23 = vmin.f32 %v1490_v15, 1.0  ;;  %v2002_v24 = vmul.f32 %v978_v14, %v978_v14  ;;  %v980_v25 = vsub.f32 %v468_v9, %v724_v10  ;;  %v1492_v26 = vmax.f32 %v1236_v11, 0.0  ;;  %v1242_v61 = vld [vmem:[%s3208_s7 + $0x648] sm:$0xff]  ;;  %v731_v3 = vld [vmem:[%s3199_s17 + $0x650] sm:$0xff]  ;;  %v476_v9 = vld [vmem:[%s3191_s9 + $0x658] sm:$0xff] }
 0x168   : > { %2512 = vst [vmem:[%s3230_s22 + $0x5f8] sm:$0xff] %v2256_v18  ;;  %v2257_v30 = vmul.f32 %v2001_v13, %v1745_v19  ;;  %v1747_v31 = vmin.f32 %v1491_v21, 1.0  ;;  %v2003_v32 = vmul.f32 %v979_v20, %v979_v20  ;;  %v981_v33 = vsub.f32 %v469_v16, %v725_v17  ;;  %v1243_v4 = vld [vmem:[%s3208_s7 + $0x650] sm:$0xff]  ;;  %v732_v10 = vld [vmem:[%s3199_s17 + $0x658] sm:$0xff]  ;;  %v477_v16 = vld [vmem:[%s3191_s9 + $0x660] sm:$0xff] }
 0x169   : > { %v2258_v37 = vmul.f32 %v2002_v24, %v1746_v23  ;;  %v1748_v38 = vmin.f32 %v1492_v26, 1.0  ;;  %v2004_v39 = vmul.f32 %v980_v25, %v980_v25  ;;  %v1493_v40 = vmax.f32 %v1237_v22, 0.0  ;;  %v1244_v11 = vld [vmem:[%s3208_s7 + $0x658] sm:$0xff]  ;;  %v733_v17 = vld [vmem:[%s3199_s17 + $0x660] sm:$0xff] }
 0x16a   : > { %2513 = vst [vmem:[%s3230_s22 + $0x600] sm:$0xff] %v2257_v30  ;;  %v2259_v44 = vmul.f32 %v2003_v32, %v1747_v31  ;;  %v2005_v45 = vmul.f32 %v981_v33, %v981_v33  ;;  %v982_v46 = vsub.f32 %v470_v27, %v726_v28  ;;  %v1494_v47 = vmax.f32 %v1238_v29, 0.0  ;;  %v1245_v22 = vld [vmem:[%s3208_s7 + $0x660] sm:$0xff]  ;;  %v478_v27 = vld [vmem:[%s3191_s9 + $0x668] sm:$0xff] }
 0x16b   : > { %2514 = vst [vmem:[%s3230_s22 + $0x608] sm:$0xff] %v2258_v37  ;;  %v2260_v50 = vmul.f32 %v2004_v39, %v1748_v38  ;;  %v1749_v51 = vmin.f32 %v1493_v40, 1.0  ;;  %v983_v52 = vsub.f32 %v471_v34, %v727_v35  ;;  %v1495_v53 = vmax.f32 %v1239_v36, 0.0  ;;  %v734_v28 = vld [vmem:[%s3199_s17 + $0x668] sm:$0xff]  ;;  %v479_v34 = vld [vmem:[%s3191_s9 + $0x670] sm:$0xff] }
 0x16c   : > { %2515 = vst [vmem:[%s3230_s22 + $0x610] sm:$0xff] %v2259_v44  ;;  %v1750_v55 = vmin.f32 %v1494_v47, 1.0  ;;  %v2006_v56 = vmul.f32 %v982_v46, %v982_v46  ;;  %v984_v57 = vsub.f32 %v472_v41, %v728_v42  ;;  %v1496_v58 = vmax.f32 %v1240_v43, 0.0  ;;  %v1246_v29 = vld [vmem:[%s3208_s7 + $0x668] sm:$0xff]  ;;  %v735_v35 = vld [vmem:[%s3199_s17 + $0x670] sm:$0xff]  ;;  %v480_v41 = vld [vmem:[%s3191_s9 + $0x678] sm:$0xff] }
 0x16d   : > { %2516 = vst [vmem:[%s3230_s22 + $0x618] sm:$0xff] %v2260_v50  ;;  %v2261_v62 = vmul.f32 %v2005_v45, %v1749_v51  ;;  %v1751_v63 = vmin.f32 %v1495_v53, 1.0  ;;  %v2007_v0 = vmul.f32 %v983_v52, %v983_v52  ;;  %v985_v1 = vsub.f32 %v473_v48, %v729_v49  ;;  %v1247_v36 = vld [vmem:[%s3208_s7 + $0x670] sm:$0xff]  ;;  %v736_v42 = vld [vmem:[%s3199_s17 + $0x678] sm:$0xff]  ;;  %v481_v48 = vld [vmem:[%s3191_s9 + $0x680] sm:$0xff] }
 0x16e   : > { %v2262_v5 = vmul.f32 %v2006_v56, %v1750_v55  ;;  %v1752_v6 = vmin.f32 %v1496_v58, 1.0  ;;  %v2008_v7 = vmul.f32 %v984_v57, %v984_v57  ;;  %v1497_v8 = vmax.f32 %v1241_v54, 0.0  ;;  %v1248_v43 = vld [vmem:[%s3208_s7 + $0x678] sm:$0xff]  ;;  %v737_v49 = vld [vmem:[%s3199_s17 + $0x680] sm:$0xff] }
 0x16f   : > { %2517 = vst [vmem:[%s3230_s22 + $0x620] sm:$0xff] %v2261_v62  ;;  %v2263_v12 = vmul.f32 %v2007_v0, %v1751_v63  ;;  %v2009_v13 = vmul.f32 %v985_v1, %v985_v1  ;;  %v986_v14 = vsub.f32 %v474_v59, %v730_v60  ;;  %v1498_v15 = vmax.f32 %v1242_v61, 0.0  ;;  %v1249_v54 = vld [vmem:[%s3208_s7 + $0x680] sm:$0xff]  ;;  %v482_v59 = vld [vmem:[%s3191_s9 + $0x688] sm:$0xff] }
 0x170   : > { %2518 = vst [vmem:[%s3230_s22 + $0x628] sm:$0xff] %v2262_v5  ;;  %v2264_v18 = vmul.f32 %v2008_v7, %v1752_v6  ;;  %v1753_v19 = vmin.f32 %v1497_v8, 1.0  ;;  %v987_v20 = vsub.f32 %v475_v2, %v731_v3  ;;  %v1499_v21 = vmax.f32 %v1243_v4, 0.0  ;;  %v738_v60 = vld [vmem:[%s3199_s17 + $0x688] sm:$0xff]  ;;  %v483_v2 = vld [vmem:[%s3191_s9 + $0x690] sm:$0xff] }
 0x171   : > { %2519 = vst [vmem:[%s3230_s22 + $0x630] sm:$0xff] %v2263_v12  ;;  %v1754_v23 = vmin.f32 %v1498_v15, 1.0  ;;  %v2010_v24 = vmul.f32 %v986_v14, %v986_v14  ;;  %v988_v25 = vsub.f32 %v476_v9, %v732_v10  ;;  %v1500_v26 = vmax.f32 %v1244_v11, 0.0  ;;  %v1250_v61 = vld [vmem:[%s3208_s7 + $0x688] sm:$0xff]  ;;  %v739_v3 = vld [vmem:[%s3199_s17 + $0x690] sm:$0xff]  ;;  %v484_v9 = vld [vmem:[%s3191_s9 + $0x698] sm:$0xff] }
 0x172   : > { %2520 = vst [vmem:[%s3230_s22 + $0x638] sm:$0xff] %v2264_v18  ;;  %v2265_v30 = vmul.f32 %v2009_v13, %v1753_v19  ;;  %v1755_v31 = vmin.f32 %v1499_v21, 1.0  ;;  %v2011_v32 = vmul.f32 %v987_v20, %v987_v20  ;;  %v989_v33 = vsub.f32 %v477_v16, %v733_v17  ;;  %v1251_v4 = vld [vmem:[%s3208_s7 + $0x690] sm:$0xff]  ;;  %v740_v10 = vld [vmem:[%s3199_s17 + $0x698] sm:$0xff]  ;;  %v485_v16 = vld [vmem:[%s3191_s9 + $0x6a0] sm:$0xff] }
 0x173   : > { %v2266_v37 = vmul.f32 %v2010_v24, %v1754_v23  ;;  %v1756_v38 = vmin.f32 %v1500_v26, 1.0  ;;  %v2012_v39 = vmul.f32 %v988_v25, %v988_v25  ;;  %v1501_v40 = vmax.f32 %v1245_v22, 0.0  ;;  %v1252_v11 = vld [vmem:[%s3208_s7 + $0x698] sm:$0xff]  ;;  %v741_v17 = vld [vmem:[%s3199_s17 + $0x6a0] sm:$0xff] }
 0x174   : > { %2521 = vst [vmem:[%s3230_s22 + $0x640] sm:$0xff] %v2265_v30  ;;  %v2267_v44 = vmul.f32 %v2011_v32, %v1755_v31  ;;  %v2013_v45 = vmul.f32 %v989_v33, %v989_v33  ;;  %v990_v46 = vsub.f32 %v478_v27, %v734_v28  ;;  %v1502_v47 = vmax.f32 %v1246_v29, 0.0  ;;  %v1253_v22 = vld [vmem:[%s3208_s7 + $0x6a0] sm:$0xff]  ;;  %v486_v27 = vld [vmem:[%s3191_s9 + $0x6a8] sm:$0xff] }
 0x175   : > { %2522 = vst [vmem:[%s3230_s22 + $0x648] sm:$0xff] %v2266_v37  ;;  %v2268_v50 = vmul.f32 %v2012_v39, %v1756_v38  ;;  %v1757_v51 = vmin.f32 %v1501_v40, 1.0  ;;  %v991_v52 = vsub.f32 %v479_v34, %v735_v35  ;;  %v1503_v53 = vmax.f32 %v1247_v36, 0.0  ;;  %v742_v28 = vld [vmem:[%s3199_s17 + $0x6a8] sm:$0xff]  ;;  %v487_v34 = vld [vmem:[%s3191_s9 + $0x6b0] sm:$0xff] }
 0x176   : > { %2523 = vst [vmem:[%s3230_s22 + $0x650] sm:$0xff] %v2267_v44  ;;  %v1758_v55 = vmin.f32 %v1502_v47, 1.0  ;;  %v2014_v56 = vmul.f32 %v990_v46, %v990_v46  ;;  %v992_v57 = vsub.f32 %v480_v41, %v736_v42  ;;  %v1504_v58 = vmax.f32 %v1248_v43, 0.0  ;;  %v1254_v29 = vld [vmem:[%s3208_s7 + $0x6a8] sm:$0xff]  ;;  %v743_v35 = vld [vmem:[%s3199_s17 + $0x6b0] sm:$0xff]  ;;  %v488_v41 = vld [vmem:[%s3191_s9 + $0x6b8] sm:$0xff] }
 0x177   : > { %2524 = vst [vmem:[%s3230_s22 + $0x658] sm:$0xff] %v2268_v50  ;;  %v2269_v62 = vmul.f32 %v2013_v45, %v1757_v51  ;;  %v1759_v63 = vmin.f32 %v1503_v53, 1.0  ;;  %v2015_v0 = vmul.f32 %v991_v52, %v991_v52  ;;  %v993_v1 = vsub.f32 %v481_v48, %v737_v49  ;;  %v1255_v36 = vld [vmem:[%s3208_s7 + $0x6b0] sm:$0xff]  ;;  %v744_v42 = vld [vmem:[%s3199_s17 + $0x6b8] sm:$0xff]  ;;  %v489_v48 = vld [vmem:[%s3191_s9 + $0x6c0] sm:$0xff] }
 0x178   : > { %v2270_v5 = vmul.f32 %v2014_v56, %v1758_v55  ;;  %v1760_v6 = vmin.f32 %v1504_v58, 1.0  ;;  %v2016_v7 = vmul.f32 %v992_v57, %v992_v57  ;;  %v1505_v8 = vmax.f32 %v1249_v54, 0.0  ;;  %v1256_v43 = vld [vmem:[%s3208_s7 + $0x6b8] sm:$0xff]  ;;  %v745_v49 = vld [vmem:[%s3199_s17 + $0x6c0] sm:$0xff] }
 0x179   : > { %2525 = vst [vmem:[%s3230_s22 + $0x660] sm:$0xff] %v2269_v62  ;;  %v2271_v12 = vmul.f32 %v2015_v0, %v1759_v63  ;;  %v2017_v13 = vmul.f32 %v993_v1, %v993_v1  ;;  %v994_v14 = vsub.f32 %v482_v59, %v738_v60  ;;  %v1506_v15 = vmax.f32 %v1250_v61, 0.0  ;;  %v1257_v54 = vld [vmem:[%s3208_s7 + $0x6c0] sm:$0xff]  ;;  %v490_v59 = vld [vmem:[%s3191_s9 + $0x6c8] sm:$0xff] }
 0x17a   : > { %2526 = vst [vmem:[%s3230_s22 + $0x668] sm:$0xff] %v2270_v5  ;;  %v2272_v18 = vmul.f32 %v2016_v7, %v1760_v6  ;;  %v1761_v19 = vmin.f32 %v1505_v8, 1.0  ;;  %v995_v20 = vsub.f32 %v483_v2, %v739_v3  ;;  %v1507_v21 = vmax.f32 %v1251_v4, 0.0  ;;  %v746_v60 = vld [vmem:[%s3199_s17 + $0x6c8] sm:$0xff]  ;;  %v491_v2 = vld [vmem:[%s3191_s9 + $0x6d0] sm:$0xff] }
 0x17b   : > { %2527 = vst [vmem:[%s3230_s22 + $0x670] sm:$0xff] %v2271_v12  ;;  %v1762_v23 = vmin.f32 %v1506_v15, 1.0  ;;  %v2018_v24 = vmul.f32 %v994_v14, %v994_v14  ;;  %v996_v25 = vsub.f32 %v484_v9, %v740_v10  ;;  %v1508_v26 = vmax.f32 %v1252_v11, 0.0  ;;  %v1258_v61 = vld [vmem:[%s3208_s7 + $0x6c8] sm:$0xff]  ;;  %v747_v3 = vld [vmem:[%s3199_s17 + $0x6d0] sm:$0xff]  ;;  %v492_v9 = vld [vmem:[%s3191_s9 + $0x6d8] sm:$0xff] }
 0x17c   : > { %2528 = vst [vmem:[%s3230_s22 + $0x678] sm:$0xff] %v2272_v18  ;;  %v2273_v30 = vmul.f32 %v2017_v13, %v1761_v19  ;;  %v1763_v31 = vmin.f32 %v1507_v21, 1.0  ;;  %v2019_v32 = vmul.f32 %v995_v20, %v995_v20  ;;  %v997_v33 = vsub.f32 %v485_v16, %v741_v17  ;;  %v1259_v4 = vld [vmem:[%s3208_s7 + $0x6d0] sm:$0xff]  ;;  %v748_v10 = vld [vmem:[%s3199_s17 + $0x6d8] sm:$0xff]  ;;  %v493_v16 = vld [vmem:[%s3191_s9 + $0x6e0] sm:$0xff] }
 0x17d   : > { %v2274_v37 = vmul.f32 %v2018_v24, %v1762_v23  ;;  %v1764_v38 = vmin.f32 %v1508_v26, 1.0  ;;  %v2020_v39 = vmul.f32 %v996_v25, %v996_v25  ;;  %v1509_v40 = vmax.f32 %v1253_v22, 0.0  ;;  %v1260_v11 = vld [vmem:[%s3208_s7 + $0x6d8] sm:$0xff]  ;;  %v749_v17 = vld [vmem:[%s3199_s17 + $0x6e0] sm:$0xff] }
 0x17e   : > { %2529 = vst [vmem:[%s3230_s22 + $0x680] sm:$0xff] %v2273_v30  ;;  %v2275_v44 = vmul.f32 %v2019_v32, %v1763_v31  ;;  %v2021_v45 = vmul.f32 %v997_v33, %v997_v33  ;;  %v998_v46 = vsub.f32 %v486_v27, %v742_v28  ;;  %v1510_v47 = vmax.f32 %v1254_v29, 0.0  ;;  %v1261_v22 = vld [vmem:[%s3208_s7 + $0x6e0] sm:$0xff]  ;;  %v494_v27 = vld [vmem:[%s3191_s9 + $0x6e8] sm:$0xff] }
 0x17f   : > { %2530 = vst [vmem:[%s3230_s22 + $0x688] sm:$0xff] %v2274_v37  ;;  %v2276_v50 = vmul.f32 %v2020_v39, %v1764_v38  ;;  %v1765_v51 = vmin.f32 %v1509_v40, 1.0  ;;  %v999_v52 = vsub.f32 %v487_v34, %v743_v35  ;;  %v1511_v53 = vmax.f32 %v1255_v36, 0.0  ;;  %v750_v28 = vld [vmem:[%s3199_s17 + $0x6e8] sm:$0xff]  ;;  %v495_v34 = vld [vmem:[%s3191_s9 + $0x6f0] sm:$0xff] }
 0x180   : > { %2531 = vst [vmem:[%s3230_s22 + $0x690] sm:$0xff] %v2275_v44  ;;  %v1766_v55 = vmin.f32 %v1510_v47, 1.0  ;;  %v2022_v56 = vmul.f32 %v998_v46, %v998_v46  ;;  %v1000_v57 = vsub.f32 %v488_v41, %v744_v42  ;;  %v1512_v58 = vmax.f32 %v1256_v43, 0.0  ;;  %v1262_v29 = vld [vmem:[%s3208_s7 + $0x6e8] sm:$0xff]  ;;  %v751_v35 = vld [vmem:[%s3199_s17 + $0x6f0] sm:$0xff]  ;;  %v496_v41 = vld [vmem:[%s3191_s9 + $0x6f8] sm:$0xff] }
 0x181   : > { %2532 = vst [vmem:[%s3230_s22 + $0x698] sm:$0xff] %v2276_v50  ;;  %v2277_v62 = vmul.f32 %v2021_v45, %v1765_v51  ;;  %v1767_v63 = vmin.f32 %v1511_v53, 1.0  ;;  %v2023_v0 = vmul.f32 %v999_v52, %v999_v52  ;;  %v1001_v1 = vsub.f32 %v489_v48, %v745_v49  ;;  %v1263_v36 = vld [vmem:[%s3208_s7 + $0x6f0] sm:$0xff]  ;;  %v752_v42 = vld [vmem:[%s3199_s17 + $0x6f8] sm:$0xff]  ;;  %v497_v48 = vld [vmem:[%s3191_s9 + $0x700] sm:$0xff] }
 0x182   : > { %v2278_v5 = vmul.f32 %v2022_v56, %v1766_v55  ;;  %v1768_v6 = vmin.f32 %v1512_v58, 1.0  ;;  %v2024_v7 = vmul.f32 %v1000_v57, %v1000_v57  ;;  %v1513_v8 = vmax.f32 %v1257_v54, 0.0  ;;  %v1264_v43 = vld [vmem:[%s3208_s7 + $0x6f8] sm:$0xff]  ;;  %v753_v49 = vld [vmem:[%s3199_s17 + $0x700] sm:$0xff] }
 0x183   : > { %2533 = vst [vmem:[%s3230_s22 + $0x6a0] sm:$0xff] %v2277_v62  ;;  %v2279_v12 = vmul.f32 %v2023_v0, %v1767_v63  ;;  %v2025_v13 = vmul.f32 %v1001_v1, %v1001_v1  ;;  %v1002_v14 = vsub.f32 %v490_v59, %v746_v60  ;;  %v1514_v15 = vmax.f32 %v1258_v61, 0.0  ;;  %v1265_v54 = vld [vmem:[%s3208_s7 + $0x700] sm:$0xff]  ;;  %v498_v59 = vld [vmem:[%s3191_s9 + $0x708] sm:$0xff] }
 0x184   : > { %2534 = vst [vmem:[%s3230_s22 + $0x6a8] sm:$0xff] %v2278_v5  ;;  %v2280_v18 = vmul.f32 %v2024_v7, %v1768_v6  ;;  %v1769_v19 = vmin.f32 %v1513_v8, 1.0  ;;  %v1003_v20 = vsub.f32 %v491_v2, %v747_v3  ;;  %v1515_v21 = vmax.f32 %v1259_v4, 0.0  ;;  %v754_v60 = vld [vmem:[%s3199_s17 + $0x708] sm:$0xff]  ;;  %v499_v2 = vld [vmem:[%s3191_s9 + $0x710] sm:$0xff] }
 0x185   : > { %2535 = vst [vmem:[%s3230_s22 + $0x6b0] sm:$0xff] %v2279_v12  ;;  %v1770_v23 = vmin.f32 %v1514_v15, 1.0  ;;  %v2026_v24 = vmul.f32 %v1002_v14, %v1002_v14  ;;  %v1004_v25 = vsub.f32 %v492_v9, %v748_v10  ;;  %v1516_v26 = vmax.f32 %v1260_v11, 0.0  ;;  %v1266_v61 = vld [vmem:[%s3208_s7 + $0x708] sm:$0xff]  ;;  %v755_v3 = vld [vmem:[%s3199_s17 + $0x710] sm:$0xff]  ;;  %v500_v9 = vld [vmem:[%s3191_s9 + $0x718] sm:$0xff] }
 0x186   : > { %2536 = vst [vmem:[%s3230_s22 + $0x6b8] sm:$0xff] %v2280_v18  ;;  %v2281_v30 = vmul.f32 %v2025_v13, %v1769_v19  ;;  %v1771_v31 = vmin.f32 %v1515_v21, 1.0  ;;  %v2027_v32 = vmul.f32 %v1003_v20, %v1003_v20  ;;  %v1005_v33 = vsub.f32 %v493_v16, %v749_v17  ;;  %v1267_v4 = vld [vmem:[%s3208_s7 + $0x710] sm:$0xff]  ;;  %v756_v10 = vld [vmem:[%s3199_s17 + $0x718] sm:$0xff]  ;;  %v501_v16 = vld [vmem:[%s3191_s9 + $0x720] sm:$0xff] }
 0x187   : > { %v2282_v37 = vmul.f32 %v2026_v24, %v1770_v23  ;;  %v1772_v38 = vmin.f32 %v1516_v26, 1.0  ;;  %v2028_v39 = vmul.f32 %v1004_v25, %v1004_v25  ;;  %v1517_v40 = vmax.f32 %v1261_v22, 0.0  ;;  %v1268_v11 = vld [vmem:[%s3208_s7 + $0x718] sm:$0xff]  ;;  %v757_v17 = vld [vmem:[%s3199_s17 + $0x720] sm:$0xff] }
 0x188   : > { %2537 = vst [vmem:[%s3230_s22 + $0x6c0] sm:$0xff] %v2281_v30  ;;  %v2283_v44 = vmul.f32 %v2027_v32, %v1771_v31  ;;  %v2029_v45 = vmul.f32 %v1005_v33, %v1005_v33  ;;  %v1006_v46 = vsub.f32 %v494_v27, %v750_v28  ;;  %v1518_v47 = vmax.f32 %v1262_v29, 0.0  ;;  %v1269_v22 = vld [vmem:[%s3208_s7 + $0x720] sm:$0xff]  ;;  %v502_v27 = vld [vmem:[%s3191_s9 + $0x728] sm:$0xff] }
 0x189   : > { %2538 = vst [vmem:[%s3230_s22 + $0x6c8] sm:$0xff] %v2282_v37  ;;  %v2284_v50 = vmul.f32 %v2028_v39, %v1772_v38  ;;  %v1773_v51 = vmin.f32 %v1517_v40, 1.0  ;;  %v1007_v52 = vsub.f32 %v495_v34, %v751_v35  ;;  %v1519_v53 = vmax.f32 %v1263_v36, 0.0  ;;  %v758_v28 = vld [vmem:[%s3199_s17 + $0x728] sm:$0xff]  ;;  %v503_v34 = vld [vmem:[%s3191_s9 + $0x730] sm:$0xff] }
 0x18a   : > { %2539 = vst [vmem:[%s3230_s22 + $0x6d0] sm:$0xff] %v2283_v44  ;;  %v1774_v55 = vmin.f32 %v1518_v47, 1.0  ;;  %v2030_v56 = vmul.f32 %v1006_v46, %v1006_v46  ;;  %v1008_v57 = vsub.f32 %v496_v41, %v752_v42  ;;  %v1520_v58 = vmax.f32 %v1264_v43, 0.0  ;;  %v1270_v29 = vld [vmem:[%s3208_s7 + $0x728] sm:$0xff]  ;;  %v759_v35 = vld [vmem:[%s3199_s17 + $0x730] sm:$0xff]  ;;  %v504_v41 = vld [vmem:[%s3191_s9 + $0x738] sm:$0xff] }
 0x18b   : > { %2540 = vst [vmem:[%s3230_s22 + $0x6d8] sm:$0xff] %v2284_v50  ;;  %v2285_v62 = vmul.f32 %v2029_v45, %v1773_v51  ;;  %v1775_v63 = vmin.f32 %v1519_v53, 1.0  ;;  %v2031_v0 = vmul.f32 %v1007_v52, %v1007_v52  ;;  %v1009_v1 = vsub.f32 %v497_v48, %v753_v49  ;;  %v1271_v36 = vld [vmem:[%s3208_s7 + $0x730] sm:$0xff]  ;;  %v760_v42 = vld [vmem:[%s3199_s17 + $0x738] sm:$0xff]  ;;  %v505_v48 = vld [vmem:[%s3191_s9 + $0x740] sm:$0xff] }
 0x18c   : > { %v2286_v5 = vmul.f32 %v2030_v56, %v1774_v55  ;;  %v1776_v6 = vmin.f32 %v1520_v58, 1.0  ;;  %v2032_v7 = vmul.f32 %v1008_v57, %v1008_v57  ;;  %v1521_v8 = vmax.f32 %v1265_v54, 0.0  ;;  %v1272_v43 = vld [vmem:[%s3208_s7 + $0x738] sm:$0xff]  ;;  %v761_v49 = vld [vmem:[%s3199_s17 + $0x740] sm:$0xff] }
 0x18d   : > { %2541 = vst [vmem:[%s3230_s22 + $0x6e0] sm:$0xff] %v2285_v62  ;;  %v2287_v12 = vmul.f32 %v2031_v0, %v1775_v63  ;;  %v2033_v13 = vmul.f32 %v1009_v1, %v1009_v1  ;;  %v1010_v14 = vsub.f32 %v498_v59, %v754_v60  ;;  %v1522_v15 = vmax.f32 %v1266_v61, 0.0  ;;  %v1273_v54 = vld [vmem:[%s3208_s7 + $0x740] sm:$0xff]  ;;  %v506_v59 = vld [vmem:[%s3191_s9 + $0x748] sm:$0xff] }
 0x18e   : > { %2542 = vst [vmem:[%s3230_s22 + $0x6e8] sm:$0xff] %v2286_v5  ;;  %v2288_v18 = vmul.f32 %v2032_v7, %v1776_v6  ;;  %v1777_v19 = vmin.f32 %v1521_v8, 1.0  ;;  %v1011_v20 = vsub.f32 %v499_v2, %v755_v3  ;;  %v1523_v21 = vmax.f32 %v1267_v4, 0.0  ;;  %v762_v60 = vld [vmem:[%s3199_s17 + $0x748] sm:$0xff]  ;;  %v507_v2 = vld [vmem:[%s3191_s9 + $0x750] sm:$0xff] }
 0x18f   : > { %2543 = vst [vmem:[%s3230_s22 + $0x6f0] sm:$0xff] %v2287_v12  ;;  %v1778_v23 = vmin.f32 %v1522_v15, 1.0  ;;  %v2034_v24 = vmul.f32 %v1010_v14, %v1010_v14  ;;  %v1012_v25 = vsub.f32 %v500_v9, %v756_v10  ;;  %v1524_v26 = vmax.f32 %v1268_v11, 0.0  ;;  %v1274_v61 = vld [vmem:[%s3208_s7 + $0x748] sm:$0xff]  ;;  %v763_v3 = vld [vmem:[%s3199_s17 + $0x750] sm:$0xff]  ;;  %v508_v9 = vld [vmem:[%s3191_s9 + $0x758] sm:$0xff] }
 0x190   : > { %2544 = vst [vmem:[%s3230_s22 + $0x6f8] sm:$0xff] %v2288_v18  ;;  %v2289_v30 = vmul.f32 %v2033_v13, %v1777_v19  ;;  %v1779_v31 = vmin.f32 %v1523_v21, 1.0  ;;  %v2035_v32 = vmul.f32 %v1011_v20, %v1011_v20  ;;  %v1013_v33 = vsub.f32 %v501_v16, %v757_v17  ;;  %v1275_v4 = vld [vmem:[%s3208_s7 + $0x750] sm:$0xff]  ;;  %v764_v10 = vld [vmem:[%s3199_s17 + $0x758] sm:$0xff]  ;;  %v509_v16 = vld [vmem:[%s3191_s9 + $0x760] sm:$0xff] }
 0x191   : > { %v2290_v37 = vmul.f32 %v2034_v24, %v1778_v23  ;;  %v1780_v38 = vmin.f32 %v1524_v26, 1.0  ;;  %v2036_v39 = vmul.f32 %v1012_v25, %v1012_v25  ;;  %v1525_v40 = vmax.f32 %v1269_v22, 0.0  ;;  %v1276_v11 = vld [vmem:[%s3208_s7 + $0x758] sm:$0xff]  ;;  %v765_v17 = vld [vmem:[%s3199_s17 + $0x760] sm:$0xff] }
 0x192   : > { %2545 = vst [vmem:[%s3230_s22 + $0x700] sm:$0xff] %v2289_v30  ;;  %v2291_v44 = vmul.f32 %v2035_v32, %v1779_v31  ;;  %v2037_v45 = vmul.f32 %v1013_v33, %v1013_v33  ;;  %v1014_v46 = vsub.f32 %v502_v27, %v758_v28  ;;  %v1526_v47 = vmax.f32 %v1270_v29, 0.0  ;;  %v1277_v22 = vld [vmem:[%s3208_s7 + $0x760] sm:$0xff]  ;;  %v510_v27 = vld [vmem:[%s3191_s9 + $0x768] sm:$0xff] }
 0x193   : > { %2546 = vst [vmem:[%s3230_s22 + $0x708] sm:$0xff] %v2290_v37  ;;  %v2292_v50 = vmul.f32 %v2036_v39, %v1780_v38  ;;  %v1781_v51 = vmin.f32 %v1525_v40, 1.0  ;;  %v1015_v52 = vsub.f32 %v503_v34, %v759_v35  ;;  %v1527_v53 = vmax.f32 %v1271_v36, 0.0  ;;  %v766_v28 = vld [vmem:[%s3199_s17 + $0x768] sm:$0xff]  ;;  %v511_v34 = vld [vmem:[%s3191_s9 + $0x770] sm:$0xff] }
 0x194   : > { %2547 = vst [vmem:[%s3230_s22 + $0x710] sm:$0xff] %v2291_v44  ;;  %v1782_v55 = vmin.f32 %v1526_v47, 1.0  ;;  %v2038_v56 = vmul.f32 %v1014_v46, %v1014_v46  ;;  %v1016_v57 = vsub.f32 %v504_v41, %v760_v42  ;;  %v1528_v58 = vmax.f32 %v1272_v43, 0.0  ;;  %v1278_v29 = vld [vmem:[%s3208_s7 + $0x768] sm:$0xff]  ;;  %v767_v35 = vld [vmem:[%s3199_s17 + $0x770] sm:$0xff]  ;;  %v512_v41 = vld [vmem:[%s3191_s9 + $0x778] sm:$0xff] }
 0x195   : > { %2548 = vst [vmem:[%s3230_s22 + $0x718] sm:$0xff] %v2292_v50  ;;  %v2293_v62 = vmul.f32 %v2037_v45, %v1781_v51  ;;  %v1783_v63 = vmin.f32 %v1527_v53, 1.0  ;;  %v2039_v0 = vmul.f32 %v1015_v52, %v1015_v52  ;;  %v1017_v1 = vsub.f32 %v505_v48, %v761_v49  ;;  %v1279_v36 = vld [vmem:[%s3208_s7 + $0x770] sm:$0xff]  ;;  %v768_v42 = vld [vmem:[%s3199_s17 + $0x778] sm:$0xff]  ;;  %v513_v48 = vld [vmem:[%s3191_s9 + $0x780] sm:$0xff] }
 0x196   : > { %v2294_v5 = vmul.f32 %v2038_v56, %v1782_v55  ;;  %v1784_v6 = vmin.f32 %v1528_v58, 1.0  ;;  %v2040_v7 = vmul.f32 %v1016_v57, %v1016_v57  ;;  %v1529_v8 = vmax.f32 %v1273_v54, 0.0  ;;  %v1280_v43 = vld [vmem:[%s3208_s7 + $0x778] sm:$0xff]  ;;  %v769_v49 = vld [vmem:[%s3199_s17 + $0x780] sm:$0xff] }
 0x197   : > { %2549 = vst [vmem:[%s3230_s22 + $0x720] sm:$0xff] %v2293_v62  ;;  %v2295_v12 = vmul.f32 %v2039_v0, %v1783_v63  ;;  %v2041_v13 = vmul.f32 %v1017_v1, %v1017_v1  ;;  %v1018_v14 = vsub.f32 %v506_v59, %v762_v60  ;;  %v1530_v15 = vmax.f32 %v1274_v61, 0.0  ;;  %v1281_v54 = vld [vmem:[%s3208_s7 + $0x780] sm:$0xff]  ;;  %v514_v59 = vld [vmem:[%s3191_s9 + $0x788] sm:$0xff] }
 0x198   : > { %2550 = vst [vmem:[%s3230_s22 + $0x728] sm:$0xff] %v2294_v5  ;;  %v2296_v18 = vmul.f32 %v2040_v7, %v1784_v6  ;;  %v1785_v19 = vmin.f32 %v1529_v8, 1.0  ;;  %v1019_v20 = vsub.f32 %v507_v2, %v763_v3  ;;  %v1531_v21 = vmax.f32 %v1275_v4, 0.0  ;;  %v770_v60 = vld [vmem:[%s3199_s17 + $0x788] sm:$0xff]  ;;  %v515_v2 = vld [vmem:[%s3191_s9 + $0x790] sm:$0xff] }
 0x199   : > { %2551 = vst [vmem:[%s3230_s22 + $0x730] sm:$0xff] %v2295_v12  ;;  %v1786_v23 = vmin.f32 %v1530_v15, 1.0  ;;  %v2042_v24 = vmul.f32 %v1018_v14, %v1018_v14  ;;  %v1020_v25 = vsub.f32 %v508_v9, %v764_v10  ;;  %v1532_v26 = vmax.f32 %v1276_v11, 0.0  ;;  %v1282_v61 = vld [vmem:[%s3208_s7 + $0x788] sm:$0xff]  ;;  %v771_v3 = vld [vmem:[%s3199_s17 + $0x790] sm:$0xff]  ;;  %v516_v9 = vld [vmem:[%s3191_s9 + $0x798] sm:$0xff] }
 0x19a   : > { %2552 = vst [vmem:[%s3230_s22 + $0x738] sm:$0xff] %v2296_v18  ;;  %v2297_v30 = vmul.f32 %v2041_v13, %v1785_v19  ;;  %v1787_v31 = vmin.f32 %v1531_v21, 1.0  ;;  %v2043_v32 = vmul.f32 %v1019_v20, %v1019_v20  ;;  %v1021_v33 = vsub.f32 %v509_v16, %v765_v17  ;;  %v1283_v4 = vld [vmem:[%s3208_s7 + $0x790] sm:$0xff]  ;;  %v772_v10 = vld [vmem:[%s3199_s17 + $0x798] sm:$0xff]  ;;  %v517_v16 = vld [vmem:[%s3191_s9 + $0x7a0] sm:$0xff] }
 0x19b   : > { %v2298_v37 = vmul.f32 %v2042_v24, %v1786_v23  ;;  %v1788_v38 = vmin.f32 %v1532_v26, 1.0  ;;  %v2044_v39 = vmul.f32 %v1020_v25, %v1020_v25  ;;  %v1533_v40 = vmax.f32 %v1277_v22, 0.0  ;;  %v1284_v11 = vld [vmem:[%s3208_s7 + $0x798] sm:$0xff]  ;;  %v773_v17 = vld [vmem:[%s3199_s17 + $0x7a0] sm:$0xff] }
 0x19c   : > { %2553 = vst [vmem:[%s3230_s22 + $0x740] sm:$0xff] %v2297_v30  ;;  %v2299_v44 = vmul.f32 %v2043_v32, %v1787_v31  ;;  %v2045_v45 = vmul.f32 %v1021_v33, %v1021_v33  ;;  %v1022_v46 = vsub.f32 %v510_v27, %v766_v28  ;;  %v1534_v47 = vmax.f32 %v1278_v29, 0.0  ;;  %v1285_v22 = vld [vmem:[%s3208_s7 + $0x7a0] sm:$0xff]  ;;  %v518_v27 = vld [vmem:[%s3191_s9 + $0x7a8] sm:$0xff] }
 0x19d   : > { %2554 = vst [vmem:[%s3230_s22 + $0x748] sm:$0xff] %v2298_v37  ;;  %v2300_v50 = vmul.f32 %v2044_v39, %v1788_v38  ;;  %v1789_v51 = vmin.f32 %v1533_v40, 1.0  ;;  %v1023_v52 = vsub.f32 %v511_v34, %v767_v35  ;;  %v1535_v53 = vmax.f32 %v1279_v36, 0.0  ;;  %v774_v28 = vld [vmem:[%s3199_s17 + $0x7a8] sm:$0xff]  ;;  %v519_v34 = vld [vmem:[%s3191_s9 + $0x7b0] sm:$0xff] }
 0x19e   : > { %2555 = vst [vmem:[%s3230_s22 + $0x750] sm:$0xff] %v2299_v44  ;;  %v1790_v55 = vmin.f32 %v1534_v47, 1.0  ;;  %v2046_v56 = vmul.f32 %v1022_v46, %v1022_v46  ;;  %v1024_v57 = vsub.f32 %v512_v41, %v768_v42  ;;  %v1536_v58 = vmax.f32 %v1280_v43, 0.0  ;;  %v1286_v29 = vld [vmem:[%s3208_s7 + $0x7a8] sm:$0xff]  ;;  %v775_v35 = vld [vmem:[%s3199_s17 + $0x7b0] sm:$0xff]  ;;  %v520_v41 = vld [vmem:[%s3191_s9 + $0x7b8] sm:$0xff] }
 0x19f   : > { %2556 = vst [vmem:[%s3230_s22 + $0x758] sm:$0xff] %v2300_v50  ;;  %v2301_v62 = vmul.f32 %v2045_v45, %v1789_v51  ;;  %v1791_v63 = vmin.f32 %v1535_v53, 1.0  ;;  %v2047_v0 = vmul.f32 %v1023_v52, %v1023_v52  ;;  %v1025_v1 = vsub.f32 %v513_v48, %v769_v49  ;;  %v1287_v36 = vld [vmem:[%s3208_s7 + $0x7b0] sm:$0xff]  ;;  %v776_v42 = vld [vmem:[%s3199_s17 + $0x7b8] sm:$0xff]  ;;  %v521_v48 = vld [vmem:[%s3191_s9 + $0x7c0] sm:$0xff] }
 0x1a0   : > { %v2302_v5 = vmul.f32 %v2046_v56, %v1790_v55  ;;  %v1792_v6 = vmin.f32 %v1536_v58, 1.0  ;;  %v2048_v7 = vmul.f32 %v1024_v57, %v1024_v57  ;;  %v1537_v8 = vmax.f32 %v1281_v54, 0.0  ;;  %v1288_v43 = vld [vmem:[%s3208_s7 + $0x7b8] sm:$0xff]  ;;  %v777_v49 = vld [vmem:[%s3199_s17 + $0x7c0] sm:$0xff] }
 0x1a1   : > { %2557 = vst [vmem:[%s3230_s22 + $0x760] sm:$0xff] %v2301_v62  ;;  %v2303_v12 = vmul.f32 %v2047_v0, %v1791_v63  ;;  %v2049_v13 = vmul.f32 %v1025_v1, %v1025_v1  ;;  %v1026_v14 = vsub.f32 %v514_v59, %v770_v60  ;;  %v1538_v15 = vmax.f32 %v1282_v61, 0.0  ;;  %v1289_v54 = vld [vmem:[%s3208_s7 + $0x7c0] sm:$0xff]  ;;  %v522_v59 = vld [vmem:[%s3191_s9 + $0x7c8] sm:$0xff] }
 0x1a2   : > { %2558 = vst [vmem:[%s3230_s22 + $0x768] sm:$0xff] %v2302_v5  ;;  %v2304_v18 = vmul.f32 %v2048_v7, %v1792_v6  ;;  %v1793_v19 = vmin.f32 %v1537_v8, 1.0  ;;  %v1027_v20 = vsub.f32 %v515_v2, %v771_v3  ;;  %v1539_v21 = vmax.f32 %v1283_v4, 0.0  ;;  %v778_v60 = vld [vmem:[%s3199_s17 + $0x7c8] sm:$0xff]  ;;  %v523_v2 = vld [vmem:[%s3191_s9 + $0x7d0] sm:$0xff] }
 0x1a3   : > { %2559 = vst [vmem:[%s3230_s22 + $0x770] sm:$0xff] %v2303_v12  ;;  %v1794_v23 = vmin.f32 %v1538_v15, 1.0  ;;  %v2050_v24 = vmul.f32 %v1026_v14, %v1026_v14  ;;  %v1028_v25 = vsub.f32 %v516_v9, %v772_v10  ;;  %v1540_v26 = vmax.f32 %v1284_v11, 0.0  ;;  %v1290_v61 = vld [vmem:[%s3208_s7 + $0x7c8] sm:$0xff]  ;;  %v779_v3 = vld [vmem:[%s3199_s17 + $0x7d0] sm:$0xff]  ;;  %v524_v9 = vld [vmem:[%s3191_s9 + $0x7d8] sm:$0xff] }
 0x1a4   : > { %2560 = vst [vmem:[%s3230_s22 + $0x778] sm:$0xff] %v2304_v18  ;;  %v2305_v30 = vmul.f32 %v2049_v13, %v1793_v19  ;;  %v1795_v31 = vmin.f32 %v1539_v21, 1.0  ;;  %v2051_v32 = vmul.f32 %v1027_v20, %v1027_v20  ;;  %v1029_v33 = vsub.f32 %v517_v16, %v773_v17  ;;  %v1291_v4 = vld [vmem:[%s3208_s7 + $0x7d0] sm:$0xff]  ;;  %v780_v10 = vld [vmem:[%s3199_s17 + $0x7d8] sm:$0xff]  ;;  %v525_v16 = vld [vmem:[%s3191_s9 + $0x7e0] sm:$0xff] }
 0x1a5   : > { %v2306_v37 = vmul.f32 %v2050_v24, %v1794_v23  ;;  %v1796_v38 = vmin.f32 %v1540_v26, 1.0  ;;  %v2052_v39 = vmul.f32 %v1028_v25, %v1028_v25  ;;  %v1541_v40 = vmax.f32 %v1285_v22, 0.0  ;;  %v1292_v11 = vld [vmem:[%s3208_s7 + $0x7d8] sm:$0xff]  ;;  %v781_v17 = vld [vmem:[%s3199_s17 + $0x7e0] sm:$0xff] }
 0x1a6   : > { %2561 = vst [vmem:[%s3230_s22 + $0x780] sm:$0xff] %v2305_v30  ;;  %v2307_v44 = vmul.f32 %v2051_v32, %v1795_v31  ;;  %v2053_v45 = vmul.f32 %v1029_v33, %v1029_v33  ;;  %v1030_v46 = vsub.f32 %v518_v27, %v774_v28  ;;  %v1542_v47 = vmax.f32 %v1286_v29, 0.0  ;;  %v1293_v22 = vld [vmem:[%s3208_s7 + $0x7e0] sm:$0xff]  ;;  %v526_v27 = vld [vmem:[%s3191_s9 + $0x7e8] sm:$0xff] }
 0x1a7   : > { %2562 = vst [vmem:[%s3230_s22 + $0x788] sm:$0xff] %v2306_v37  ;;  %v2308_v50 = vmul.f32 %v2052_v39, %v1796_v38  ;;  %v1797_v51 = vmin.f32 %v1541_v40, 1.0  ;;  %v1031_v52 = vsub.f32 %v519_v34, %v775_v35  ;;  %v1543_v53 = vmax.f32 %v1287_v36, 0.0  ;;  %v782_v28 = vld [vmem:[%s3199_s17 + $0x7e8] sm:$0xff]  ;;  %v527_v34 = vld [vmem:[%s3191_s9 + $0x7f0] sm:$0xff] }
 0x1a8   : > { %2563 = vst [vmem:[%s3230_s22 + $0x790] sm:$0xff] %v2307_v44  ;;  %v1798_v55 = vmin.f32 %v1542_v47, 1.0  ;;  %v2054_v56 = vmul.f32 %v1030_v46, %v1030_v46  ;;  %v1032_v57 = vsub.f32 %v520_v41, %v776_v42  ;;  %v1544_v58 = vmax.f32 %v1288_v43, 0.0  ;;  %v1294_v29 = vld [vmem:[%s3208_s7 + $0x7e8] sm:$0xff]  ;;  %v783_v35 = vld [vmem:[%s3199_s17 + $0x7f0] sm:$0xff]  ;;  %v528_v41 = vld [vmem:[%s3191_s9 + $0x7f8] sm:$0xff] }
 0x1a9   : > { %2564 = vst [vmem:[%s3230_s22 + $0x798] sm:$0xff] %v2308_v50  ;;  %v2309_v62 = vmul.f32 %v2053_v45, %v1797_v51  ;;  %v1799_v63 = vmin.f32 %v1543_v53, 1.0  ;;  %v2055_v0 = vmul.f32 %v1031_v52, %v1031_v52  ;;  %v1033_v1 = vsub.f32 %v521_v48, %v777_v49  ;;  %v1295_v36 = vld [vmem:[%s3208_s7 + $0x7f0] sm:$0xff]  ;;  %v784_v42 = vld [vmem:[%s3199_s17 + $0x7f8] sm:$0xff] }
 0x1aa   : > { %v2310_v5 = vmul.f32 %v2054_v56, %v1798_v55  ;;  %v1800_v6 = vmin.f32 %v1544_v58, 1.0  ;;  %v2056_v7 = vmul.f32 %v1032_v57, %v1032_v57  ;;  %v1545_v8 = vmax.f32 %v1289_v54, 0.0  ;;  %v1296_v43 = vld [vmem:[%s3208_s7 + $0x7f8] sm:$0xff] }
 0x1ab   : > { %2565 = vst [vmem:[%s3230_s22 + $0x7a0] sm:$0xff] %v2309_v62  ;;  %v2311_v12 = vmul.f32 %v2055_v0, %v1799_v63  ;;  %v2057_v13 = vmul.f32 %v1033_v1, %v1033_v1  ;;  %v1034_v14 = vsub.f32 %v522_v59, %v778_v60  ;;  %v1546_v15 = vmax.f32 %v1290_v61, 0.0 }
 0x1ac   : > { %2566 = vst [vmem:[%s3230_s22 + $0x7a8] sm:$0xff] %v2310_v5  ;;  %v2312_v18 = vmul.f32 %v2056_v7, %v1800_v6  ;;  %v1801_v19 = vmin.f32 %v1545_v8, 1.0  ;;  %v1035_v20 = vsub.f32 %v523_v2, %v779_v3  ;;  %v1547_v21 = vmax.f32 %v1291_v4, 0.0 }
 0x1ad   : > { %2567 = vst [vmem:[%s3230_s22 + $0x7b0] sm:$0xff] %v2311_v12  ;;  %v1802_v23 = vmin.f32 %v1546_v15, 1.0  ;;  %v2058_v24 = vmul.f32 %v1034_v14, %v1034_v14  ;;  %v1036_v25 = vsub.f32 %v524_v9, %v780_v10  ;;  %v1548_v26 = vmax.f32 %v1292_v11, 0.0 }
 0x1ae   : > { %2568 = vst [vmem:[%s3230_s22 + $0x7b8] sm:$0xff] %v2312_v18  ;;  %v2313_v30 = vmul.f32 %v2057_v13, %v1801_v19  ;;  %v1803_v31 = vmin.f32 %v1547_v21, 1.0  ;;  %v2059_v32 = vmul.f32 %v1035_v20, %v1035_v20  ;;  %v1037_v33 = vsub.f32 %v525_v16, %v781_v17 }
 0x1af   : > { %v2314_v37 = vmul.f32 %v2058_v24, %v1802_v23  ;;  %v1804_v38 = vmin.f32 %v1548_v26, 1.0  ;;  %v2060_v39 = vmul.f32 %v1036_v25, %v1036_v25  ;;  %v1549_v40 = vmax.f32 %v1293_v22, 0.0 }
 0x1b0   : > { %2569 = vst [vmem:[%s3230_s22 + $0x7c0] sm:$0xff] %v2313_v30  ;;  %v2315_v44 = vmul.f32 %v2059_v32, %v1803_v31  ;;  %v2061_v45 = vmul.f32 %v1037_v33, %v1037_v33  ;;  %v1038_v46 = vsub.f32 %v526_v27, %v782_v28  ;;  %v1550_v47 = vmax.f32 %v1294_v29, 0.0 }
 0x1b1   : > { %2570 = vst [vmem:[%s3230_s22 + $0x7c8] sm:$0xff] %v2314_v37  ;;  %v2316_v48 = vmul.f32 %v2060_v39, %v1804_v38  ;;  %v1805_v49 = vmin.f32 %v1549_v40, 1.0  ;;  %v1039_v50 = vsub.f32 %v527_v34, %v783_v35  ;;  %v1551_v51 = vmax.f32 %v1295_v36, 0.0 }
 0x1b2   : > { %2571 = vst [vmem:[%s3230_s22 + $0x7d0] sm:$0xff] %v2315_v44  ;;  %v1806_v52 = vmin.f32 %v1550_v47, 1.0  ;;  %v2062_v53 = vmul.f32 %v1038_v46, %v1038_v46  ;;  %v1040_v54 = vsub.f32 %v528_v41, %v784_v42  ;;  %v1552_v55 = vmax.f32 %v1296_v43, 0.0 }
 0x1b3   : > { %2572 = vst [vmem:[%s3230_s22 + $0x7d8] sm:$0xff] %v2316_v48  ;;  %v2317_v56 = vmul.f32 %v2061_v45, %v1805_v49  ;;  %v1807_v57 = vmin.f32 %v1551_v51, 1.0  ;;  %v2063_v58 = vmul.f32 %v1039_v50, %v1039_v50 }
 0x1b4   : > { %v2318_v59 = vmul.f32 %v2062_v53, %v1806_v52  ;;  %v1808_v60 = vmin.f32 %v1552_v55, 1.0  ;;  %v2064_v61 = vmul.f32 %v1040_v54, %v1040_v54 }
 0x1b5   : > { %2573 = vst [vmem:[%s3230_s22 + $0x7e0] sm:$0xff] %v2317_v56  ;;  %v2319_v62 = vmul.f32 %v2063_v58, %v1807_v57 }
 0x1b6   : > { %2574 = vst [vmem:[%s3230_s22 + $0x7e8] sm:$0xff] %v2318_v59  ;;  %v2320_v63 = vmul.f32 %v2064_v61, %v1808_v60 }
 0x1b7   : > { %2575 = vst [vmem:[%s3230_s22 + $0x7f0] sm:$0xff] %v2319_v62 }
 0x1b8   : > { %2576 = vst [vmem:[%s3230_s22 + $0x7f8] sm:$0xff] %v2320_v63 }
 0x1b9   : > { %2905 = shalt.err (!%p2902_p10)
}
 0x1ba   : > { %s2906_s20 = scalar_lea.hbm %s4237_s5, 32768  ;;  %s2910_s9 = scalar_lea.hbm %s4289_s3, 65536 }
 0x1bb   : > { %p2907_p11 = scmp.ne.s32.totalorder %s4237_s5, %s2906_s20  ;;  %p2911_p5 = scmp.lt.u32.totalorder %s4237_s5, %s4289_s3 }
 0x1bc   : > { %p2912_p2 = scmp.lt.u32.totalorder %s2910_s9, %s2906_s20  ;;  %p2914_p13 = scmp.lt.u32.totalorder %s2906_s20, %s4237_s5 }
 0x1bd   : > { %p2908_p4 = pnand %p2907_p11, %p4309_p7 }
 0x1be   : > { %p2913_p1 = por %p2912_p2, %p2911_p5 }
 0x1bf   : > { %p2909_p3 = pneg %p2908_p4 }
 0x1c0   : > { %p2915_p6 = por %p2914_p13, %p2913_p1 }
 0x1c2   : > { %p2916_p9 = pnand %p2915_p6, %p2909_p3 }
 0x1c4   : > { %2919 = shalt.err (!%p2916_p9)
}
 0x1c5   : > { %s2970_s17 = smov 2048   ;;  %s2971_s7 = smov 128  }
 0x1c6   : > { %2748 = dma.vmem_to_hbm [thread:$0]  (%p4309_p7), %s4239_s11, 32768, %s4237_s5, %s2578_s16, %s2970_s17, %s2970_s17, %s2971_s7  }
 0x1c7 PF: > { %s2607_s22 = sand.u32 1, %s2950_s12   ;;  %p4310_p12 = scmp.ne.s32.totalorder %s4299_s24, 0 }
 0x1c8   : > { %p4311_p0 = scmp.ge.s32.totalorder %s2962_s15, 2  ;;  %s2608_s4 = scalar_lea.sflag [#allocation4], %s2607_s22 }
 0x1ca   : > { %p2761_p8 = pnand %p4311_p0, %p4310_p12 }
 0x1cc   : > { %2945 = dma.done.wait (!%p2761_p8), %s2608_s4, 32768  }
 0x1cd   : > { %2947 = vsyncadd (!%p2761_p8), %s2608_s4, 4294934528  ;;  %p19_p10 = scmp.ge.s32.totalorder %s3017_s18, 4   ;;  %s4312_s12 = smov %s2954_s13 }
 0x1ce   : > { %s4313_s13 = smov %s2958_s14  ;;  %s4314_s14 = smov %s3029_s21 }
 0x1cf   : > { %s4315_s15 = smov %s3017_s18  ;;  %21 = sbr.rel (!%p19_p10) target bundleno = 9 (0x9), region = 101 }
 0x1d6   :  { %2613 = vsyncpa [#allocation3], 1 }
 0x1d7   :  { %2615 = vsyncpa [#allocation3 + $0x1], 1 }
 0x1d8   :  { %2616 = vsyncpa [#allocation6], 1 }
 0x1d9   :  { %2618 = vsyncpa [#allocation6 + $0x1], 1 }
 0x1da   :  { %2619 = vsyncpa [#allocation4], 1 }
 0x1db   :  { %2621 = vsyncpa [#allocation4 + $0x1], 1 }

</bundles_post_ra>
